<compile_context>
chip_gen: v6e
topology: v6e:2x2x1
jax: 0.10.0
libtpu: 0.0.40
codegen_flags: <defaults>
</compile_context>

<pallas_src>
import math
from functools import partial

import jax
import jax.numpy as jnp
from jax import lax
from jax.experimental import pallas as pl
from jax.experimental.pallas import tpu as pltpu


# ----------------------------------------------------------------------------
# In-kernel building blocks (operate on VMEM-resident *values*, not refs)
# ----------------------------------------------------------------------------

def _linear(x, w, b, activation=None):
    # x: (M, K), w: (K, N) (pre-transposed from torch layout), b: (1, N)
    y = jnp.dot(x, w, preferred_element_type=jnp.float32) + b
    if activation == "relu":
        y = jnp.maximum(y, 0.0)
    return y


def _layernorm(x, g, b, eps=1e-5):
    # x: (M, D), g/b: (1, D); normalize over the last dim (torch LayerNorm).
    mean = jnp.mean(x, axis=-1, keepdims=True)
    var = jnp.mean((x - mean) ** 2, axis=-1, keepdims=True)
    return (x - mean) * lax.rsqrt(var + eps) * g + b


def _mha(q_in, kv_in, p, nhead, *, fused_qkv):
    """Multi-head attention for ONE batch element.

    q_in: (Sq, D), kv_in: (Skv, D).  p["w_in"]: (D, 3D), p["b_in"]: (1, 3D),
    p["w_out"]: (D, D), p["b_out"]: (1, D).  Matches torch MHA semantics.
    """
    D = q_in.shape[-1]
    dh = D // nhead
    scale = 1.0 / math.sqrt(dh)
    w_in, b_in = p["w_in"], p["b_in"]

    if fused_qkv:
        # self-attention: one fused (Sq,D)x(D,3D) projection
        qkv = jnp.dot(q_in, w_in, preferred_element_type=jnp.float32) + b_in
        q, k, v = qkv[:, :D], qkv[:, D:2 * D], qkv[:, 2 * D:]
    else:
        # cross-attention: Q from q_in, fused K/V from kv_in
        q = jnp.dot(q_in, w_in[:, :D],
                    preferred_element_type=jnp.float32) + b_in[:, :D]
        kv = jnp.dot(kv_in, w_in[:, D:],
                     preferred_element_type=jnp.float32) + b_in[:, D:]
        k, v = kv[:, :D], kv[:, D:]

    # Static unroll over heads; head-merge is folded into the output
    # projection by accumulating per-head partial out-proj matmuls.
    acc = None
    for h in range(nhead):
        lo = h * dh
        q_h = q[:, lo:lo + dh]
        k_h = k[:, lo:lo + dh]
        v_h = v[:, lo:lo + dh]
        # scores = q_h @ k_h^T without an explicit transpose op
        s = lax.dot_general(q_h, k_h, (((1,), (1,)), ((), ())),
                            preferred_element_type=jnp.float32) * scale
        s = s - jnp.max(s, axis=-1, keepdims=True)
        e = jnp.exp(s)
        pr = e * pl.reciprocal(jnp.sum(e, axis=-1, keepdims=True), approx=True)
        h_out = jnp.dot(pr, v_h, preferred_element_type=jnp.float32)   # (Sq, dh)
        contrib = jnp.dot(h_out, p["w_out"][lo:lo + dh, :],
                          preferred_element_type=jnp.float32)          # (Sq, D)
        acc = contrib if acc is None else acc + contrib
    return acc + p["b_out"]


def _encoder_layer(x, lp, nhead):
    # torch post-norm encoder layer (norm_first=False), ReLU FFN
    a = _mha(x, x, lp["self_attn"], nhead, fused_qkv=True)
    x = _layernorm(x + a, lp["norm1_g"], lp["norm1_b"])
    f = _linear(_linear(x, lp["lin1_w"], lp["lin1_b"], "relu"),
                lp["lin2_w"], lp["lin2_b"])
    x = _layernorm(x + f, lp["norm2_g"], lp["norm2_b"])
    return x


def _decoder_layer(x, mem, lp, nhead):
    a = _mha(x, x, lp["self_attn"], nhead, fused_qkv=True)
    x = _layernorm(x + a, lp["norm1_g"], lp["norm1_b"])
    c = _mha(x, mem, lp["cross_attn"], nhead, fused_qkv=False)
    x = _layernorm(x + c, lp["norm2_g"], lp["norm2_b"])
    f = _linear(_linear(x, lp["lin1_w"], lp["lin1_b"], "relu"),
                lp["lin2_w"], lp["lin2_b"])
    x = _layernorm(x + f, lp["norm3_g"], lp["norm3_b"])
    return x


# ----------------------------------------------------------------------------
# Wrapper: one fused pallas_call for the whole forward pass
# ----------------------------------------------------------------------------

def _prepare_kernel_params(params):
    """Convert torch-layout params into kernel layout:
       weights transposed to (K, N), vectors reshaped to (1, N)."""
    def attn(p):
        return {
            "w_in": p["in_proj_w"].T,                 # (D, 3D)
            "b_in": p["in_proj_b"].reshape(1, -1),    # (1, 3D)
            "w_out": p["out_proj_w"].T,               # (D, D)
            "b_out": p["out_proj_b"].reshape(1, -1),  # (1, D)
        }

    def layer(p, has_cross):
        out = {
            "self_attn": attn(p["self_attn"]),
            "lin1_w": p["lin1_w"].T, "lin1_b": p["lin1_b"].reshape(1, -1),
            "lin2_w": p["lin2_w"].T, "lin2_b": p["lin2_b"].reshape(1, -1),
            "norm1_g": p["norm1_g"].reshape(1, -1),
            "norm1_b": p["norm1_b"].reshape(1, -1),
            "norm2_g": p["norm2_g"].reshape(1, -1),
            "norm2_b": p["norm2_b"].reshape(1, -1),
        }
        if has_cross:
            out["cross_attn"] = attn(p["cross_attn"])
            out["norm3_g"] = p["norm3_g"].reshape(1, -1)
            out["norm3_b"] = p["norm3_b"].reshape(1, -1)
        return out

    return {
        "encoder_layers": [layer(p, False) for p in params["encoder_layers"]],
        "decoder_layers": [layer(p, True) for p in params["decoder_layers"]],
        "enc_norm_g": params["enc_norm_g"].reshape(1, -1),
        "enc_norm_b": params["enc_norm_b"].reshape(1, -1),
        "dec_norm_g": params["dec_norm_g"].reshape(1, -1),
        "dec_norm_b": params["dec_norm_b"].reshape(1, -1),
        # `hiddent2out` is intentionally excluded (unused in forward()).
    }


@partial(jax.jit, static_argnames=("nhead",))
def transformer_forward(x, params, *, nhead):
    B, S, D = x.shape
    kparams = _prepare_kernel_params(params)
    flat, treedef = jax.tree_util.tree_flatten(kparams)
    n_flat = len(flat)

    def kernel(*refs):
        x_ref = refs[0]
        o_ref = refs[1 + n_flat]
        kp = jax.tree_util.tree_unflatten(
            treedef, [r[...] for r in refs[1:1 + n_flat]])

        xb = x_ref[...]                       # (S, D): one batch element

        # encoder stack + final encoder LayerNorm
        mem = xb
        for lp in kp["encoder_layers"]:
            mem = _encoder_layer(mem, lp, nhead)
        mem = _layernorm(mem, kp["enc_norm_g"], kp["enc_norm_b"])

        # decoder stack (tgt = x) + final decoder LayerNorm
        out = xb
        for lp in kp["decoder_layers"]:
            out = _decoder_layer(out, mem, lp, nhead)
        out = _layernorm(out, kp["dec_norm_g"], kp["dec_norm_b"])

        o_ref[...] = out

    # x/out: one (S, D) block per batch element; params: full arrays, kept
    # resident in VMEM across grid steps (constant block index).
    in_specs = [pl.BlockSpec((S, D), lambda b: (b, 0))]
    in_specs += [pl.BlockSpec(p.shape, lambda b: (0, 0)) for p in flat]

    out2d = pl.pallas_call(
        kernel,
        out_shape=jax.ShapeDtypeStruct((B * S, D), jnp.float32),
        grid=(B,),
        in_specs=in_specs,
        out_specs=pl.BlockSpec((S, D), lambda b: (b, 0)),
        compiler_params=pltpu.CompilerParams(
            dimension_semantics=("parallel",)),
    )(x.reshape(B * S, D), *flat)

    return out2d.reshape(B, S, D)


# ----------------------------------------------------------------------------
# Deterministic parameter init (shapes match nn.Transformer internals,
# stored in torch layout: Linear weight is (out_features, in_features))
# ----------------------------------------------------------------------------

def init_params(key, d_model, hidden_dim, num_layers):
    cnt = [0]

    def nxt():
        cnt[0] += 1
        return jax.random.fold_in(key, cnt[0])

    def w(shape, scale=0.05):
        return (scale * jax.random.normal(nxt(), shape)).astype(jnp.float32)

    def zeros(shape):
        return jnp.zeros(shape, jnp.float32)

    def ones(shape):
        return jnp.ones(shape, jnp.float32)

    def attn_params():
        return {
            "in_proj_w": w((3 * d_model, d_model)),
            "in_proj_b": zeros((3 * d_model,)),
            "out_proj_w": w((d_model, d_model)),
            "out_proj_b": zeros((d_model,)),
        }

    def enc_layer_params():
        return {
            "self_attn": attn_params(),
            "lin1_w": w((hidden_dim, d_model)), "lin1_b": zeros((hidden_dim,)),
            "lin2_w": w((d_model, hidden_dim)), "lin2_b": zeros((d_model,)),
            "norm1_g": ones((d_model,)), "norm1_b": zeros((d_model,)),
            "norm2_g": ones((d_model,)), "norm2_b": zeros((d_model,)),
        }

    def dec_layer_params():
        p = enc_layer_params()
        p["cross_attn"] = attn_params()
        p["norm3_g"] = ones((d_model,))
        p["norm3_b"] = zeros((d_model,))
        return p

    return {
        "encoder_layers": [enc_layer_params() for _ in range(num_layers)],
        "decoder_layers": [dec_layer_params() for _ in range(num_layers)],
        "enc_norm_g": ones((d_model,)), "enc_norm_b": zeros((d_model,)),
        "dec_norm_g": ones((d_model,)), "dec_norm_b": zeros((d_model,)),
        # present in the module but unused in forward():
        "hiddent2out_w": w((d_model, hidden_dim)),
        "hiddent2out_b": zeros((d_model,)),
    }


# ----------------------------------------------------------------------------
# Main
# ----------------------------------------------------------------------------

if __name__ == "__main__":
    # Module hyperparameters (small, consistent with the forward pass)
    input_dim = 32      # d_model
    nhead = 4
    win_len = 8         # sequence length
    hidden_dim = 64     # dim_feedforward
    num_layers = 2

    B, S = 2, win_len

    key = jax.random.PRNGKey(0)
    pkey, xkey = jax.random.split(key)
    params = init_params(pkey, input_dim, hidden_dim, num_layers)

    # x: (B, S, d_model), batch_first
    x = jax.random.normal(xkey, (B, S, input_dim), jnp.float32)

    out = transformer_forward(x, params, nhead=nhead)
    out = jax.block_until_ready(out)

    assert out.shape == (B, S, input_dim), out.shape
    assert bool(jnp.all(jnp.isfinite(out)))
    print("KERNEL_OK")
</pallas_src>

<mosaic_0001>
module attributes {stable_mosaic.version = 11 : i64} {
  func.func @kernel(%arg0: i32, %arg1: memref<8x32xf32, #tpu.memory_space<vmem>>, %arg2: memref<1x32xf32, #tpu.memory_space<vmem>>, %arg3: memref<1x32xf32, #tpu.memory_space<vmem>>, %arg4: memref<1x96xf32, #tpu.memory_space<vmem>>, %arg5: memref<1x32xf32, #tpu.memory_space<vmem>>, %arg6: memref<32x96xf32, #tpu.memory_space<vmem>>, %arg7: memref<32x32xf32, #tpu.memory_space<vmem>>, %arg8: memref<1x64xf32, #tpu.memory_space<vmem>>, %arg9: memref<32x64xf32, #tpu.memory_space<vmem>>, %arg10: memref<1x32xf32, #tpu.memory_space<vmem>>, %arg11: memref<64x32xf32, #tpu.memory_space<vmem>>, %arg12: memref<1x32xf32, #tpu.memory_space<vmem>>, %arg13: memref<1x32xf32, #tpu.memory_space<vmem>>, %arg14: memref<1x32xf32, #tpu.memory_space<vmem>>, %arg15: memref<1x32xf32, #tpu.memory_space<vmem>>, %arg16: memref<1x32xf32, #tpu.memory_space<vmem>>, %arg17: memref<1x32xf32, #tpu.memory_space<vmem>>, %arg18: memref<1x96xf32, #tpu.memory_space<vmem>>, %arg19: memref<1x32xf32, #tpu.memory_space<vmem>>, %arg20: memref<32x96xf32, #tpu.memory_space<vmem>>, %arg21: memref<32x32xf32, #tpu.memory_space<vmem>>, %arg22: memref<1x96xf32, #tpu.memory_space<vmem>>, %arg23: memref<1x32xf32, #tpu.memory_space<vmem>>, %arg24: memref<32x96xf32, #tpu.memory_space<vmem>>, %arg25: memref<32x32xf32, #tpu.memory_space<vmem>>, %arg26: memref<1x64xf32, #tpu.memory_space<vmem>>, %arg27: memref<32x64xf32, #tpu.memory_space<vmem>>, %arg28: memref<1x32xf32, #tpu.memory_space<vmem>>, %arg29: memref<64x32xf32, #tpu.memory_space<vmem>>, %arg30: memref<1x32xf32, #tpu.memory_space<vmem>>, %arg31: memref<1x32xf32, #tpu.memory_space<vmem>>, %arg32: memref<1x32xf32, #tpu.memory_space<vmem>>, %arg33: memref<1x32xf32, #tpu.memory_space<vmem>>, %arg34: memref<1x32xf32, #tpu.memory_space<vmem>>, %arg35: memref<1x32xf32, #tpu.memory_space<vmem>>, %arg36: memref<1x96xf32, #tpu.memory_space<vmem>>, %arg37: memref<1x32xf32, #tpu.memory_space<vmem>>, %arg38: memref<32x96xf32, #tpu.memory_space<vmem>>, %arg39: memref<32x32xf32, #tpu.memory_space<vmem>>, %arg40: memref<1x32xf32, #tpu.memory_space<vmem>>, %arg41: memref<1x32xf32, #tpu.memory_space<vmem>>, %arg42: memref<1x64xf32, #tpu.memory_space<vmem>>, %arg43: memref<32x64xf32, #tpu.memory_space<vmem>>, %arg44: memref<1x32xf32, #tpu.memory_space<vmem>>, %arg45: memref<64x32xf32, #tpu.memory_space<vmem>>, %arg46: memref<1x32xf32, #tpu.memory_space<vmem>>, %arg47: memref<1x32xf32, #tpu.memory_space<vmem>>, %arg48: memref<1x32xf32, #tpu.memory_space<vmem>>, %arg49: memref<1x32xf32, #tpu.memory_space<vmem>>, %arg50: memref<1x96xf32, #tpu.memory_space<vmem>>, %arg51: memref<1x32xf32, #tpu.memory_space<vmem>>, %arg52: memref<32x96xf32, #tpu.memory_space<vmem>>, %arg53: memref<32x32xf32, #tpu.memory_space<vmem>>, %arg54: memref<1x64xf32, #tpu.memory_space<vmem>>, %arg55: memref<32x64xf32, #tpu.memory_space<vmem>>, %arg56: memref<1x32xf32, #tpu.memory_space<vmem>>, %arg57: memref<64x32xf32, #tpu.memory_space<vmem>>, %arg58: memref<1x32xf32, #tpu.memory_space<vmem>>, %arg59: memref<1x32xf32, #tpu.memory_space<vmem>>, %arg60: memref<1x32xf32, #tpu.memory_space<vmem>>, %arg61: memref<1x32xf32, #tpu.memory_space<vmem>>, %arg62: memref<1x96xf32, #tpu.memory_space<vmem>>, %arg63: memref<1x32xf32, #tpu.memory_space<vmem>>, %arg64: memref<32x96xf32, #tpu.memory_space<vmem>>, %arg65: memref<32x32xf32, #tpu.memory_space<vmem>>, %arg66: memref<8x32xf32, #tpu.memory_space<vmem>>) attributes {dimension_semantics = [#tpu.dimension_semantics<parallel>], iteration_bounds = array<i64: 2>, scalar_prefetch = 0 : i64, scratch_operands = 0 : i64, tpu.core_type = #tpu.core_type<tc>, window_params = [{transform_indices = @transform_0, window_bounds = array<i64: 8, 32>}, {pipeline_mode = #tpu.pipeline_mode<synchronous>, transform_indices = @transform_1, window_bounds = array<i64: 1, 32>}, {pipeline_mode = #tpu.pipeline_mode<synchronous>, transform_indices = @transform_2, window_bounds = array<i64: 1, 32>}, {pipeline_mode = #tpu.pipeline_mode<synchronous>, transform_indices = @transform_3, window_bounds = array<i64: 1, 96>}, {pipeline_mode = #tpu.pipeline_mode<synchronous>, transform_indices = @transform_4, window_bounds = array<i64: 1, 32>}, {pipeline_mode = #tpu.pipeline_mode<synchronous>, transform_indices = @transform_5, window_bounds = array<i64: 32, 96>}, {pipeline_mode = #tpu.pipeline_mode<synchronous>, transform_indices = @transform_6, window_bounds = array<i64: 32, 32>}, {pipeline_mode = #tpu.pipeline_mode<synchronous>, transform_indices = @transform_7, window_bounds = array<i64: 1, 64>}, {pipeline_mode = #tpu.pipeline_mode<synchronous>, transform_indices = @transform_8, window_bounds = array<i64: 32, 64>}, {pipeline_mode = #tpu.pipeline_mode<synchronous>, transform_indices = @transform_9, window_bounds = array<i64: 1, 32>}, {pipeline_mode = #tpu.pipeline_mode<synchronous>, transform_indices = @transform_10, window_bounds = array<i64: 64, 32>}, {pipeline_mode = #tpu.pipeline_mode<synchronous>, transform_indices = @transform_11, window_bounds = array<i64: 1, 32>}, {pipeline_mode = #tpu.pipeline_mode<synchronous>, transform_indices = @transform_12, window_bounds = array<i64: 1, 32>}, {pipeline_mode = #tpu.pipeline_mode<synchronous>, transform_indices = @transform_13, window_bounds = array<i64: 1, 32>}, {pipeline_mode = #tpu.pipeline_mode<synchronous>, transform_indices = @transform_14, window_bounds = array<i64: 1, 32>}, {pipeline_mode = #tpu.pipeline_mode<synchronous>, transform_indices = @transform_15, window_bounds = array<i64: 1, 32>}, {pipeline_mode = #tpu.pipeline_mode<synchronous>, transform_indices = @transform_16, window_bounds = array<i64: 1, 32>}, {pipeline_mode = #tpu.pipeline_mode<synchronous>, transform_indices = @transform_17, window_bounds = array<i64: 1, 96>}, {pipeline_mode = #tpu.pipeline_mode<synchronous>, transform_indices = @transform_18, window_bounds = array<i64: 1, 32>}, {pipeline_mode = #tpu.pipeline_mode<synchronous>, transform_indices = @transform_19, window_bounds = array<i64: 32, 96>}, {pipeline_mode = #tpu.pipeline_mode<synchronous>, transform_indices = @transform_20, window_bounds = array<i64: 32, 32>}, {pipeline_mode = #tpu.pipeline_mode<synchronous>, transform_indices = @transform_21, window_bounds = array<i64: 1, 96>}, {pipeline_mode = #tpu.pipeline_mode<synchronous>, transform_indices = @transform_22, window_bounds = array<i64: 1, 32>}, {pipeline_mode = #tpu.pipeline_mode<synchronous>, transform_indices = @transform_23, window_bounds = array<i64: 32, 96>}, {pipeline_mode = #tpu.pipeline_mode<synchronous>, transform_indices = @transform_24, window_bounds = array<i64: 32, 32>}, {pipeline_mode = #tpu.pipeline_mode<synchronous>, transform_indices = @transform_25, window_bounds = array<i64: 1, 64>}, {pipeline_mode = #tpu.pipeline_mode<synchronous>, transform_indices = @transform_26, window_bounds = array<i64: 32, 64>}, {pipeline_mode = #tpu.pipeline_mode<synchronous>, transform_indices = @transform_27, window_bounds = array<i64: 1, 32>}, {pipeline_mode = #tpu.pipeline_mode<synchronous>, transform_indices = @transform_28, window_bounds = array<i64: 64, 32>}, {pipeline_mode = #tpu.pipeline_mode<synchronous>, transform_indices = @transform_29, window_bounds = array<i64: 1, 32>}, {pipeline_mode = #tpu.pipeline_mode<synchronous>, transform_indices = @transform_30, window_bounds = array<i64: 1, 32>}, {pipeline_mode = #tpu.pipeline_mode<synchronous>, transform_indices = @transform_31, window_bounds = array<i64: 1, 32>}, {pipeline_mode = #tpu.pipeline_mode<synchronous>, transform_indices = @transform_32, window_bounds = array<i64: 1, 32>}, {pipeline_mode = #tpu.pipeline_mode<synchronous>, transform_indices = @transform_33, window_bounds = array<i64: 1, 32>}, {pipeline_mode = #tpu.pipeline_mode<synchronous>, transform_indices = @transform_34, window_bounds = array<i64: 1, 32>}, {pipeline_mode = #tpu.pipeline_mode<synchronous>, transform_indices = @transform_35, window_bounds = array<i64: 1, 96>}, {pipeline_mode = #tpu.pipeline_mode<synchronous>, transform_indices = @transform_36, window_bounds = array<i64: 1, 32>}, {pipeline_mode = #tpu.pipeline_mode<synchronous>, transform_indices = @transform_37, window_bounds = array<i64: 32, 96>}, {pipeline_mode = #tpu.pipeline_mode<synchronous>, transform_indices = @transform_38, window_bounds = array<i64: 32, 32>}, {pipeline_mode = #tpu.pipeline_mode<synchronous>, transform_indices = @transform_39, window_bounds = array<i64: 1, 32>}, {pipeline_mode = #tpu.pipeline_mode<synchronous>, transform_indices = @transform_40, window_bounds = array<i64: 1, 32>}, {pipeline_mode = #tpu.pipeline_mode<synchronous>, transform_indices = @transform_41, window_bounds = array<i64: 1, 64>}, {pipeline_mode = #tpu.pipeline_mode<synchronous>, transform_indices = @transform_42, window_bounds = array<i64: 32, 64>}, {pipeline_mode = #tpu.pipeline_mode<synchronous>, transform_indices = @transform_43, window_bounds = array<i64: 1, 32>}, {pipeline_mode = #tpu.pipeline_mode<synchronous>, transform_indices = @transform_44, window_bounds = array<i64: 64, 32>}, {pipeline_mode = #tpu.pipeline_mode<synchronous>, transform_indices = @transform_45, window_bounds = array<i64: 1, 32>}, {pipeline_mode = #tpu.pipeline_mode<synchronous>, transform_indices = @transform_46, window_bounds = array<i64: 1, 32>}, {pipeline_mode = #tpu.pipeline_mode<synchronous>, transform_indices = @transform_47, window_bounds = array<i64: 1, 32>}, {pipeline_mode = #tpu.pipeline_mode<synchronous>, transform_indices = @transform_48, window_bounds = array<i64: 1, 32>}, {pipeline_mode = #tpu.pipeline_mode<synchronous>, transform_indices = @transform_49, window_bounds = array<i64: 1, 96>}, {pipeline_mode = #tpu.pipeline_mode<synchronous>, transform_indices = @transform_50, window_bounds = array<i64: 1, 32>}, {pipeline_mode = #tpu.pipeline_mode<synchronous>, transform_indices = @transform_51, window_bounds = array<i64: 32, 96>}, {pipeline_mode = #tpu.pipeline_mode<synchronous>, transform_indices = @transform_52, window_bounds = array<i64: 32, 32>}, {pipeline_mode = #tpu.pipeline_mode<synchronous>, transform_indices = @transform_53, window_bounds = array<i64: 1, 64>}, {pipeline_mode = #tpu.pipeline_mode<synchronous>, transform_indices = @transform_54, window_bounds = array<i64: 32, 64>}, {pipeline_mode = #tpu.pipeline_mode<synchronous>, transform_indices = @transform_55, window_bounds = array<i64: 1, 32>}, {pipeline_mode = #tpu.pipeline_mode<synchronous>, transform_indices = @transform_56, window_bounds = array<i64: 64, 32>}, {pipeline_mode = #tpu.pipeline_mode<synchronous>, transform_indices = @transform_57, window_bounds = array<i64: 1, 32>}, {pipeline_mode = #tpu.pipeline_mode<synchronous>, transform_indices = @transform_58, window_bounds = array<i64: 1, 32>}, {pipeline_mode = #tpu.pipeline_mode<synchronous>, transform_indices = @transform_59, window_bounds = array<i64: 1, 32>}, {pipeline_mode = #tpu.pipeline_mode<synchronous>, transform_indices = @transform_60, window_bounds = array<i64: 1, 32>}, {pipeline_mode = #tpu.pipeline_mode<synchronous>, transform_indices = @transform_61, window_bounds = array<i64: 1, 96>}, {pipeline_mode = #tpu.pipeline_mode<synchronous>, transform_indices = @transform_62, window_bounds = array<i64: 1, 32>}, {pipeline_mode = #tpu.pipeline_mode<synchronous>, transform_indices = @transform_63, window_bounds = array<i64: 32, 96>}, {pipeline_mode = #tpu.pipeline_mode<synchronous>, transform_indices = @transform_64, window_bounds = array<i64: 32, 32>}, {transform_indices = @transform_65, window_bounds = array<i64: 8, 32>}]} {
    %c0 = arith.constant 0 : index
    %c0_0 = arith.constant 0 : index
    %0 = vector.load %arg2[%c0, %c0_0] : memref<1x32xf32, #tpu.memory_space<vmem>>, vector<1x32xf32>
    %c0_1 = arith.constant 0 : index
    %c0_2 = arith.constant 0 : index
    %1 = vector.load %arg3[%c0_1, %c0_2] : memref<1x32xf32, #tpu.memory_space<vmem>>, vector<1x32xf32>
    %c0_3 = arith.constant 0 : index
    %c0_4 = arith.constant 0 : index
    %2 = vector.load %arg4[%c0_3, %c0_4] : memref<1x96xf32, #tpu.memory_space<vmem>>, vector<1x96xf32>
    %c0_5 = arith.constant 0 : index
    %c0_6 = arith.constant 0 : index
    %3 = vector.load %arg5[%c0_5, %c0_6] : memref<1x32xf32, #tpu.memory_space<vmem>>, vector<1x32xf32>
    %c0_7 = arith.constant 0 : index
    %c0_8 = arith.constant 0 : index
    %4 = vector.load %arg6[%c0_7, %c0_8] : memref<32x96xf32, #tpu.memory_space<vmem>>, vector<32x96xf32>
    %c0_9 = arith.constant 0 : index
    %c0_10 = arith.constant 0 : index
    %5 = vector.load %arg7[%c0_9, %c0_10] : memref<32x32xf32, #tpu.memory_space<vmem>>, vector<32x32xf32>
    %c0_11 = arith.constant 0 : index
    %c0_12 = arith.constant 0 : index
    %6 = vector.load %arg8[%c0_11, %c0_12] : memref<1x64xf32, #tpu.memory_space<vmem>>, vector<1x64xf32>
    %c0_13 = arith.constant 0 : index
    %c0_14 = arith.constant 0 : index
    %7 = vector.load %arg9[%c0_13, %c0_14] : memref<32x64xf32, #tpu.memory_space<vmem>>, vector<32x64xf32>
    %c0_15 = arith.constant 0 : index
    %c0_16 = arith.constant 0 : index
    %8 = vector.load %arg10[%c0_15, %c0_16] : memref<1x32xf32, #tpu.memory_space<vmem>>, vector<1x32xf32>
    %c0_17 = arith.constant 0 : index
    %c0_18 = arith.constant 0 : index
    %9 = vector.load %arg11[%c0_17, %c0_18] : memref<64x32xf32, #tpu.memory_space<vmem>>, vector<64x32xf32>
    %c0_19 = arith.constant 0 : index
    %c0_20 = arith.constant 0 : index
    %10 = vector.load %arg12[%c0_19, %c0_20] : memref<1x32xf32, #tpu.memory_space<vmem>>, vector<1x32xf32>
    %c0_21 = arith.constant 0 : index
    %c0_22 = arith.constant 0 : index
    %11 = vector.load %arg13[%c0_21, %c0_22] : memref<1x32xf32, #tpu.memory_space<vmem>>, vector<1x32xf32>
    %c0_23 = arith.constant 0 : index
    %c0_24 = arith.constant 0 : index
    %12 = vector.load %arg14[%c0_23, %c0_24] : memref<1x32xf32, #tpu.memory_space<vmem>>, vector<1x32xf32>
    %c0_25 = arith.constant 0 : index
    %c0_26 = arith.constant 0 : index
    %13 = vector.load %arg15[%c0_25, %c0_26] : memref<1x32xf32, #tpu.memory_space<vmem>>, vector<1x32xf32>
    %c0_27 = arith.constant 0 : index
    %c0_28 = arith.constant 0 : index
    %14 = vector.load %arg16[%c0_27, %c0_28] : memref<1x32xf32, #tpu.memory_space<vmem>>, vector<1x32xf32>
    %c0_29 = arith.constant 0 : index
    %c0_30 = arith.constant 0 : index
    %15 = vector.load %arg17[%c0_29, %c0_30] : memref<1x32xf32, #tpu.memory_space<vmem>>, vector<1x32xf32>
    %c0_31 = arith.constant 0 : index
    %c0_32 = arith.constant 0 : index
    %16 = vector.load %arg18[%c0_31, %c0_32] : memref<1x96xf32, #tpu.memory_space<vmem>>, vector<1x96xf32>
    %c0_33 = arith.constant 0 : index
    %c0_34 = arith.constant 0 : index
    %17 = vector.load %arg19[%c0_33, %c0_34] : memref<1x32xf32, #tpu.memory_space<vmem>>, vector<1x32xf32>
    %c0_35 = arith.constant 0 : index
    %c0_36 = arith.constant 0 : index
    %18 = vector.load %arg20[%c0_35, %c0_36] : memref<32x96xf32, #tpu.memory_space<vmem>>, vector<32x96xf32>
    %c0_37 = arith.constant 0 : index
    %c0_38 = arith.constant 0 : index
    %19 = vector.load %arg21[%c0_37, %c0_38] : memref<32x32xf32, #tpu.memory_space<vmem>>, vector<32x32xf32>
    %c0_39 = arith.constant 0 : index
    %c0_40 = arith.constant 0 : index
    %20 = vector.load %arg22[%c0_39, %c0_40] : memref<1x96xf32, #tpu.memory_space<vmem>>, vector<1x96xf32>
    %c0_41 = arith.constant 0 : index
    %c0_42 = arith.constant 0 : index
    %21 = vector.load %arg23[%c0_41, %c0_42] : memref<1x32xf32, #tpu.memory_space<vmem>>, vector<1x32xf32>
    %c0_43 = arith.constant 0 : index
    %c0_44 = arith.constant 0 : index
    %22 = vector.load %arg24[%c0_43, %c0_44] : memref<32x96xf32, #tpu.memory_space<vmem>>, vector<32x96xf32>
    %c0_45 = arith.constant 0 : index
    %c0_46 = arith.constant 0 : index
    %23 = vector.load %arg25[%c0_45, %c0_46] : memref<32x32xf32, #tpu.memory_space<vmem>>, vector<32x32xf32>
    %c0_47 = arith.constant 0 : index
    %c0_48 = arith.constant 0 : index
    %24 = vector.load %arg26[%c0_47, %c0_48] : memref<1x64xf32, #tpu.memory_space<vmem>>, vector<1x64xf32>
    %c0_49 = arith.constant 0 : index
    %c0_50 = arith.constant 0 : index
    %25 = vector.load %arg27[%c0_49, %c0_50] : memref<32x64xf32, #tpu.memory_space<vmem>>, vector<32x64xf32>
    %c0_51 = arith.constant 0 : index
    %c0_52 = arith.constant 0 : index
    %26 = vector.load %arg28[%c0_51, %c0_52] : memref<1x32xf32, #tpu.memory_space<vmem>>, vector<1x32xf32>
    %c0_53 = arith.constant 0 : index
    %c0_54 = arith.constant 0 : index
    %27 = vector.load %arg29[%c0_53, %c0_54] : memref<64x32xf32, #tpu.memory_space<vmem>>, vector<64x32xf32>
    %c0_55 = arith.constant 0 : index
    %c0_56 = arith.constant 0 : index
    %28 = vector.load %arg30[%c0_55, %c0_56] : memref<1x32xf32, #tpu.memory_space<vmem>>, vector<1x32xf32>
    %c0_57 = arith.constant 0 : index
    %c0_58 = arith.constant 0 : index
    %29 = vector.load %arg31[%c0_57, %c0_58] : memref<1x32xf32, #tpu.memory_space<vmem>>, vector<1x32xf32>
    %c0_59 = arith.constant 0 : index
    %c0_60 = arith.constant 0 : index
    %30 = vector.load %arg32[%c0_59, %c0_60] : memref<1x32xf32, #tpu.memory_space<vmem>>, vector<1x32xf32>
    %c0_61 = arith.constant 0 : index
    %c0_62 = arith.constant 0 : index
    %31 = vector.load %arg33[%c0_61, %c0_62] : memref<1x32xf32, #tpu.memory_space<vmem>>, vector<1x32xf32>
    %c0_63 = arith.constant 0 : index
    %c0_64 = arith.constant 0 : index
    %32 = vector.load %arg34[%c0_63, %c0_64] : memref<1x32xf32, #tpu.memory_space<vmem>>, vector<1x32xf32>
    %c0_65 = arith.constant 0 : index
    %c0_66 = arith.constant 0 : index
    %33 = vector.load %arg35[%c0_65, %c0_66] : memref<1x32xf32, #tpu.memory_space<vmem>>, vector<1x32xf32>
    %c0_67 = arith.constant 0 : index
    %c0_68 = arith.constant 0 : index
    %34 = vector.load %arg36[%c0_67, %c0_68] : memref<1x96xf32, #tpu.memory_space<vmem>>, vector<1x96xf32>
    %c0_69 = arith.constant 0 : index
    %c0_70 = arith.constant 0 : index
    %35 = vector.load %arg37[%c0_69, %c0_70] : memref<1x32xf32, #tpu.memory_space<vmem>>, vector<1x32xf32>
    %c0_71 = arith.constant 0 : index
    %c0_72 = arith.constant 0 : index
    %36 = vector.load %arg38[%c0_71, %c0_72] : memref<32x96xf32, #tpu.memory_space<vmem>>, vector<32x96xf32>
    %c0_73 = arith.constant 0 : index
    %c0_74 = arith.constant 0 : index
    %37 = vector.load %arg39[%c0_73, %c0_74] : memref<32x32xf32, #tpu.memory_space<vmem>>, vector<32x32xf32>
    %c0_75 = arith.constant 0 : index
    %c0_76 = arith.constant 0 : index
    %38 = vector.load %arg40[%c0_75, %c0_76] : memref<1x32xf32, #tpu.memory_space<vmem>>, vector<1x32xf32>
    %c0_77 = arith.constant 0 : index
    %c0_78 = arith.constant 0 : index
    %39 = vector.load %arg41[%c0_77, %c0_78] : memref<1x32xf32, #tpu.memory_space<vmem>>, vector<1x32xf32>
    %c0_79 = arith.constant 0 : index
    %c0_80 = arith.constant 0 : index
    %40 = vector.load %arg42[%c0_79, %c0_80] : memref<1x64xf32, #tpu.memory_space<vmem>>, vector<1x64xf32>
    %c0_81 = arith.constant 0 : index
    %c0_82 = arith.constant 0 : index
    %41 = vector.load %arg43[%c0_81, %c0_82] : memref<32x64xf32, #tpu.memory_space<vmem>>, vector<32x64xf32>
    %c0_83 = arith.constant 0 : index
    %c0_84 = arith.constant 0 : index
    %42 = vector.load %arg44[%c0_83, %c0_84] : memref<1x32xf32, #tpu.memory_space<vmem>>, vector<1x32xf32>
    %c0_85 = arith.constant 0 : index
    %c0_86 = arith.constant 0 : index
    %43 = vector.load %arg45[%c0_85, %c0_86] : memref<64x32xf32, #tpu.memory_space<vmem>>, vector<64x32xf32>
    %c0_87 = arith.constant 0 : index
    %c0_88 = arith.constant 0 : index
    %44 = vector.load %arg46[%c0_87, %c0_88] : memref<1x32xf32, #tpu.memory_space<vmem>>, vector<1x32xf32>
    %c0_89 = arith.constant 0 : index
    %c0_90 = arith.constant 0 : index
    %45 = vector.load %arg47[%c0_89, %c0_90] : memref<1x32xf32, #tpu.memory_space<vmem>>, vector<1x32xf32>
    %c0_91 = arith.constant 0 : index
    %c0_92 = arith.constant 0 : index
    %46 = vector.load %arg48[%c0_91, %c0_92] : memref<1x32xf32, #tpu.memory_space<vmem>>, vector<1x32xf32>
    %c0_93 = arith.constant 0 : index
    %c0_94 = arith.constant 0 : index
    %47 = vector.load %arg49[%c0_93, %c0_94] : memref<1x32xf32, #tpu.memory_space<vmem>>, vector<1x32xf32>
    %c0_95 = arith.constant 0 : index
    %c0_96 = arith.constant 0 : index
    %48 = vector.load %arg50[%c0_95, %c0_96] : memref<1x96xf32, #tpu.memory_space<vmem>>, vector<1x96xf32>
    %c0_97 = arith.constant 0 : index
    %c0_98 = arith.constant 0 : index
    %49 = vector.load %arg51[%c0_97, %c0_98] : memref<1x32xf32, #tpu.memory_space<vmem>>, vector<1x32xf32>
    %c0_99 = arith.constant 0 : index
    %c0_100 = arith.constant 0 : index
    %50 = vector.load %arg52[%c0_99, %c0_100] : memref<32x96xf32, #tpu.memory_space<vmem>>, vector<32x96xf32>
    %c0_101 = arith.constant 0 : index
    %c0_102 = arith.constant 0 : index
    %51 = vector.load %arg53[%c0_101, %c0_102] : memref<32x32xf32, #tpu.memory_space<vmem>>, vector<32x32xf32>
    %c0_103 = arith.constant 0 : index
    %c0_104 = arith.constant 0 : index
    %52 = vector.load %arg54[%c0_103, %c0_104] : memref<1x64xf32, #tpu.memory_space<vmem>>, vector<1x64xf32>
    %c0_105 = arith.constant 0 : index
    %c0_106 = arith.constant 0 : index
    %53 = vector.load %arg55[%c0_105, %c0_106] : memref<32x64xf32, #tpu.memory_space<vmem>>, vector<32x64xf32>
    %c0_107 = arith.constant 0 : index
    %c0_108 = arith.constant 0 : index
    %54 = vector.load %arg56[%c0_107, %c0_108] : memref<1x32xf32, #tpu.memory_space<vmem>>, vector<1x32xf32>
    %c0_109 = arith.constant 0 : index
    %c0_110 = arith.constant 0 : index
    %55 = vector.load %arg57[%c0_109, %c0_110] : memref<64x32xf32, #tpu.memory_space<vmem>>, vector<64x32xf32>
    %c0_111 = arith.constant 0 : index
    %c0_112 = arith.constant 0 : index
    %56 = vector.load %arg58[%c0_111, %c0_112] : memref<1x32xf32, #tpu.memory_space<vmem>>, vector<1x32xf32>
    %c0_113 = arith.constant 0 : index
    %c0_114 = arith.constant 0 : index
    %57 = vector.load %arg59[%c0_113, %c0_114] : memref<1x32xf32, #tpu.memory_space<vmem>>, vector<1x32xf32>
    %c0_115 = arith.constant 0 : index
    %c0_116 = arith.constant 0 : index
    %58 = vector.load %arg60[%c0_115, %c0_116] : memref<1x32xf32, #tpu.memory_space<vmem>>, vector<1x32xf32>
    %c0_117 = arith.constant 0 : index
    %c0_118 = arith.constant 0 : index
    %59 = vector.load %arg61[%c0_117, %c0_118] : memref<1x32xf32, #tpu.memory_space<vmem>>, vector<1x32xf32>
    %c0_119 = arith.constant 0 : index
    %c0_120 = arith.constant 0 : index
    %60 = vector.load %arg62[%c0_119, %c0_120] : memref<1x96xf32, #tpu.memory_space<vmem>>, vector<1x96xf32>
    %c0_121 = arith.constant 0 : index
    %c0_122 = arith.constant 0 : index
    %61 = vector.load %arg63[%c0_121, %c0_122] : memref<1x32xf32, #tpu.memory_space<vmem>>, vector<1x32xf32>
    %c0_123 = arith.constant 0 : index
    %c0_124 = arith.constant 0 : index
    %62 = vector.load %arg64[%c0_123, %c0_124] : memref<32x96xf32, #tpu.memory_space<vmem>>, vector<32x96xf32>
    %c0_125 = arith.constant 0 : index
    %c0_126 = arith.constant 0 : index
    %63 = vector.load %arg65[%c0_125, %c0_126] : memref<32x32xf32, #tpu.memory_space<vmem>>, vector<32x32xf32>
    %c0_127 = arith.constant 0 : index
    %c0_128 = arith.constant 0 : index
    %64 = vector.load %arg1[%c0_127, %c0_128] : memref<8x32xf32, #tpu.memory_space<vmem>>, vector<8x32xf32>
    %cst = arith.constant dense<0.000000e+00> : vector<8x96xf32>
    %65 = tpu.matmul %64, %50, %cst {dimension_numbers = #tpu.dot_dimension_numbers<[1], [0], [0], [1], [0, 0, 1, 1], [], []>} : vector<8x32xf32>, vector<32x96xf32>, vector<8x96xf32> -> vector<8x96xf32>
    %66 = vector.broadcast %48 : vector<1x96xf32> to vector<8x96xf32>
    %67 = arith.addf %65, %66 : vector<8x96xf32>
    %68 = vector.extract_strided_slice %67 {offsets = [0, 0], sizes = [8, 32], strides = [1, 1]} : vector<8x96xf32> to vector<8x32xf32>
    %69 = vector.extract_strided_slice %67 {offsets = [0, 32], sizes = [8, 32], strides = [1, 1]} : vector<8x96xf32> to vector<8x32xf32>
    %70 = vector.extract_strided_slice %67 {offsets = [0, 64], sizes = [8, 32], strides = [1, 1]} : vector<8x96xf32> to vector<8x32xf32>
    %71 = vector.extract_strided_slice %68 {offsets = [0, 0], sizes = [8, 8], strides = [1, 1]} : vector<8x32xf32> to vector<8x8xf32>
    %72 = vector.extract_strided_slice %69 {offsets = [0, 0], sizes = [8, 8], strides = [1, 1]} : vector<8x32xf32> to vector<8x8xf32>
    %73 = vector.extract_strided_slice %70 {offsets = [0, 0], sizes = [8, 8], strides = [1, 1]} : vector<8x32xf32> to vector<8x8xf32>
    %cst_129 = arith.constant dense<0.000000e+00> : vector<8x8xf32>
    %74 = tpu.matmul %71, %72, %cst_129 {dimension_numbers = #tpu.dot_dimension_numbers<[1], [1], [0], [0], [0, 0, 1, 0], [], []>} : vector<8x8xf32>, vector<8x8xf32>, vector<8x8xf32> -> vector<8x8xf32>
    %cst_130 = arith.constant 0.353553385 : f32
    %75 = vector.broadcast %cst_130 : f32 to vector<8x8xf32>
    %76 = arith.mulf %74, %75 : vector<8x8xf32>
    %cst_131 = arith.constant dense<0xFF800000> : vector<8xf32>
    %77 = vector.multi_reduction <maximumf>, %76, %cst_131 [1] : vector<8x8xf32> to vector<8xf32>
    %78 = vector.shape_cast %77 : vector<8xf32> to vector<8x1xf32>
    %79 = vector.broadcast %78 : vector<8x1xf32> to vector<8x8xf32>
    %80 = arith.subf %76, %79 : vector<8x8xf32>
    %81 = math.exp %80 : vector<8x8xf32>
    %cst_132 = arith.constant dense<0.000000e+00> : vector<8xf32>
    %82 = vector.multi_reduction <add>, %81, %cst_132 [1] : vector<8x8xf32> to vector<8xf32>
    %83 = vector.shape_cast %82 : vector<8xf32> to vector<8x1xf32>
    %84 = tpu.reciprocal %83 {approx = true} : vector<8x1xf32> -> vector<8x1xf32>
    %85 = vector.broadcast %84 : vector<8x1xf32> to vector<8x8xf32>
    %86 = arith.mulf %81, %85 : vector<8x8xf32>
    %cst_133 = arith.constant dense<0.000000e+00> : vector<8x8xf32>
    %87 = tpu.matmul %86, %73, %cst_133 {dimension_numbers = #tpu.dot_dimension_numbers<[1], [0], [0], [1], [0, 0, 1, 1], [], []>} : vector<8x8xf32>, vector<8x8xf32>, vector<8x8xf32> -> vector<8x8xf32>
    %88 = vector.extract_strided_slice %51 {offsets = [0, 0], sizes = [8, 32], strides = [1, 1]} : vector<32x32xf32> to vector<8x32xf32>
    %cst_134 = arith.constant dense<0.000000e+00> : vector<8x32xf32>
    %89 = tpu.matmul %87, %88, %cst_134 {dimension_numbers = #tpu.dot_dimension_numbers<[1], [0], [0], [1], [0, 0, 1, 1], [], []>} : vector<8x8xf32>, vector<8x32xf32>, vector<8x32xf32> -> vector<8x32xf32>
    %90 = vector.extract_strided_slice %68 {offsets = [0, 8], sizes = [8, 8], strides = [1, 1]} : vector<8x32xf32> to vector<8x8xf32>
    %91 = vector.extract_strided_slice %69 {offsets = [0, 8], sizes = [8, 8], strides = [1, 1]} : vector<8x32xf32> to vector<8x8xf32>
    %92 = vector.extract_strided_slice %70 {offsets = [0, 8], sizes = [8, 8], strides = [1, 1]} : vector<8x32xf32> to vector<8x8xf32>
    %cst_135 = arith.constant dense<0.000000e+00> : vector<8x8xf32>
    %93 = tpu.matmul %90, %91, %cst_135 {dimension_numbers = #tpu.dot_dimension_numbers<[1], [1], [0], [0], [0, 0, 1, 0], [], []>} : vector<8x8xf32>, vector<8x8xf32>, vector<8x8xf32> -> vector<8x8xf32>
    %cst_136 = arith.constant 0.353553385 : f32
    %94 = vector.broadcast %cst_136 : f32 to vector<8x8xf32>
    %95 = arith.mulf %93, %94 : vector<8x8xf32>
    %cst_137 = arith.constant dense<0xFF800000> : vector<8xf32>
    %96 = vector.multi_reduction <maximumf>, %95, %cst_137 [1] : vector<8x8xf32> to vector<8xf32>
    %97 = vector.shape_cast %96 : vector<8xf32> to vector<8x1xf32>
    %98 = vector.broadcast %97 : vector<8x1xf32> to vector<8x8xf32>
    %99 = arith.subf %95, %98 : vector<8x8xf32>
    %100 = math.exp %99 : vector<8x8xf32>
    %cst_138 = arith.constant dense<0.000000e+00> : vector<8xf32>
    %101 = vector.multi_reduction <add>, %100, %cst_138 [1] : vector<8x8xf32> to vector<8xf32>
    %102 = vector.shape_cast %101 : vector<8xf32> to vector<8x1xf32>
    %103 = tpu.reciprocal %102 {approx = true} : vector<8x1xf32> -> vector<8x1xf32>
    %104 = vector.broadcast %103 : vector<8x1xf32> to vector<8x8xf32>
    %105 = arith.mulf %100, %104 : vector<8x8xf32>
    %cst_139 = arith.constant dense<0.000000e+00> : vector<8x8xf32>
    %106 = tpu.matmul %105, %92, %cst_139 {dimension_numbers = #tpu.dot_dimension_numbers<[1], [0], [0], [1], [0, 0, 1, 1], [], []>} : vector<8x8xf32>, vector<8x8xf32>, vector<8x8xf32> -> vector<8x8xf32>
    %107 = vector.extract_strided_slice %51 {offsets = [8, 0], sizes = [8, 32], strides = [1, 1]} : vector<32x32xf32> to vector<8x32xf32>
    %cst_140 = arith.constant dense<0.000000e+00> : vector<8x32xf32>
    %108 = tpu.matmul %106, %107, %cst_140 {dimension_numbers = #tpu.dot_dimension_numbers<[1], [0], [0], [1], [0, 0, 1, 1], [], []>} : vector<8x8xf32>, vector<8x32xf32>, vector<8x32xf32> -> vector<8x32xf32>
    %109 = arith.addf %89, %108 : vector<8x32xf32>
    %110 = vector.extract_strided_slice %68 {offsets = [0, 16], sizes = [8, 8], strides = [1, 1]} : vector<8x32xf32> to vector<8x8xf32>
    %111 = vector.extract_strided_slice %69 {offsets = [0, 16], sizes = [8, 8], strides = [1, 1]} : vector<8x32xf32> to vector<8x8xf32>
    %112 = vector.extract_strided_slice %70 {offsets = [0, 16], sizes = [8, 8], strides = [1, 1]} : vector<8x32xf32> to vector<8x8xf32>
    %cst_141 = arith.constant dense<0.000000e+00> : vector<8x8xf32>
    %113 = tpu.matmul %110, %111, %cst_141 {dimension_numbers = #tpu.dot_dimension_numbers<[1], [1], [0], [0], [0, 0, 1, 0], [], []>} : vector<8x8xf32>, vector<8x8xf32>, vector<8x8xf32> -> vector<8x8xf32>
    %cst_142 = arith.constant 0.353553385 : f32
    %114 = vector.broadcast %cst_142 : f32 to vector<8x8xf32>
    %115 = arith.mulf %113, %114 : vector<8x8xf32>
    %cst_143 = arith.constant dense<0xFF800000> : vector<8xf32>
    %116 = vector.multi_reduction <maximumf>, %115, %cst_143 [1] : vector<8x8xf32> to vector<8xf32>
    %117 = vector.shape_cast %116 : vector<8xf32> to vector<8x1xf32>
    %118 = vector.broadcast %117 : vector<8x1xf32> to vector<8x8xf32>
    %119 = arith.subf %115, %118 : vector<8x8xf32>
    %120 = math.exp %119 : vector<8x8xf32>
    %cst_144 = arith.constant dense<0.000000e+00> : vector<8xf32>
    %121 = vector.multi_reduction <add>, %120, %cst_144 [1] : vector<8x8xf32> to vector<8xf32>
    %122 = vector.shape_cast %121 : vector<8xf32> to vector<8x1xf32>
    %123 = tpu.reciprocal %122 {approx = true} : vector<8x1xf32> -> vector<8x1xf32>
    %124 = vector.broadcast %123 : vector<8x1xf32> to vector<8x8xf32>
    %125 = arith.mulf %120, %124 : vector<8x8xf32>
    %cst_145 = arith.constant dense<0.000000e+00> : vector<8x8xf32>
    %126 = tpu.matmul %125, %112, %cst_145 {dimension_numbers = #tpu.dot_dimension_numbers<[1], [0], [0], [1], [0, 0, 1, 1], [], []>} : vector<8x8xf32>, vector<8x8xf32>, vector<8x8xf32> -> vector<8x8xf32>
    %127 = vector.extract_strided_slice %51 {offsets = [16, 0], sizes = [8, 32], strides = [1, 1]} : vector<32x32xf32> to vector<8x32xf32>
    %cst_146 = arith.constant dense<0.000000e+00> : vector<8x32xf32>
    %128 = tpu.matmul %126, %127, %cst_146 {dimension_numbers = #tpu.dot_dimension_numbers<[1], [0], [0], [1], [0, 0, 1, 1], [], []>} : vector<8x8xf32>, vector<8x32xf32>, vector<8x32xf32> -> vector<8x32xf32>
    %129 = arith.addf %109, %128 : vector<8x32xf32>
    %130 = vector.extract_strided_slice %68 {offsets = [0, 24], sizes = [8, 8], strides = [1, 1]} : vector<8x32xf32> to vector<8x8xf32>
    %131 = vector.extract_strided_slice %69 {offsets = [0, 24], sizes = [8, 8], strides = [1, 1]} : vector<8x32xf32> to vector<8x8xf32>
    %132 = vector.extract_strided_slice %70 {offsets = [0, 24], sizes = [8, 8], strides = [1, 1]} : vector<8x32xf32> to vector<8x8xf32>
    %cst_147 = arith.constant dense<0.000000e+00> : vector<8x8xf32>
    %133 = tpu.matmul %130, %131, %cst_147 {dimension_numbers = #tpu.dot_dimension_numbers<[1], [1], [0], [0], [0, 0, 1, 0], [], []>} : vector<8x8xf32>, vector<8x8xf32>, vector<8x8xf32> -> vector<8x8xf32>
    %cst_148 = arith.constant 0.353553385 : f32
    %134 = vector.broadcast %cst_148 : f32 to vector<8x8xf32>
    %135 = arith.mulf %133, %134 : vector<8x8xf32>
    %cst_149 = arith.constant dense<0xFF800000> : vector<8xf32>
    %136 = vector.multi_reduction <maximumf>, %135, %cst_149 [1] : vector<8x8xf32> to vector<8xf32>
    %137 = vector.shape_cast %136 : vector<8xf32> to vector<8x1xf32>
    %138 = vector.broadcast %137 : vector<8x1xf32> to vector<8x8xf32>
    %139 = arith.subf %135, %138 : vector<8x8xf32>
    %140 = math.exp %139 : vector<8x8xf32>
    %cst_150 = arith.constant dense<0.000000e+00> : vector<8xf32>
    %141 = vector.multi_reduction <add>, %140, %cst_150 [1] : vector<8x8xf32> to vector<8xf32>
    %142 = vector.shape_cast %141 : vector<8xf32> to vector<8x1xf32>
    %143 = tpu.reciprocal %142 {approx = true} : vector<8x1xf32> -> vector<8x1xf32>
    %144 = vector.broadcast %143 : vector<8x1xf32> to vector<8x8xf32>
    %145 = arith.mulf %140, %144 : vector<8x8xf32>
    %cst_151 = arith.constant dense<0.000000e+00> : vector<8x8xf32>
    %146 = tpu.matmul %145, %132, %cst_151 {dimension_numbers = #tpu.dot_dimension_numbers<[1], [0], [0], [1], [0, 0, 1, 1], [], []>} : vector<8x8xf32>, vector<8x8xf32>, vector<8x8xf32> -> vector<8x8xf32>
    %147 = vector.extract_strided_slice %51 {offsets = [24, 0], sizes = [8, 32], strides = [1, 1]} : vector<32x32xf32> to vector<8x32xf32>
    %cst_152 = arith.constant dense<0.000000e+00> : vector<8x32xf32>
    %148 = tpu.matmul %146, %147, %cst_152 {dimension_numbers = #tpu.dot_dimension_numbers<[1], [0], [0], [1], [0, 0, 1, 1], [], []>} : vector<8x8xf32>, vector<8x32xf32>, vector<8x32xf32> -> vector<8x32xf32>
    %149 = arith.addf %129, %148 : vector<8x32xf32>
    %150 = vector.broadcast %49 : vector<1x32xf32> to vector<8x32xf32>
    %151 = arith.addf %149, %150 : vector<8x32xf32>
    %152 = arith.addf %64, %151 : vector<8x32xf32>
    %cst_153 = arith.constant dense<0.000000e+00> : vector<8xf32>
    %153 = vector.multi_reduction <add>, %152, %cst_153 [1] : vector<8x32xf32> to vector<8xf32>
    %154 = vector.shape_cast %153 : vector<8xf32> to vector<8x1xf32>
    %cst_154 = arith.constant 3.200000e+01 : f32
    %155 = vector.broadcast %cst_154 : f32 to vector<8x1xf32>
    %156 = arith.divf %154, %155 : vector<8x1xf32>
    %157 = vector.broadcast %156 : vector<8x1xf32> to vector<8x32xf32>
    %158 = arith.subf %152, %157 : vector<8x32xf32>
    %159 = arith.mulf %158, %158 : vector<8x32xf32>
    %cst_155 = arith.constant dense<0.000000e+00> : vector<8xf32>
    %160 = vector.multi_reduction <add>, %159, %cst_155 [1] : vector<8x32xf32> to vector<8xf32>
    %161 = vector.shape_cast %160 : vector<8xf32> to vector<8x1xf32>
    %cst_156 = arith.constant 3.200000e+01 : f32
    %162 = vector.broadcast %cst_156 : f32 to vector<8x1xf32>
    %163 = arith.divf %161, %162 : vector<8x1xf32>
    %164 = vector.broadcast %156 : vector<8x1xf32> to vector<8x32xf32>
    %165 = arith.subf %152, %164 : vector<8x32xf32>
    %cst_157 = arith.constant 9.99999974E-6 : f32
    %166 = vector.broadcast %cst_157 : f32 to vector<8x1xf32>
    %167 = arith.addf %163, %166 : vector<8x1xf32>
    %168 = math.rsqrt %167 : vector<8x1xf32>
    %169 = vector.broadcast %168 : vector<8x1xf32> to vector<8x32xf32>
    %170 = arith.mulf %165, %169 : vector<8x32xf32>
    %171 = vector.broadcast %45 : vector<1x32xf32> to vector<8x32xf32>
    %172 = arith.mulf %170, %171 : vector<8x32xf32>
    %173 = vector.broadcast %44 : vector<1x32xf32> to vector<8x32xf32>
    %174 = arith.addf %172, %173 : vector<8x32xf32>
    %cst_158 = arith.constant dense<0.000000e+00> : vector<8x64xf32>
    %175 = tpu.matmul %174, %41, %cst_158 {dimension_numbers = #tpu.dot_dimension_numbers<[1], [0], [0], [1], [0, 0, 1, 1], [], []>} : vector<8x32xf32>, vector<32x64xf32>, vector<8x64xf32> -> vector<8x64xf32>
    %176 = vector.broadcast %40 : vector<1x64xf32> to vector<8x64xf32>
    %177 = arith.addf %175, %176 : vector<8x64xf32>
    %cst_159 = arith.constant 0.000000e+00 : f32
    %178 = vector.broadcast %cst_159 : f32 to vector<8x64xf32>
    %179 = arith.maximumf %177, %178 : vector<8x64xf32>
    %cst_160 = arith.constant dense<0.000000e+00> : vector<8x32xf32>
    %180 = tpu.matmul %179, %43, %cst_160 {dimension_numbers = #tpu.dot_dimension_numbers<[1], [0], [0], [1], [0, 0, 1, 1], [], []>} : vector<8x64xf32>, vector<64x32xf32>, vector<8x32xf32> -> vector<8x32xf32>
    %181 = vector.broadcast %42 : vector<1x32xf32> to vector<8x32xf32>
    %182 = arith.addf %180, %181 : vector<8x32xf32>
    %183 = arith.addf %174, %182 : vector<8x32xf32>
    %cst_161 = arith.constant dense<0.000000e+00> : vector<8xf32>
    %184 = vector.multi_reduction <add>, %183, %cst_161 [1] : vector<8x32xf32> to vector<8xf32>
    %185 = vector.shape_cast %184 : vector<8xf32> to vector<8x1xf32>
    %cst_162 = arith.constant 3.200000e+01 : f32
    %186 = vector.broadcast %cst_162 : f32 to vector<8x1xf32>
    %187 = arith.divf %185, %186 : vector<8x1xf32>
    %188 = vector.broadcast %187 : vector<8x1xf32> to vector<8x32xf32>
    %189 = arith.subf %183, %188 : vector<8x32xf32>
    %190 = arith.mulf %189, %189 : vector<8x32xf32>
    %cst_163 = arith.constant dense<0.000000e+00> : vector<8xf32>
    %191 = vector.multi_reduction <add>, %190, %cst_163 [1] : vector<8x32xf32> to vector<8xf32>
    %192 = vector.shape_cast %191 : vector<8xf32> to vector<8x1xf32>
    %cst_164 = arith.constant 3.200000e+01 : f32
    %193 = vector.broadcast %cst_164 : f32 to vector<8x1xf32>
    %194 = arith.divf %192, %193 : vector<8x1xf32>
    %195 = vector.broadcast %187 : vector<8x1xf32> to vector<8x32xf32>
    %196 = arith.subf %183, %195 : vector<8x32xf32>
    %cst_165 = arith.constant 9.99999974E-6 : f32
    %197 = vector.broadcast %cst_165 : f32 to vector<8x1xf32>
    %198 = arith.addf %194, %197 : vector<8x1xf32>
    %199 = math.rsqrt %198 : vector<8x1xf32>
    %200 = vector.broadcast %199 : vector<8x1xf32> to vector<8x32xf32>
    %201 = arith.mulf %196, %200 : vector<8x32xf32>
    %202 = vector.broadcast %47 : vector<1x32xf32> to vector<8x32xf32>
    %203 = arith.mulf %201, %202 : vector<8x32xf32>
    %204 = vector.broadcast %46 : vector<1x32xf32> to vector<8x32xf32>
    %205 = arith.addf %203, %204 : vector<8x32xf32>
    %cst_166 = arith.constant dense<0.000000e+00> : vector<8x96xf32>
    %206 = tpu.matmul %205, %62, %cst_166 {dimension_numbers = #tpu.dot_dimension_numbers<[1], [0], [0], [1], [0, 0, 1, 1], [], []>} : vector<8x32xf32>, vector<32x96xf32>, vector<8x96xf32> -> vector<8x96xf32>
    %207 = vector.broadcast %60 : vector<1x96xf32> to vector<8x96xf32>
    %208 = arith.addf %206, %207 : vector<8x96xf32>
    %209 = vector.extract_strided_slice %208 {offsets = [0, 0], sizes = [8, 32], strides = [1, 1]} : vector<8x96xf32> to vector<8x32xf32>
    %210 = vector.extract_strided_slice %208 {offsets = [0, 32], sizes = [8, 32], strides = [1, 1]} : vector<8x96xf32> to vector<8x32xf32>
    %211 = vector.extract_strided_slice %208 {offsets = [0, 64], sizes = [8, 32], strides = [1, 1]} : vector<8x96xf32> to vector<8x32xf32>
    %212 = vector.extract_strided_slice %209 {offsets = [0, 0], sizes = [8, 8], strides = [1, 1]} : vector<8x32xf32> to vector<8x8xf32>
    %213 = vector.extract_strided_slice %210 {offsets = [0, 0], sizes = [8, 8], strides = [1, 1]} : vector<8x32xf32> to vector<8x8xf32>
    %214 = vector.extract_strided_slice %211 {offsets = [0, 0], sizes = [8, 8], strides = [1, 1]} : vector<8x32xf32> to vector<8x8xf32>
    %cst_167 = arith.constant dense<0.000000e+00> : vector<8x8xf32>
    %215 = tpu.matmul %212, %213, %cst_167 {dimension_numbers = #tpu.dot_dimension_numbers<[1], [1], [0], [0], [0, 0, 1, 0], [], []>} : vector<8x8xf32>, vector<8x8xf32>, vector<8x8xf32> -> vector<8x8xf32>
    %cst_168 = arith.constant 0.353553385 : f32
    %216 = vector.broadcast %cst_168 : f32 to vector<8x8xf32>
    %217 = arith.mulf %215, %216 : vector<8x8xf32>
    %cst_169 = arith.constant dense<0xFF800000> : vector<8xf32>
    %218 = vector.multi_reduction <maximumf>, %217, %cst_169 [1] : vector<8x8xf32> to vector<8xf32>
    %219 = vector.shape_cast %218 : vector<8xf32> to vector<8x1xf32>
    %220 = vector.broadcast %219 : vector<8x1xf32> to vector<8x8xf32>
    %221 = arith.subf %217, %220 : vector<8x8xf32>
    %222 = math.exp %221 : vector<8x8xf32>
    %cst_170 = arith.constant dense<0.000000e+00> : vector<8xf32>
    %223 = vector.multi_reduction <add>, %222, %cst_170 [1] : vector<8x8xf32> to vector<8xf32>
    %224 = vector.shape_cast %223 : vector<8xf32> to vector<8x1xf32>
    %225 = tpu.reciprocal %224 {approx = true} : vector<8x1xf32> -> vector<8x1xf32>
    %226 = vector.broadcast %225 : vector<8x1xf32> to vector<8x8xf32>
    %227 = arith.mulf %222, %226 : vector<8x8xf32>
    %cst_171 = arith.constant dense<0.000000e+00> : vector<8x8xf32>
    %228 = tpu.matmul %227, %214, %cst_171 {dimension_numbers = #tpu.dot_dimension_numbers<[1], [0], [0], [1], [0, 0, 1, 1], [], []>} : vector<8x8xf32>, vector<8x8xf32>, vector<8x8xf32> -> vector<8x8xf32>
    %229 = vector.extract_strided_slice %63 {offsets = [0, 0], sizes = [8, 32], strides = [1, 1]} : vector<32x32xf32> to vector<8x32xf32>
    %cst_172 = arith.constant dense<0.000000e+00> : vector<8x32xf32>
    %230 = tpu.matmul %228, %229, %cst_172 {dimension_numbers = #tpu.dot_dimension_numbers<[1], [0], [0], [1], [0, 0, 1, 1], [], []>} : vector<8x8xf32>, vector<8x32xf32>, vector<8x32xf32> -> vector<8x32xf32>
    %231 = vector.extract_strided_slice %209 {offsets = [0, 8], sizes = [8, 8], strides = [1, 1]} : vector<8x32xf32> to vector<8x8xf32>
    %232 = vector.extract_strided_slice %210 {offsets = [0, 8], sizes = [8, 8], strides = [1, 1]} : vector<8x32xf32> to vector<8x8xf32>
    %233 = vector.extract_strided_slice %211 {offsets = [0, 8], sizes = [8, 8], strides = [1, 1]} : vector<8x32xf32> to vector<8x8xf32>
    %cst_173 = arith.constant dense<0.000000e+00> : vector<8x8xf32>
    %234 = tpu.matmul %231, %232, %cst_173 {dimension_numbers = #tpu.dot_dimension_numbers<[1], [1], [0], [0], [0, 0, 1, 0], [], []>} : vector<8x8xf32>, vector<8x8xf32>, vector<8x8xf32> -> vector<8x8xf32>
    %cst_174 = arith.constant 0.353553385 : f32
    %235 = vector.broadcast %cst_174 : f32 to vector<8x8xf32>
    %236 = arith.mulf %234, %235 : vector<8x8xf32>
    %cst_175 = arith.constant dense<0xFF800000> : vector<8xf32>
    %237 = vector.multi_reduction <maximumf>, %236, %cst_175 [1] : vector<8x8xf32> to vector<8xf32>
    %238 = vector.shape_cast %237 : vector<8xf32> to vector<8x1xf32>
    %239 = vector.broadcast %238 : vector<8x1xf32> to vector<8x8xf32>
    %240 = arith.subf %236, %239 : vector<8x8xf32>
    %241 = math.exp %240 : vector<8x8xf32>
    %cst_176 = arith.constant dense<0.000000e+00> : vector<8xf32>
    %242 = vector.multi_reduction <add>, %241, %cst_176 [1] : vector<8x8xf32> to vector<8xf32>
    %243 = vector.shape_cast %242 : vector<8xf32> to vector<8x1xf32>
    %244 = tpu.reciprocal %243 {approx = true} : vector<8x1xf32> -> vector<8x1xf32>
    %245 = vector.broadcast %244 : vector<8x1xf32> to vector<8x8xf32>
    %246 = arith.mulf %241, %245 : vector<8x8xf32>
    %cst_177 = arith.constant dense<0.000000e+00> : vector<8x8xf32>
    %247 = tpu.matmul %246, %233, %cst_177 {dimension_numbers = #tpu.dot_dimension_numbers<[1], [0], [0], [1], [0, 0, 1, 1], [], []>} : vector<8x8xf32>, vector<8x8xf32>, vector<8x8xf32> -> vector<8x8xf32>
    %248 = vector.extract_strided_slice %63 {offsets = [8, 0], sizes = [8, 32], strides = [1, 1]} : vector<32x32xf32> to vector<8x32xf32>
    %cst_178 = arith.constant dense<0.000000e+00> : vector<8x32xf32>
    %249 = tpu.matmul %247, %248, %cst_178 {dimension_numbers = #tpu.dot_dimension_numbers<[1], [0], [0], [1], [0, 0, 1, 1], [], []>} : vector<8x8xf32>, vector<8x32xf32>, vector<8x32xf32> -> vector<8x32xf32>
    %250 = arith.addf %230, %249 : vector<8x32xf32>
    %251 = vector.extract_strided_slice %209 {offsets = [0, 16], sizes = [8, 8], strides = [1, 1]} : vector<8x32xf32> to vector<8x8xf32>
    %252 = vector.extract_strided_slice %210 {offsets = [0, 16], sizes = [8, 8], strides = [1, 1]} : vector<8x32xf32> to vector<8x8xf32>
    %253 = vector.extract_strided_slice %211 {offsets = [0, 16], sizes = [8, 8], strides = [1, 1]} : vector<8x32xf32> to vector<8x8xf32>
    %cst_179 = arith.constant dense<0.000000e+00> : vector<8x8xf32>
    %254 = tpu.matmul %251, %252, %cst_179 {dimension_numbers = #tpu.dot_dimension_numbers<[1], [1], [0], [0], [0, 0, 1, 0], [], []>} : vector<8x8xf32>, vector<8x8xf32>, vector<8x8xf32> -> vector<8x8xf32>
    %cst_180 = arith.constant 0.353553385 : f32
    %255 = vector.broadcast %cst_180 : f32 to vector<8x8xf32>
    %256 = arith.mulf %254, %255 : vector<8x8xf32>
    %cst_181 = arith.constant dense<0xFF800000> : vector<8xf32>
    %257 = vector.multi_reduction <maximumf>, %256, %cst_181 [1] : vector<8x8xf32> to vector<8xf32>
    %258 = vector.shape_cast %257 : vector<8xf32> to vector<8x1xf32>
    %259 = vector.broadcast %258 : vector<8x1xf32> to vector<8x8xf32>
    %260 = arith.subf %256, %259 : vector<8x8xf32>
    %261 = math.exp %260 : vector<8x8xf32>
    %cst_182 = arith.constant dense<0.000000e+00> : vector<8xf32>
    %262 = vector.multi_reduction <add>, %261, %cst_182 [1] : vector<8x8xf32> to vector<8xf32>
    %263 = vector.shape_cast %262 : vector<8xf32> to vector<8x1xf32>
    %264 = tpu.reciprocal %263 {approx = true} : vector<8x1xf32> -> vector<8x1xf32>
    %265 = vector.broadcast %264 : vector<8x1xf32> to vector<8x8xf32>
    %266 = arith.mulf %261, %265 : vector<8x8xf32>
    %cst_183 = arith.constant dense<0.000000e+00> : vector<8x8xf32>
    %267 = tpu.matmul %266, %253, %cst_183 {dimension_numbers = #tpu.dot_dimension_numbers<[1], [0], [0], [1], [0, 0, 1, 1], [], []>} : vector<8x8xf32>, vector<8x8xf32>, vector<8x8xf32> -> vector<8x8xf32>
    %268 = vector.extract_strided_slice %63 {offsets = [16, 0], sizes = [8, 32], strides = [1, 1]} : vector<32x32xf32> to vector<8x32xf32>
    %cst_184 = arith.constant dense<0.000000e+00> : vector<8x32xf32>
    %269 = tpu.matmul %267, %268, %cst_184 {dimension_numbers = #tpu.dot_dimension_numbers<[1], [0], [0], [1], [0, 0, 1, 1], [], []>} : vector<8x8xf32>, vector<8x32xf32>, vector<8x32xf32> -> vector<8x32xf32>
    %270 = arith.addf %250, %269 : vector<8x32xf32>
    %271 = vector.extract_strided_slice %209 {offsets = [0, 24], sizes = [8, 8], strides = [1, 1]} : vector<8x32xf32> to vector<8x8xf32>
    %272 = vector.extract_strided_slice %210 {offsets = [0, 24], sizes = [8, 8], strides = [1, 1]} : vector<8x32xf32> to vector<8x8xf32>
    %273 = vector.extract_strided_slice %211 {offsets = [0, 24], sizes = [8, 8], strides = [1, 1]} : vector<8x32xf32> to vector<8x8xf32>
    %cst_185 = arith.constant dense<0.000000e+00> : vector<8x8xf32>
    %274 = tpu.matmul %271, %272, %cst_185 {dimension_numbers = #tpu.dot_dimension_numbers<[1], [1], [0], [0], [0, 0, 1, 0], [], []>} : vector<8x8xf32>, vector<8x8xf32>, vector<8x8xf32> -> vector<8x8xf32>
    %cst_186 = arith.constant 0.353553385 : f32
    %275 = vector.broadcast %cst_186 : f32 to vector<8x8xf32>
    %276 = arith.mulf %274, %275 : vector<8x8xf32>
    %cst_187 = arith.constant dense<0xFF800000> : vector<8xf32>
    %277 = vector.multi_reduction <maximumf>, %276, %cst_187 [1] : vector<8x8xf32> to vector<8xf32>
    %278 = vector.shape_cast %277 : vector<8xf32> to vector<8x1xf32>
    %279 = vector.broadcast %278 : vector<8x1xf32> to vector<8x8xf32>
    %280 = arith.subf %276, %279 : vector<8x8xf32>
    %281 = math.exp %280 : vector<8x8xf32>
    %cst_188 = arith.constant dense<0.000000e+00> : vector<8xf32>
    %282 = vector.multi_reduction <add>, %281, %cst_188 [1] : vector<8x8xf32> to vector<8xf32>
    %283 = vector.shape_cast %282 : vector<8xf32> to vector<8x1xf32>
    %284 = tpu.reciprocal %283 {approx = true} : vector<8x1xf32> -> vector<8x1xf32>
    %285 = vector.broadcast %284 : vector<8x1xf32> to vector<8x8xf32>
    %286 = arith.mulf %281, %285 : vector<8x8xf32>
    %cst_189 = arith.constant dense<0.000000e+00> : vector<8x8xf32>
    %287 = tpu.matmul %286, %273, %cst_189 {dimension_numbers = #tpu.dot_dimension_numbers<[1], [0], [0], [1], [0, 0, 1, 1], [], []>} : vector<8x8xf32>, vector<8x8xf32>, vector<8x8xf32> -> vector<8x8xf32>
    %288 = vector.extract_strided_slice %63 {offsets = [24, 0], sizes = [8, 32], strides = [1, 1]} : vector<32x32xf32> to vector<8x32xf32>
    %cst_190 = arith.constant dense<0.000000e+00> : vector<8x32xf32>
    %289 = tpu.matmul %287, %288, %cst_190 {dimension_numbers = #tpu.dot_dimension_numbers<[1], [0], [0], [1], [0, 0, 1, 1], [], []>} : vector<8x8xf32>, vector<8x32xf32>, vector<8x32xf32> -> vector<8x32xf32>
    %290 = arith.addf %270, %289 : vector<8x32xf32>
    %291 = vector.broadcast %61 : vector<1x32xf32> to vector<8x32xf32>
    %292 = arith.addf %290, %291 : vector<8x32xf32>
    %293 = arith.addf %205, %292 : vector<8x32xf32>
    %cst_191 = arith.constant dense<0.000000e+00> : vector<8xf32>
    %294 = vector.multi_reduction <add>, %293, %cst_191 [1] : vector<8x32xf32> to vector<8xf32>
    %295 = vector.shape_cast %294 : vector<8xf32> to vector<8x1xf32>
    %cst_192 = arith.constant 3.200000e+01 : f32
    %296 = vector.broadcast %cst_192 : f32 to vector<8x1xf32>
    %297 = arith.divf %295, %296 : vector<8x1xf32>
    %298 = vector.broadcast %297 : vector<8x1xf32> to vector<8x32xf32>
    %299 = arith.subf %293, %298 : vector<8x32xf32>
    %300 = arith.mulf %299, %299 : vector<8x32xf32>
    %cst_193 = arith.constant dense<0.000000e+00> : vector<8xf32>
    %301 = vector.multi_reduction <add>, %300, %cst_193 [1] : vector<8x32xf32> to vector<8xf32>
    %302 = vector.shape_cast %301 : vector<8xf32> to vector<8x1xf32>
    %cst_194 = arith.constant 3.200000e+01 : f32
    %303 = vector.broadcast %cst_194 : f32 to vector<8x1xf32>
    %304 = arith.divf %302, %303 : vector<8x1xf32>
    %305 = vector.broadcast %297 : vector<8x1xf32> to vector<8x32xf32>
    %306 = arith.subf %293, %305 : vector<8x32xf32>
    %cst_195 = arith.constant 9.99999974E-6 : f32
    %307 = vector.broadcast %cst_195 : f32 to vector<8x1xf32>
    %308 = arith.addf %304, %307 : vector<8x1xf32>
    %309 = math.rsqrt %308 : vector<8x1xf32>
    %310 = vector.broadcast %309 : vector<8x1xf32> to vector<8x32xf32>
    %311 = arith.mulf %306, %310 : vector<8x32xf32>
    %312 = vector.broadcast %57 : vector<1x32xf32> to vector<8x32xf32>
    %313 = arith.mulf %311, %312 : vector<8x32xf32>
    %314 = vector.broadcast %56 : vector<1x32xf32> to vector<8x32xf32>
    %315 = arith.addf %313, %314 : vector<8x32xf32>
    %cst_196 = arith.constant dense<0.000000e+00> : vector<8x64xf32>
    %316 = tpu.matmul %315, %53, %cst_196 {dimension_numbers = #tpu.dot_dimension_numbers<[1], [0], [0], [1], [0, 0, 1, 1], [], []>} : vector<8x32xf32>, vector<32x64xf32>, vector<8x64xf32> -> vector<8x64xf32>
    %317 = vector.broadcast %52 : vector<1x64xf32> to vector<8x64xf32>
    %318 = arith.addf %316, %317 : vector<8x64xf32>
    %cst_197 = arith.constant 0.000000e+00 : f32
    %319 = vector.broadcast %cst_197 : f32 to vector<8x64xf32>
    %320 = arith.maximumf %318, %319 : vector<8x64xf32>
    %cst_198 = arith.constant dense<0.000000e+00> : vector<8x32xf32>
    %321 = tpu.matmul %320, %55, %cst_198 {dimension_numbers = #tpu.dot_dimension_numbers<[1], [0], [0], [1], [0, 0, 1, 1], [], []>} : vector<8x64xf32>, vector<64x32xf32>, vector<8x32xf32> -> vector<8x32xf32>
    %322 = vector.broadcast %54 : vector<1x32xf32> to vector<8x32xf32>
    %323 = arith.addf %321, %322 : vector<8x32xf32>
    %324 = arith.addf %315, %323 : vector<8x32xf32>
    %cst_199 = arith.constant dense<0.000000e+00> : vector<8xf32>
    %325 = vector.multi_reduction <add>, %324, %cst_199 [1] : vector<8x32xf32> to vector<8xf32>
    %326 = vector.shape_cast %325 : vector<8xf32> to vector<8x1xf32>
    %cst_200 = arith.constant 3.200000e+01 : f32
    %327 = vector.broadcast %cst_200 : f32 to vector<8x1xf32>
    %328 = arith.divf %326, %327 : vector<8x1xf32>
    %329 = vector.broadcast %328 : vector<8x1xf32> to vector<8x32xf32>
    %330 = arith.subf %324, %329 : vector<8x32xf32>
    %331 = arith.mulf %330, %330 : vector<8x32xf32>
    %cst_201 = arith.constant dense<0.000000e+00> : vector<8xf32>
    %332 = vector.multi_reduction <add>, %331, %cst_201 [1] : vector<8x32xf32> to vector<8xf32>
    %333 = vector.shape_cast %332 : vector<8xf32> to vector<8x1xf32>
    %cst_202 = arith.constant 3.200000e+01 : f32
    %334 = vector.broadcast %cst_202 : f32 to vector<8x1xf32>
    %335 = arith.divf %333, %334 : vector<8x1xf32>
    %336 = vector.broadcast %328 : vector<8x1xf32> to vector<8x32xf32>
    %337 = arith.subf %324, %336 : vector<8x32xf32>
    %cst_203 = arith.constant 9.99999974E-6 : f32
    %338 = vector.broadcast %cst_203 : f32 to vector<8x1xf32>
    %339 = arith.addf %335, %338 : vector<8x1xf32>
    %340 = math.rsqrt %339 : vector<8x1xf32>
    %341 = vector.broadcast %340 : vector<8x1xf32> to vector<8x32xf32>
    %342 = arith.mulf %337, %341 : vector<8x32xf32>
    %343 = vector.broadcast %59 : vector<1x32xf32> to vector<8x32xf32>
    %344 = arith.mulf %342, %343 : vector<8x32xf32>
    %345 = vector.broadcast %58 : vector<1x32xf32> to vector<8x32xf32>
    %346 = arith.addf %344, %345 : vector<8x32xf32>
    %cst_204 = arith.constant dense<0.000000e+00> : vector<8xf32>
    %347 = vector.multi_reduction <add>, %346, %cst_204 [1] : vector<8x32xf32> to vector<8xf32>
    %348 = vector.shape_cast %347 : vector<8xf32> to vector<8x1xf32>
    %cst_205 = arith.constant 3.200000e+01 : f32
    %349 = vector.broadcast %cst_205 : f32 to vector<8x1xf32>
    %350 = arith.divf %348, %349 : vector<8x1xf32>
    %351 = vector.broadcast %350 : vector<8x1xf32> to vector<8x32xf32>
    %352 = arith.subf %346, %351 : vector<8x32xf32>
    %353 = arith.mulf %352, %352 : vector<8x32xf32>
    %cst_206 = arith.constant dense<0.000000e+00> : vector<8xf32>
    %354 = vector.multi_reduction <add>, %353, %cst_206 [1] : vector<8x32xf32> to vector<8xf32>
    %355 = vector.shape_cast %354 : vector<8xf32> to vector<8x1xf32>
    %cst_207 = arith.constant 3.200000e+01 : f32
    %356 = vector.broadcast %cst_207 : f32 to vector<8x1xf32>
    %357 = arith.divf %355, %356 : vector<8x1xf32>
    %358 = vector.broadcast %350 : vector<8x1xf32> to vector<8x32xf32>
    %359 = arith.subf %346, %358 : vector<8x32xf32>
    %cst_208 = arith.constant 9.99999974E-6 : f32
    %360 = vector.broadcast %cst_208 : f32 to vector<8x1xf32>
    %361 = arith.addf %357, %360 : vector<8x1xf32>
    %362 = math.rsqrt %361 : vector<8x1xf32>
    %363 = vector.broadcast %362 : vector<8x1xf32> to vector<8x32xf32>
    %364 = arith.mulf %359, %363 : vector<8x32xf32>
    %365 = vector.broadcast %39 : vector<1x32xf32> to vector<8x32xf32>
    %366 = arith.mulf %364, %365 : vector<8x32xf32>
    %367 = vector.broadcast %38 : vector<1x32xf32> to vector<8x32xf32>
    %368 = arith.addf %366, %367 : vector<8x32xf32>
    %cst_209 = arith.constant dense<0.000000e+00> : vector<8x96xf32>
    %369 = tpu.matmul %64, %18, %cst_209 {dimension_numbers = #tpu.dot_dimension_numbers<[1], [0], [0], [1], [0, 0, 1, 1], [], []>} : vector<8x32xf32>, vector<32x96xf32>, vector<8x96xf32> -> vector<8x96xf32>
    %370 = vector.broadcast %16 : vector<1x96xf32> to vector<8x96xf32>
    %371 = arith.addf %369, %370 : vector<8x96xf32>
    %372 = vector.extract_strided_slice %371 {offsets = [0, 0], sizes = [8, 32], strides = [1, 1]} : vector<8x96xf32> to vector<8x32xf32>
    %373 = vector.extract_strided_slice %371 {offsets = [0, 32], sizes = [8, 32], strides = [1, 1]} : vector<8x96xf32> to vector<8x32xf32>
    %374 = vector.extract_strided_slice %371 {offsets = [0, 64], sizes = [8, 32], strides = [1, 1]} : vector<8x96xf32> to vector<8x32xf32>
    %375 = vector.extract_strided_slice %372 {offsets = [0, 0], sizes = [8, 8], strides = [1, 1]} : vector<8x32xf32> to vector<8x8xf32>
    %376 = vector.extract_strided_slice %373 {offsets = [0, 0], sizes = [8, 8], strides = [1, 1]} : vector<8x32xf32> to vector<8x8xf32>
    %377 = vector.extract_strided_slice %374 {offsets = [0, 0], sizes = [8, 8], strides = [1, 1]} : vector<8x32xf32> to vector<8x8xf32>
    %cst_210 = arith.constant dense<0.000000e+00> : vector<8x8xf32>
    %378 = tpu.matmul %375, %376, %cst_210 {dimension_numbers = #tpu.dot_dimension_numbers<[1], [1], [0], [0], [0, 0, 1, 0], [], []>} : vector<8x8xf32>, vector<8x8xf32>, vector<8x8xf32> -> vector<8x8xf32>
    %cst_211 = arith.constant 0.353553385 : f32
    %379 = vector.broadcast %cst_211 : f32 to vector<8x8xf32>
    %380 = arith.mulf %378, %379 : vector<8x8xf32>
    %cst_212 = arith.constant dense<0xFF800000> : vector<8xf32>
    %381 = vector.multi_reduction <maximumf>, %380, %cst_212 [1] : vector<8x8xf32> to vector<8xf32>
    %382 = vector.shape_cast %381 : vector<8xf32> to vector<8x1xf32>
    %383 = vector.broadcast %382 : vector<8x1xf32> to vector<8x8xf32>
    %384 = arith.subf %380, %383 : vector<8x8xf32>
    %385 = math.exp %384 : vector<8x8xf32>
    %cst_213 = arith.constant dense<0.000000e+00> : vector<8xf32>
    %386 = vector.multi_reduction <add>, %385, %cst_213 [1] : vector<8x8xf32> to vector<8xf32>
    %387 = vector.shape_cast %386 : vector<8xf32> to vector<8x1xf32>
    %388 = tpu.reciprocal %387 {approx = true} : vector<8x1xf32> -> vector<8x1xf32>
    %389 = vector.broadcast %388 : vector<8x1xf32> to vector<8x8xf32>
    %390 = arith.mulf %385, %389 : vector<8x8xf32>
    %cst_214 = arith.constant dense<0.000000e+00> : vector<8x8xf32>
    %391 = tpu.matmul %390, %377, %cst_214 {dimension_numbers = #tpu.dot_dimension_numbers<[1], [0], [0], [1], [0, 0, 1, 1], [], []>} : vector<8x8xf32>, vector<8x8xf32>, vector<8x8xf32> -> vector<8x8xf32>
    %392 = vector.extract_strided_slice %19 {offsets = [0, 0], sizes = [8, 32], strides = [1, 1]} : vector<32x32xf32> to vector<8x32xf32>
    %cst_215 = arith.constant dense<0.000000e+00> : vector<8x32xf32>
    %393 = tpu.matmul %391, %392, %cst_215 {dimension_numbers = #tpu.dot_dimension_numbers<[1], [0], [0], [1], [0, 0, 1, 1], [], []>} : vector<8x8xf32>, vector<8x32xf32>, vector<8x32xf32> -> vector<8x32xf32>
    %394 = vector.extract_strided_slice %372 {offsets = [0, 8], sizes = [8, 8], strides = [1, 1]} : vector<8x32xf32> to vector<8x8xf32>
    %395 = vector.extract_strided_slice %373 {offsets = [0, 8], sizes = [8, 8], strides = [1, 1]} : vector<8x32xf32> to vector<8x8xf32>
    %396 = vector.extract_strided_slice %374 {offsets = [0, 8], sizes = [8, 8], strides = [1, 1]} : vector<8x32xf32> to vector<8x8xf32>
    %cst_216 = arith.constant dense<0.000000e+00> : vector<8x8xf32>
    %397 = tpu.matmul %394, %395, %cst_216 {dimension_numbers = #tpu.dot_dimension_numbers<[1], [1], [0], [0], [0, 0, 1, 0], [], []>} : vector<8x8xf32>, vector<8x8xf32>, vector<8x8xf32> -> vector<8x8xf32>
    %cst_217 = arith.constant 0.353553385 : f32
    %398 = vector.broadcast %cst_217 : f32 to vector<8x8xf32>
    %399 = arith.mulf %397, %398 : vector<8x8xf32>
    %cst_218 = arith.constant dense<0xFF800000> : vector<8xf32>
    %400 = vector.multi_reduction <maximumf>, %399, %cst_218 [1] : vector<8x8xf32> to vector<8xf32>
    %401 = vector.shape_cast %400 : vector<8xf32> to vector<8x1xf32>
    %402 = vector.broadcast %401 : vector<8x1xf32> to vector<8x8xf32>
    %403 = arith.subf %399, %402 : vector<8x8xf32>
    %404 = math.exp %403 : vector<8x8xf32>
    %cst_219 = arith.constant dense<0.000000e+00> : vector<8xf32>
    %405 = vector.multi_reduction <add>, %404, %cst_219 [1] : vector<8x8xf32> to vector<8xf32>
    %406 = vector.shape_cast %405 : vector<8xf32> to vector<8x1xf32>
    %407 = tpu.reciprocal %406 {approx = true} : vector<8x1xf32> -> vector<8x1xf32>
    %408 = vector.broadcast %407 : vector<8x1xf32> to vector<8x8xf32>
    %409 = arith.mulf %404, %408 : vector<8x8xf32>
    %cst_220 = arith.constant dense<0.000000e+00> : vector<8x8xf32>
    %410 = tpu.matmul %409, %396, %cst_220 {dimension_numbers = #tpu.dot_dimension_numbers<[1], [0], [0], [1], [0, 0, 1, 1], [], []>} : vector<8x8xf32>, vector<8x8xf32>, vector<8x8xf32> -> vector<8x8xf32>
    %411 = vector.extract_strided_slice %19 {offsets = [8, 0], sizes = [8, 32], strides = [1, 1]} : vector<32x32xf32> to vector<8x32xf32>
    %cst_221 = arith.constant dense<0.000000e+00> : vector<8x32xf32>
    %412 = tpu.matmul %410, %411, %cst_221 {dimension_numbers = #tpu.dot_dimension_numbers<[1], [0], [0], [1], [0, 0, 1, 1], [], []>} : vector<8x8xf32>, vector<8x32xf32>, vector<8x32xf32> -> vector<8x32xf32>
    %413 = arith.addf %393, %412 : vector<8x32xf32>
    %414 = vector.extract_strided_slice %372 {offsets = [0, 16], sizes = [8, 8], strides = [1, 1]} : vector<8x32xf32> to vector<8x8xf32>
    %415 = vector.extract_strided_slice %373 {offsets = [0, 16], sizes = [8, 8], strides = [1, 1]} : vector<8x32xf32> to vector<8x8xf32>
    %416 = vector.extract_strided_slice %374 {offsets = [0, 16], sizes = [8, 8], strides = [1, 1]} : vector<8x32xf32> to vector<8x8xf32>
    %cst_222 = arith.constant dense<0.000000e+00> : vector<8x8xf32>
    %417 = tpu.matmul %414, %415, %cst_222 {dimension_numbers = #tpu.dot_dimension_numbers<[1], [1], [0], [0], [0, 0, 1, 0], [], []>} : vector<8x8xf32>, vector<8x8xf32>, vector<8x8xf32> -> vector<8x8xf32>
    %cst_223 = arith.constant 0.353553385 : f32
    %418 = vector.broadcast %cst_223 : f32 to vector<8x8xf32>
    %419 = arith.mulf %417, %418 : vector<8x8xf32>
    %cst_224 = arith.constant dense<0xFF800000> : vector<8xf32>
    %420 = vector.multi_reduction <maximumf>, %419, %cst_224 [1] : vector<8x8xf32> to vector<8xf32>
    %421 = vector.shape_cast %420 : vector<8xf32> to vector<8x1xf32>
    %422 = vector.broadcast %421 : vector<8x1xf32> to vector<8x8xf32>
    %423 = arith.subf %419, %422 : vector<8x8xf32>
    %424 = math.exp %423 : vector<8x8xf32>
    %cst_225 = arith.constant dense<0.000000e+00> : vector<8xf32>
    %425 = vector.multi_reduction <add>, %424, %cst_225 [1] : vector<8x8xf32> to vector<8xf32>
    %426 = vector.shape_cast %425 : vector<8xf32> to vector<8x1xf32>
    %427 = tpu.reciprocal %426 {approx = true} : vector<8x1xf32> -> vector<8x1xf32>
    %428 = vector.broadcast %427 : vector<8x1xf32> to vector<8x8xf32>
    %429 = arith.mulf %424, %428 : vector<8x8xf32>
    %cst_226 = arith.constant dense<0.000000e+00> : vector<8x8xf32>
    %430 = tpu.matmul %429, %416, %cst_226 {dimension_numbers = #tpu.dot_dimension_numbers<[1], [0], [0], [1], [0, 0, 1, 1], [], []>} : vector<8x8xf32>, vector<8x8xf32>, vector<8x8xf32> -> vector<8x8xf32>
    %431 = vector.extract_strided_slice %19 {offsets = [16, 0], sizes = [8, 32], strides = [1, 1]} : vector<32x32xf32> to vector<8x32xf32>
    %cst_227 = arith.constant dense<0.000000e+00> : vector<8x32xf32>
    %432 = tpu.matmul %430, %431, %cst_227 {dimension_numbers = #tpu.dot_dimension_numbers<[1], [0], [0], [1], [0, 0, 1, 1], [], []>} : vector<8x8xf32>, vector<8x32xf32>, vector<8x32xf32> -> vector<8x32xf32>
    %433 = arith.addf %413, %432 : vector<8x32xf32>
    %434 = vector.extract_strided_slice %372 {offsets = [0, 24], sizes = [8, 8], strides = [1, 1]} : vector<8x32xf32> to vector<8x8xf32>
    %435 = vector.extract_strided_slice %373 {offsets = [0, 24], sizes = [8, 8], strides = [1, 1]} : vector<8x32xf32> to vector<8x8xf32>
    %436 = vector.extract_strided_slice %374 {offsets = [0, 24], sizes = [8, 8], strides = [1, 1]} : vector<8x32xf32> to vector<8x8xf32>
    %cst_228 = arith.constant dense<0.000000e+00> : vector<8x8xf32>
    %437 = tpu.matmul %434, %435, %cst_228 {dimension_numbers = #tpu.dot_dimension_numbers<[1], [1], [0], [0], [0, 0, 1, 0], [], []>} : vector<8x8xf32>, vector<8x8xf32>, vector<8x8xf32> -> vector<8x8xf32>
    %cst_229 = arith.constant 0.353553385 : f32
    %438 = vector.broadcast %cst_229 : f32 to vector<8x8xf32>
    %439 = arith.mulf %437, %438 : vector<8x8xf32>
    %cst_230 = arith.constant dense<0xFF800000> : vector<8xf32>
    %440 = vector.multi_reduction <maximumf>, %439, %cst_230 [1] : vector<8x8xf32> to vector<8xf32>
    %441 = vector.shape_cast %440 : vector<8xf32> to vector<8x1xf32>
    %442 = vector.broadcast %441 : vector<8x1xf32> to vector<8x8xf32>
    %443 = arith.subf %439, %442 : vector<8x8xf32>
    %444 = math.exp %443 : vector<8x8xf32>
    %cst_231 = arith.constant dense<0.000000e+00> : vector<8xf32>
    %445 = vector.multi_reduction <add>, %444, %cst_231 [1] : vector<8x8xf32> to vector<8xf32>
    %446 = vector.shape_cast %445 : vector<8xf32> to vector<8x1xf32>
    %447 = tpu.reciprocal %446 {approx = true} : vector<8x1xf32> -> vector<8x1xf32>
    %448 = vector.broadcast %447 : vector<8x1xf32> to vector<8x8xf32>
    %449 = arith.mulf %444, %448 : vector<8x8xf32>
    %cst_232 = arith.constant dense<0.000000e+00> : vector<8x8xf32>
    %450 = tpu.matmul %449, %436, %cst_232 {dimension_numbers = #tpu.dot_dimension_numbers<[1], [0], [0], [1], [0, 0, 1, 1], [], []>} : vector<8x8xf32>, vector<8x8xf32>, vector<8x8xf32> -> vector<8x8xf32>
    %451 = vector.extract_strided_slice %19 {offsets = [24, 0], sizes = [8, 32], strides = [1, 1]} : vector<32x32xf32> to vector<8x32xf32>
    %cst_233 = arith.constant dense<0.000000e+00> : vector<8x32xf32>
    %452 = tpu.matmul %450, %451, %cst_233 {dimension_numbers = #tpu.dot_dimension_numbers<[1], [0], [0], [1], [0, 0, 1, 1], [], []>} : vector<8x8xf32>, vector<8x32xf32>, vector<8x32xf32> -> vector<8x32xf32>
    %453 = arith.addf %433, %452 : vector<8x32xf32>
    %454 = vector.broadcast %17 : vector<1x32xf32> to vector<8x32xf32>
    %455 = arith.addf %453, %454 : vector<8x32xf32>
    %456 = arith.addf %64, %455 : vector<8x32xf32>
    %cst_234 = arith.constant dense<0.000000e+00> : vector<8xf32>
    %457 = vector.multi_reduction <add>, %456, %cst_234 [1] : vector<8x32xf32> to vector<8xf32>
    %458 = vector.shape_cast %457 : vector<8xf32> to vector<8x1xf32>
    %cst_235 = arith.constant 3.200000e+01 : f32
    %459 = vector.broadcast %cst_235 : f32 to vector<8x1xf32>
    %460 = arith.divf %458, %459 : vector<8x1xf32>
    %461 = vector.broadcast %460 : vector<8x1xf32> to vector<8x32xf32>
    %462 = arith.subf %456, %461 : vector<8x32xf32>
    %463 = arith.mulf %462, %462 : vector<8x32xf32>
    %cst_236 = arith.constant dense<0.000000e+00> : vector<8xf32>
    %464 = vector.multi_reduction <add>, %463, %cst_236 [1] : vector<8x32xf32> to vector<8xf32>
    %465 = vector.shape_cast %464 : vector<8xf32> to vector<8x1xf32>
    %cst_237 = arith.constant 3.200000e+01 : f32
    %466 = vector.broadcast %cst_237 : f32 to vector<8x1xf32>
    %467 = arith.divf %465, %466 : vector<8x1xf32>
    %468 = vector.broadcast %460 : vector<8x1xf32> to vector<8x32xf32>
    %469 = arith.subf %456, %468 : vector<8x32xf32>
    %cst_238 = arith.constant 9.99999974E-6 : f32
    %470 = vector.broadcast %cst_238 : f32 to vector<8x1xf32>
    %471 = arith.addf %467, %470 : vector<8x1xf32>
    %472 = math.rsqrt %471 : vector<8x1xf32>
    %473 = vector.broadcast %472 : vector<8x1xf32> to vector<8x32xf32>
    %474 = arith.mulf %469, %473 : vector<8x32xf32>
    %475 = vector.broadcast %11 : vector<1x32xf32> to vector<8x32xf32>
    %476 = arith.mulf %474, %475 : vector<8x32xf32>
    %477 = vector.broadcast %10 : vector<1x32xf32> to vector<8x32xf32>
    %478 = arith.addf %476, %477 : vector<8x32xf32>
    %479 = vector.extract_strided_slice %4 {offsets = [0, 0], sizes = [32, 32], strides = [1, 1]} : vector<32x96xf32> to vector<32x32xf32>
    %cst_239 = arith.constant dense<0.000000e+00> : vector<8x32xf32>
    %480 = tpu.matmul %478, %479, %cst_239 {dimension_numbers = #tpu.dot_dimension_numbers<[1], [0], [0], [1], [0, 0, 1, 1], [], []>} : vector<8x32xf32>, vector<32x32xf32>, vector<8x32xf32> -> vector<8x32xf32>
    %481 = vector.extract_strided_slice %2 {offsets = [0, 0], sizes = [1, 32], strides = [1, 1]} : vector<1x96xf32> to vector<1x32xf32>
    %482 = vector.broadcast %481 : vector<1x32xf32> to vector<8x32xf32>
    %483 = arith.addf %480, %482 : vector<8x32xf32>
    %484 = vector.extract_strided_slice %4 {offsets = [0, 32], sizes = [32, 64], strides = [1, 1]} : vector<32x96xf32> to vector<32x64xf32>
    %cst_240 = arith.constant dense<0.000000e+00> : vector<8x64xf32>
    %485 = tpu.matmul %368, %484, %cst_240 {dimension_numbers = #tpu.dot_dimension_numbers<[1], [0], [0], [1], [0, 0, 1, 1], [], []>} : vector<8x32xf32>, vector<32x64xf32>, vector<8x64xf32> -> vector<8x64xf32>
    %486 = vector.extract_strided_slice %2 {offsets = [0, 32], sizes = [1, 64], strides = [1, 1]} : vector<1x96xf32> to vector<1x64xf32>
    %487 = vector.broadcast %486 : vector<1x64xf32> to vector<8x64xf32>
    %488 = arith.addf %485, %487 : vector<8x64xf32>
    %489 = vector.extract_strided_slice %488 {offsets = [0, 0], sizes = [8, 32], strides = [1, 1]} : vector<8x64xf32> to vector<8x32xf32>
    %490 = vector.extract_strided_slice %488 {offsets = [0, 32], sizes = [8, 32], strides = [1, 1]} : vector<8x64xf32> to vector<8x32xf32>
    %491 = vector.extract_strided_slice %483 {offsets = [0, 0], sizes = [8, 8], strides = [1, 1]} : vector<8x32xf32> to vector<8x8xf32>
    %492 = vector.extract_strided_slice %489 {offsets = [0, 0], sizes = [8, 8], strides = [1, 1]} : vector<8x32xf32> to vector<8x8xf32>
    %493 = vector.extract_strided_slice %490 {offsets = [0, 0], sizes = [8, 8], strides = [1, 1]} : vector<8x32xf32> to vector<8x8xf32>
    %cst_241 = arith.constant dense<0.000000e+00> : vector<8x8xf32>
    %494 = tpu.matmul %491, %492, %cst_241 {dimension_numbers = #tpu.dot_dimension_numbers<[1], [1], [0], [0], [0, 0, 1, 0], [], []>} : vector<8x8xf32>, vector<8x8xf32>, vector<8x8xf32> -> vector<8x8xf32>
    %cst_242 = arith.constant 0.353553385 : f32
    %495 = vector.broadcast %cst_242 : f32 to vector<8x8xf32>
    %496 = arith.mulf %494, %495 : vector<8x8xf32>
    %cst_243 = arith.constant dense<0xFF800000> : vector<8xf32>
    %497 = vector.multi_reduction <maximumf>, %496, %cst_243 [1] : vector<8x8xf32> to vector<8xf32>
    %498 = vector.shape_cast %497 : vector<8xf32> to vector<8x1xf32>
    %499 = vector.broadcast %498 : vector<8x1xf32> to vector<8x8xf32>
    %500 = arith.subf %496, %499 : vector<8x8xf32>
    %501 = math.exp %500 : vector<8x8xf32>
    %cst_244 = arith.constant dense<0.000000e+00> : vector<8xf32>
    %502 = vector.multi_reduction <add>, %501, %cst_244 [1] : vector<8x8xf32> to vector<8xf32>
    %503 = vector.shape_cast %502 : vector<8xf32> to vector<8x1xf32>
    %504 = tpu.reciprocal %503 {approx = true} : vector<8x1xf32> -> vector<8x1xf32>
    %505 = vector.broadcast %504 : vector<8x1xf32> to vector<8x8xf32>
    %506 = arith.mulf %501, %505 : vector<8x8xf32>
    %cst_245 = arith.constant dense<0.000000e+00> : vector<8x8xf32>
    %507 = tpu.matmul %506, %493, %cst_245 {dimension_numbers = #tpu.dot_dimension_numbers<[1], [0], [0], [1], [0, 0, 1, 1], [], []>} : vector<8x8xf32>, vector<8x8xf32>, vector<8x8xf32> -> vector<8x8xf32>
    %508 = vector.extract_strided_slice %5 {offsets = [0, 0], sizes = [8, 32], strides = [1, 1]} : vector<32x32xf32> to vector<8x32xf32>
    %cst_246 = arith.constant dense<0.000000e+00> : vector<8x32xf32>
    %509 = tpu.matmul %507, %508, %cst_246 {dimension_numbers = #tpu.dot_dimension_numbers<[1], [0], [0], [1], [0, 0, 1, 1], [], []>} : vector<8x8xf32>, vector<8x32xf32>, vector<8x32xf32> -> vector<8x32xf32>
    %510 = vector.extract_strided_slice %483 {offsets = [0, 8], sizes = [8, 8], strides = [1, 1]} : vector<8x32xf32> to vector<8x8xf32>
    %511 = vector.extract_strided_slice %489 {offsets = [0, 8], sizes = [8, 8], strides = [1, 1]} : vector<8x32xf32> to vector<8x8xf32>
    %512 = vector.extract_strided_slice %490 {offsets = [0, 8], sizes = [8, 8], strides = [1, 1]} : vector<8x32xf32> to vector<8x8xf32>
    %cst_247 = arith.constant dense<0.000000e+00> : vector<8x8xf32>
    %513 = tpu.matmul %510, %511, %cst_247 {dimension_numbers = #tpu.dot_dimension_numbers<[1], [1], [0], [0], [0, 0, 1, 0], [], []>} : vector<8x8xf32>, vector<8x8xf32>, vector<8x8xf32> -> vector<8x8xf32>
    %cst_248 = arith.constant 0.353553385 : f32
    %514 = vector.broadcast %cst_248 : f32 to vector<8x8xf32>
    %515 = arith.mulf %513, %514 : vector<8x8xf32>
    %cst_249 = arith.constant dense<0xFF800000> : vector<8xf32>
    %516 = vector.multi_reduction <maximumf>, %515, %cst_249 [1] : vector<8x8xf32> to vector<8xf32>
    %517 = vector.shape_cast %516 : vector<8xf32> to vector<8x1xf32>
    %518 = vector.broadcast %517 : vector<8x1xf32> to vector<8x8xf32>
    %519 = arith.subf %515, %518 : vector<8x8xf32>
    %520 = math.exp %519 : vector<8x8xf32>
    %cst_250 = arith.constant dense<0.000000e+00> : vector<8xf32>
    %521 = vector.multi_reduction <add>, %520, %cst_250 [1] : vector<8x8xf32> to vector<8xf32>
    %522 = vector.shape_cast %521 : vector<8xf32> to vector<8x1xf32>
    %523 = tpu.reciprocal %522 {approx = true} : vector<8x1xf32> -> vector<8x1xf32>
    %524 = vector.broadcast %523 : vector<8x1xf32> to vector<8x8xf32>
    %525 = arith.mulf %520, %524 : vector<8x8xf32>
    %cst_251 = arith.constant dense<0.000000e+00> : vector<8x8xf32>
    %526 = tpu.matmul %525, %512, %cst_251 {dimension_numbers = #tpu.dot_dimension_numbers<[1], [0], [0], [1], [0, 0, 1, 1], [], []>} : vector<8x8xf32>, vector<8x8xf32>, vector<8x8xf32> -> vector<8x8xf32>
    %527 = vector.extract_strided_slice %5 {offsets = [8, 0], sizes = [8, 32], strides = [1, 1]} : vector<32x32xf32> to vector<8x32xf32>
    %cst_252 = arith.constant dense<0.000000e+00> : vector<8x32xf32>
    %528 = tpu.matmul %526, %527, %cst_252 {dimension_numbers = #tpu.dot_dimension_numbers<[1], [0], [0], [1], [0, 0, 1, 1], [], []>} : vector<8x8xf32>, vector<8x32xf32>, vector<8x32xf32> -> vector<8x32xf32>
    %529 = arith.addf %509, %528 : vector<8x32xf32>
    %530 = vector.extract_strided_slice %483 {offsets = [0, 16], sizes = [8, 8], strides = [1, 1]} : vector<8x32xf32> to vector<8x8xf32>
    %531 = vector.extract_strided_slice %489 {offsets = [0, 16], sizes = [8, 8], strides = [1, 1]} : vector<8x32xf32> to vector<8x8xf32>
    %532 = vector.extract_strided_slice %490 {offsets = [0, 16], sizes = [8, 8], strides = [1, 1]} : vector<8x32xf32> to vector<8x8xf32>
    %cst_253 = arith.constant dense<0.000000e+00> : vector<8x8xf32>
    %533 = tpu.matmul %530, %531, %cst_253 {dimension_numbers = #tpu.dot_dimension_numbers<[1], [1], [0], [0], [0, 0, 1, 0], [], []>} : vector<8x8xf32>, vector<8x8xf32>, vector<8x8xf32> -> vector<8x8xf32>
    %cst_254 = arith.constant 0.353553385 : f32
    %534 = vector.broadcast %cst_254 : f32 to vector<8x8xf32>
    %535 = arith.mulf %533, %534 : vector<8x8xf32>
    %cst_255 = arith.constant dense<0xFF800000> : vector<8xf32>
    %536 = vector.multi_reduction <maximumf>, %535, %cst_255 [1] : vector<8x8xf32> to vector<8xf32>
    %537 = vector.shape_cast %536 : vector<8xf32> to vector<8x1xf32>
    %538 = vector.broadcast %537 : vector<8x1xf32> to vector<8x8xf32>
    %539 = arith.subf %535, %538 : vector<8x8xf32>
    %540 = math.exp %539 : vector<8x8xf32>
    %cst_256 = arith.constant dense<0.000000e+00> : vector<8xf32>
    %541 = vector.multi_reduction <add>, %540, %cst_256 [1] : vector<8x8xf32> to vector<8xf32>
    %542 = vector.shape_cast %541 : vector<8xf32> to vector<8x1xf32>
    %543 = tpu.reciprocal %542 {approx = true} : vector<8x1xf32> -> vector<8x1xf32>
    %544 = vector.broadcast %543 : vector<8x1xf32> to vector<8x8xf32>
    %545 = arith.mulf %540, %544 : vector<8x8xf32>
    %cst_257 = arith.constant dense<0.000000e+00> : vector<8x8xf32>
    %546 = tpu.matmul %545, %532, %cst_257 {dimension_numbers = #tpu.dot_dimension_numbers<[1], [0], [0], [1], [0, 0, 1, 1], [], []>} : vector<8x8xf32>, vector<8x8xf32>, vector<8x8xf32> -> vector<8x8xf32>
    %547 = vector.extract_strided_slice %5 {offsets = [16, 0], sizes = [8, 32], strides = [1, 1]} : vector<32x32xf32> to vector<8x32xf32>
    %cst_258 = arith.constant dense<0.000000e+00> : vector<8x32xf32>
    %548 = tpu.matmul %546, %547, %cst_258 {dimension_numbers = #tpu.dot_dimension_numbers<[1], [0], [0], [1], [0, 0, 1, 1], [], []>} : vector<8x8xf32>, vector<8x32xf32>, vector<8x32xf32> -> vector<8x32xf32>
    %549 = arith.addf %529, %548 : vector<8x32xf32>
    %550 = vector.extract_strided_slice %483 {offsets = [0, 24], sizes = [8, 8], strides = [1, 1]} : vector<8x32xf32> to vector<8x8xf32>
    %551 = vector.extract_strided_slice %489 {offsets = [0, 24], sizes = [8, 8], strides = [1, 1]} : vector<8x32xf32> to vector<8x8xf32>
    %552 = vector.extract_strided_slice %490 {offsets = [0, 24], sizes = [8, 8], strides = [1, 1]} : vector<8x32xf32> to vector<8x8xf32>
    %cst_259 = arith.constant dense<0.000000e+00> : vector<8x8xf32>
    %553 = tpu.matmul %550, %551, %cst_259 {dimension_numbers = #tpu.dot_dimension_numbers<[1], [1], [0], [0], [0, 0, 1, 0], [], []>} : vector<8x8xf32>, vector<8x8xf32>, vector<8x8xf32> -> vector<8x8xf32>
    %cst_260 = arith.constant 0.353553385 : f32
    %554 = vector.broadcast %cst_260 : f32 to vector<8x8xf32>
    %555 = arith.mulf %553, %554 : vector<8x8xf32>
    %cst_261 = arith.constant dense<0xFF800000> : vector<8xf32>
    %556 = vector.multi_reduction <maximumf>, %555, %cst_261 [1] : vector<8x8xf32> to vector<8xf32>
    %557 = vector.shape_cast %556 : vector<8xf32> to vector<8x1xf32>
    %558 = vector.broadcast %557 : vector<8x1xf32> to vector<8x8xf32>
    %559 = arith.subf %555, %558 : vector<8x8xf32>
    %560 = math.exp %559 : vector<8x8xf32>
    %cst_262 = arith.constant dense<0.000000e+00> : vector<8xf32>
    %561 = vector.multi_reduction <add>, %560, %cst_262 [1] : vector<8x8xf32> to vector<8xf32>
    %562 = vector.shape_cast %561 : vector<8xf32> to vector<8x1xf32>
    %563 = tpu.reciprocal %562 {approx = true} : vector<8x1xf32> -> vector<8x1xf32>
    %564 = vector.broadcast %563 : vector<8x1xf32> to vector<8x8xf32>
    %565 = arith.mulf %560, %564 : vector<8x8xf32>
    %cst_263 = arith.constant dense<0.000000e+00> : vector<8x8xf32>
    %566 = tpu.matmul %565, %552, %cst_263 {dimension_numbers = #tpu.dot_dimension_numbers<[1], [0], [0], [1], [0, 0, 1, 1], [], []>} : vector<8x8xf32>, vector<8x8xf32>, vector<8x8xf32> -> vector<8x8xf32>
    %567 = vector.extract_strided_slice %5 {offsets = [24, 0], sizes = [8, 32], strides = [1, 1]} : vector<32x32xf32> to vector<8x32xf32>
    %cst_264 = arith.constant dense<0.000000e+00> : vector<8x32xf32>
    %568 = tpu.matmul %566, %567, %cst_264 {dimension_numbers = #tpu.dot_dimension_numbers<[1], [0], [0], [1], [0, 0, 1, 1], [], []>} : vector<8x8xf32>, vector<8x32xf32>, vector<8x32xf32> -> vector<8x32xf32>
    %569 = arith.addf %549, %568 : vector<8x32xf32>
    %570 = vector.broadcast %3 : vector<1x32xf32> to vector<8x32xf32>
    %571 = arith.addf %569, %570 : vector<8x32xf32>
    %572 = arith.addf %478, %571 : vector<8x32xf32>
    %cst_265 = arith.constant dense<0.000000e+00> : vector<8xf32>
    %573 = vector.multi_reduction <add>, %572, %cst_265 [1] : vector<8x32xf32> to vector<8xf32>
    %574 = vector.shape_cast %573 : vector<8xf32> to vector<8x1xf32>
    %cst_266 = arith.constant 3.200000e+01 : f32
    %575 = vector.broadcast %cst_266 : f32 to vector<8x1xf32>
    %576 = arith.divf %574, %575 : vector<8x1xf32>
    %577 = vector.broadcast %576 : vector<8x1xf32> to vector<8x32xf32>
    %578 = arith.subf %572, %577 : vector<8x32xf32>
    %579 = arith.mulf %578, %578 : vector<8x32xf32>
    %cst_267 = arith.constant dense<0.000000e+00> : vector<8xf32>
    %580 = vector.multi_reduction <add>, %579, %cst_267 [1] : vector<8x32xf32> to vector<8xf32>
    %581 = vector.shape_cast %580 : vector<8xf32> to vector<8x1xf32>
    %cst_268 = arith.constant 3.200000e+01 : f32
    %582 = vector.broadcast %cst_268 : f32 to vector<8x1xf32>
    %583 = arith.divf %581, %582 : vector<8x1xf32>
    %584 = vector.broadcast %576 : vector<8x1xf32> to vector<8x32xf32>
    %585 = arith.subf %572, %584 : vector<8x32xf32>
    %cst_269 = arith.constant 9.99999974E-6 : f32
    %586 = vector.broadcast %cst_269 : f32 to vector<8x1xf32>
    %587 = arith.addf %583, %586 : vector<8x1xf32>
    %588 = math.rsqrt %587 : vector<8x1xf32>
    %589 = vector.broadcast %588 : vector<8x1xf32> to vector<8x32xf32>
    %590 = arith.mulf %585, %589 : vector<8x32xf32>
    %591 = vector.broadcast %13 : vector<1x32xf32> to vector<8x32xf32>
    %592 = arith.mulf %590, %591 : vector<8x32xf32>
    %593 = vector.broadcast %12 : vector<1x32xf32> to vector<8x32xf32>
    %594 = arith.addf %592, %593 : vector<8x32xf32>
    %cst_270 = arith.constant dense<0.000000e+00> : vector<8x64xf32>
    %595 = tpu.matmul %594, %7, %cst_270 {dimension_numbers = #tpu.dot_dimension_numbers<[1], [0], [0], [1], [0, 0, 1, 1], [], []>} : vector<8x32xf32>, vector<32x64xf32>, vector<8x64xf32> -> vector<8x64xf32>
    %596 = vector.broadcast %6 : vector<1x64xf32> to vector<8x64xf32>
    %597 = arith.addf %595, %596 : vector<8x64xf32>
    %cst_271 = arith.constant 0.000000e+00 : f32
    %598 = vector.broadcast %cst_271 : f32 to vector<8x64xf32>
    %599 = arith.maximumf %597, %598 : vector<8x64xf32>
    %cst_272 = arith.constant dense<0.000000e+00> : vector<8x32xf32>
    %600 = tpu.matmul %599, %9, %cst_272 {dimension_numbers = #tpu.dot_dimension_numbers<[1], [0], [0], [1], [0, 0, 1, 1], [], []>} : vector<8x64xf32>, vector<64x32xf32>, vector<8x32xf32> -> vector<8x32xf32>
    %601 = vector.broadcast %8 : vector<1x32xf32> to vector<8x32xf32>
    %602 = arith.addf %600, %601 : vector<8x32xf32>
    %603 = arith.addf %594, %602 : vector<8x32xf32>
    %cst_273 = arith.constant dense<0.000000e+00> : vector<8xf32>
    %604 = vector.multi_reduction <add>, %603, %cst_273 [1] : vector<8x32xf32> to vector<8xf32>
    %605 = vector.shape_cast %604 : vector<8xf32> to vector<8x1xf32>
    %cst_274 = arith.constant 3.200000e+01 : f32
    %606 = vector.broadcast %cst_274 : f32 to vector<8x1xf32>
    %607 = arith.divf %605, %606 : vector<8x1xf32>
    %608 = vector.broadcast %607 : vector<8x1xf32> to vector<8x32xf32>
    %609 = arith.subf %603, %608 : vector<8x32xf32>
    %610 = arith.mulf %609, %609 : vector<8x32xf32>
    %cst_275 = arith.constant dense<0.000000e+00> : vector<8xf32>
    %611 = vector.multi_reduction <add>, %610, %cst_275 [1] : vector<8x32xf32> to vector<8xf32>
    %612 = vector.shape_cast %611 : vector<8xf32> to vector<8x1xf32>
    %cst_276 = arith.constant 3.200000e+01 : f32
    %613 = vector.broadcast %cst_276 : f32 to vector<8x1xf32>
    %614 = arith.divf %612, %613 : vector<8x1xf32>
    %615 = vector.broadcast %607 : vector<8x1xf32> to vector<8x32xf32>
    %616 = arith.subf %603, %615 : vector<8x32xf32>
    %cst_277 = arith.constant 9.99999974E-6 : f32
    %617 = vector.broadcast %cst_277 : f32 to vector<8x1xf32>
    %618 = arith.addf %614, %617 : vector<8x1xf32>
    %619 = math.rsqrt %618 : vector<8x1xf32>
    %620 = vector.broadcast %619 : vector<8x1xf32> to vector<8x32xf32>
    %621 = arith.mulf %616, %620 : vector<8x32xf32>
    %622 = vector.broadcast %15 : vector<1x32xf32> to vector<8x32xf32>
    %623 = arith.mulf %621, %622 : vector<8x32xf32>
    %624 = vector.broadcast %14 : vector<1x32xf32> to vector<8x32xf32>
    %625 = arith.addf %623, %624 : vector<8x32xf32>
    %cst_278 = arith.constant dense<0.000000e+00> : vector<8x96xf32>
    %626 = tpu.matmul %625, %36, %cst_278 {dimension_numbers = #tpu.dot_dimension_numbers<[1], [0], [0], [1], [0, 0, 1, 1], [], []>} : vector<8x32xf32>, vector<32x96xf32>, vector<8x96xf32> -> vector<8x96xf32>
    %627 = vector.broadcast %34 : vector<1x96xf32> to vector<8x96xf32>
    %628 = arith.addf %626, %627 : vector<8x96xf32>
    %629 = vector.extract_strided_slice %628 {offsets = [0, 0], sizes = [8, 32], strides = [1, 1]} : vector<8x96xf32> to vector<8x32xf32>
    %630 = vector.extract_strided_slice %628 {offsets = [0, 32], sizes = [8, 32], strides = [1, 1]} : vector<8x96xf32> to vector<8x32xf32>
    %631 = vector.extract_strided_slice %628 {offsets = [0, 64], sizes = [8, 32], strides = [1, 1]} : vector<8x96xf32> to vector<8x32xf32>
    %632 = vector.extract_strided_slice %629 {offsets = [0, 0], sizes = [8, 8], strides = [1, 1]} : vector<8x32xf32> to vector<8x8xf32>
    %633 = vector.extract_strided_slice %630 {offsets = [0, 0], sizes = [8, 8], strides = [1, 1]} : vector<8x32xf32> to vector<8x8xf32>
    %634 = vector.extract_strided_slice %631 {offsets = [0, 0], sizes = [8, 8], strides = [1, 1]} : vector<8x32xf32> to vector<8x8xf32>
    %cst_279 = arith.constant dense<0.000000e+00> : vector<8x8xf32>
    %635 = tpu.matmul %632, %633, %cst_279 {dimension_numbers = #tpu.dot_dimension_numbers<[1], [1], [0], [0], [0, 0, 1, 0], [], []>} : vector<8x8xf32>, vector<8x8xf32>, vector<8x8xf32> -> vector<8x8xf32>
    %cst_280 = arith.constant 0.353553385 : f32
    %636 = vector.broadcast %cst_280 : f32 to vector<8x8xf32>
    %637 = arith.mulf %635, %636 : vector<8x8xf32>
    %cst_281 = arith.constant dense<0xFF800000> : vector<8xf32>
    %638 = vector.multi_reduction <maximumf>, %637, %cst_281 [1] : vector<8x8xf32> to vector<8xf32>
    %639 = vector.shape_cast %638 : vector<8xf32> to vector<8x1xf32>
    %640 = vector.broadcast %639 : vector<8x1xf32> to vector<8x8xf32>
    %641 = arith.subf %637, %640 : vector<8x8xf32>
    %642 = math.exp %641 : vector<8x8xf32>
    %cst_282 = arith.constant dense<0.000000e+00> : vector<8xf32>
    %643 = vector.multi_reduction <add>, %642, %cst_282 [1] : vector<8x8xf32> to vector<8xf32>
    %644 = vector.shape_cast %643 : vector<8xf32> to vector<8x1xf32>
    %645 = tpu.reciprocal %644 {approx = true} : vector<8x1xf32> -> vector<8x1xf32>
    %646 = vector.broadcast %645 : vector<8x1xf32> to vector<8x8xf32>
    %647 = arith.mulf %642, %646 : vector<8x8xf32>
    %cst_283 = arith.constant dense<0.000000e+00> : vector<8x8xf32>
    %648 = tpu.matmul %647, %634, %cst_283 {dimension_numbers = #tpu.dot_dimension_numbers<[1], [0], [0], [1], [0, 0, 1, 1], [], []>} : vector<8x8xf32>, vector<8x8xf32>, vector<8x8xf32> -> vector<8x8xf32>
    %649 = vector.extract_strided_slice %37 {offsets = [0, 0], sizes = [8, 32], strides = [1, 1]} : vector<32x32xf32> to vector<8x32xf32>
    %cst_284 = arith.constant dense<0.000000e+00> : vector<8x32xf32>
    %650 = tpu.matmul %648, %649, %cst_284 {dimension_numbers = #tpu.dot_dimension_numbers<[1], [0], [0], [1], [0, 0, 1, 1], [], []>} : vector<8x8xf32>, vector<8x32xf32>, vector<8x32xf32> -> vector<8x32xf32>
    %651 = vector.extract_strided_slice %629 {offsets = [0, 8], sizes = [8, 8], strides = [1, 1]} : vector<8x32xf32> to vector<8x8xf32>
    %652 = vector.extract_strided_slice %630 {offsets = [0, 8], sizes = [8, 8], strides = [1, 1]} : vector<8x32xf32> to vector<8x8xf32>
    %653 = vector.extract_strided_slice %631 {offsets = [0, 8], sizes = [8, 8], strides = [1, 1]} : vector<8x32xf32> to vector<8x8xf32>
    %cst_285 = arith.constant dense<0.000000e+00> : vector<8x8xf32>
    %654 = tpu.matmul %651, %652, %cst_285 {dimension_numbers = #tpu.dot_dimension_numbers<[1], [1], [0], [0], [0, 0, 1, 0], [], []>} : vector<8x8xf32>, vector<8x8xf32>, vector<8x8xf32> -> vector<8x8xf32>
    %cst_286 = arith.constant 0.353553385 : f32
    %655 = vector.broadcast %cst_286 : f32 to vector<8x8xf32>
    %656 = arith.mulf %654, %655 : vector<8x8xf32>
    %cst_287 = arith.constant dense<0xFF800000> : vector<8xf32>
    %657 = vector.multi_reduction <maximumf>, %656, %cst_287 [1] : vector<8x8xf32> to vector<8xf32>
    %658 = vector.shape_cast %657 : vector<8xf32> to vector<8x1xf32>
    %659 = vector.broadcast %658 : vector<8x1xf32> to vector<8x8xf32>
    %660 = arith.subf %656, %659 : vector<8x8xf32>
    %661 = math.exp %660 : vector<8x8xf32>
    %cst_288 = arith.constant dense<0.000000e+00> : vector<8xf32>
    %662 = vector.multi_reduction <add>, %661, %cst_288 [1] : vector<8x8xf32> to vector<8xf32>
    %663 = vector.shape_cast %662 : vector<8xf32> to vector<8x1xf32>
    %664 = tpu.reciprocal %663 {approx = true} : vector<8x1xf32> -> vector<8x1xf32>
    %665 = vector.broadcast %664 : vector<8x1xf32> to vector<8x8xf32>
    %666 = arith.mulf %661, %665 : vector<8x8xf32>
    %cst_289 = arith.constant dense<0.000000e+00> : vector<8x8xf32>
    %667 = tpu.matmul %666, %653, %cst_289 {dimension_numbers = #tpu.dot_dimension_numbers<[1], [0], [0], [1], [0, 0, 1, 1], [], []>} : vector<8x8xf32>, vector<8x8xf32>, vector<8x8xf32> -> vector<8x8xf32>
    %668 = vector.extract_strided_slice %37 {offsets = [8, 0], sizes = [8, 32], strides = [1, 1]} : vector<32x32xf32> to vector<8x32xf32>
    %cst_290 = arith.constant dense<0.000000e+00> : vector<8x32xf32>
    %669 = tpu.matmul %667, %668, %cst_290 {dimension_numbers = #tpu.dot_dimension_numbers<[1], [0], [0], [1], [0, 0, 1, 1], [], []>} : vector<8x8xf32>, vector<8x32xf32>, vector<8x32xf32> -> vector<8x32xf32>
    %670 = arith.addf %650, %669 : vector<8x32xf32>
    %671 = vector.extract_strided_slice %629 {offsets = [0, 16], sizes = [8, 8], strides = [1, 1]} : vector<8x32xf32> to vector<8x8xf32>
    %672 = vector.extract_strided_slice %630 {offsets = [0, 16], sizes = [8, 8], strides = [1, 1]} : vector<8x32xf32> to vector<8x8xf32>
    %673 = vector.extract_strided_slice %631 {offsets = [0, 16], sizes = [8, 8], strides = [1, 1]} : vector<8x32xf32> to vector<8x8xf32>
    %cst_291 = arith.constant dense<0.000000e+00> : vector<8x8xf32>
    %674 = tpu.matmul %671, %672, %cst_291 {dimension_numbers = #tpu.dot_dimension_numbers<[1], [1], [0], [0], [0, 0, 1, 0], [], []>} : vector<8x8xf32>, vector<8x8xf32>, vector<8x8xf32> -> vector<8x8xf32>
    %cst_292 = arith.constant 0.353553385 : f32
    %675 = vector.broadcast %cst_292 : f32 to vector<8x8xf32>
    %676 = arith.mulf %674, %675 : vector<8x8xf32>
    %cst_293 = arith.constant dense<0xFF800000> : vector<8xf32>
    %677 = vector.multi_reduction <maximumf>, %676, %cst_293 [1] : vector<8x8xf32> to vector<8xf32>
    %678 = vector.shape_cast %677 : vector<8xf32> to vector<8x1xf32>
    %679 = vector.broadcast %678 : vector<8x1xf32> to vector<8x8xf32>
    %680 = arith.subf %676, %679 : vector<8x8xf32>
    %681 = math.exp %680 : vector<8x8xf32>
    %cst_294 = arith.constant dense<0.000000e+00> : vector<8xf32>
    %682 = vector.multi_reduction <add>, %681, %cst_294 [1] : vector<8x8xf32> to vector<8xf32>
    %683 = vector.shape_cast %682 : vector<8xf32> to vector<8x1xf32>
    %684 = tpu.reciprocal %683 {approx = true} : vector<8x1xf32> -> vector<8x1xf32>
    %685 = vector.broadcast %684 : vector<8x1xf32> to vector<8x8xf32>
    %686 = arith.mulf %681, %685 : vector<8x8xf32>
    %cst_295 = arith.constant dense<0.000000e+00> : vector<8x8xf32>
    %687 = tpu.matmul %686, %673, %cst_295 {dimension_numbers = #tpu.dot_dimension_numbers<[1], [0], [0], [1], [0, 0, 1, 1], [], []>} : vector<8x8xf32>, vector<8x8xf32>, vector<8x8xf32> -> vector<8x8xf32>
    %688 = vector.extract_strided_slice %37 {offsets = [16, 0], sizes = [8, 32], strides = [1, 1]} : vector<32x32xf32> to vector<8x32xf32>
    %cst_296 = arith.constant dense<0.000000e+00> : vector<8x32xf32>
    %689 = tpu.matmul %687, %688, %cst_296 {dimension_numbers = #tpu.dot_dimension_numbers<[1], [0], [0], [1], [0, 0, 1, 1], [], []>} : vector<8x8xf32>, vector<8x32xf32>, vector<8x32xf32> -> vector<8x32xf32>
    %690 = arith.addf %670, %689 : vector<8x32xf32>
    %691 = vector.extract_strided_slice %629 {offsets = [0, 24], sizes = [8, 8], strides = [1, 1]} : vector<8x32xf32> to vector<8x8xf32>
    %692 = vector.extract_strided_slice %630 {offsets = [0, 24], sizes = [8, 8], strides = [1, 1]} : vector<8x32xf32> to vector<8x8xf32>
    %693 = vector.extract_strided_slice %631 {offsets = [0, 24], sizes = [8, 8], strides = [1, 1]} : vector<8x32xf32> to vector<8x8xf32>
    %cst_297 = arith.constant dense<0.000000e+00> : vector<8x8xf32>
    %694 = tpu.matmul %691, %692, %cst_297 {dimension_numbers = #tpu.dot_dimension_numbers<[1], [1], [0], [0], [0, 0, 1, 0], [], []>} : vector<8x8xf32>, vector<8x8xf32>, vector<8x8xf32> -> vector<8x8xf32>
    %cst_298 = arith.constant 0.353553385 : f32
    %695 = vector.broadcast %cst_298 : f32 to vector<8x8xf32>
    %696 = arith.mulf %694, %695 : vector<8x8xf32>
    %cst_299 = arith.constant dense<0xFF800000> : vector<8xf32>
    %697 = vector.multi_reduction <maximumf>, %696, %cst_299 [1] : vector<8x8xf32> to vector<8xf32>
    %698 = vector.shape_cast %697 : vector<8xf32> to vector<8x1xf32>
    %699 = vector.broadcast %698 : vector<8x1xf32> to vector<8x8xf32>
    %700 = arith.subf %696, %699 : vector<8x8xf32>
    %701 = math.exp %700 : vector<8x8xf32>
    %cst_300 = arith.constant dense<0.000000e+00> : vector<8xf32>
    %702 = vector.multi_reduction <add>, %701, %cst_300 [1] : vector<8x8xf32> to vector<8xf32>
    %703 = vector.shape_cast %702 : vector<8xf32> to vector<8x1xf32>
    %704 = tpu.reciprocal %703 {approx = true} : vector<8x1xf32> -> vector<8x1xf32>
    %705 = vector.broadcast %704 : vector<8x1xf32> to vector<8x8xf32>
    %706 = arith.mulf %701, %705 : vector<8x8xf32>
    %cst_301 = arith.constant dense<0.000000e+00> : vector<8x8xf32>
    %707 = tpu.matmul %706, %693, %cst_301 {dimension_numbers = #tpu.dot_dimension_numbers<[1], [0], [0], [1], [0, 0, 1, 1], [], []>} : vector<8x8xf32>, vector<8x8xf32>, vector<8x8xf32> -> vector<8x8xf32>
    %708 = vector.extract_strided_slice %37 {offsets = [24, 0], sizes = [8, 32], strides = [1, 1]} : vector<32x32xf32> to vector<8x32xf32>
    %cst_302 = arith.constant dense<0.000000e+00> : vector<8x32xf32>
    %709 = tpu.matmul %707, %708, %cst_302 {dimension_numbers = #tpu.dot_dimension_numbers<[1], [0], [0], [1], [0, 0, 1, 1], [], []>} : vector<8x8xf32>, vector<8x32xf32>, vector<8x32xf32> -> vector<8x32xf32>
    %710 = arith.addf %690, %709 : vector<8x32xf32>
    %711 = vector.broadcast %35 : vector<1x32xf32> to vector<8x32xf32>
    %712 = arith.addf %710, %711 : vector<8x32xf32>
    %713 = arith.addf %625, %712 : vector<8x32xf32>
    %cst_303 = arith.constant dense<0.000000e+00> : vector<8xf32>
    %714 = vector.multi_reduction <add>, %713, %cst_303 [1] : vector<8x32xf32> to vector<8xf32>
    %715 = vector.shape_cast %714 : vector<8xf32> to vector<8x1xf32>
    %cst_304 = arith.constant 3.200000e+01 : f32
    %716 = vector.broadcast %cst_304 : f32 to vector<8x1xf32>
    %717 = arith.divf %715, %716 : vector<8x1xf32>
    %718 = vector.broadcast %717 : vector<8x1xf32> to vector<8x32xf32>
    %719 = arith.subf %713, %718 : vector<8x32xf32>
    %720 = arith.mulf %719, %719 : vector<8x32xf32>
    %cst_305 = arith.constant dense<0.000000e+00> : vector<8xf32>
    %721 = vector.multi_reduction <add>, %720, %cst_305 [1] : vector<8x32xf32> to vector<8xf32>
    %722 = vector.shape_cast %721 : vector<8xf32> to vector<8x1xf32>
    %cst_306 = arith.constant 3.200000e+01 : f32
    %723 = vector.broadcast %cst_306 : f32 to vector<8x1xf32>
    %724 = arith.divf %722, %723 : vector<8x1xf32>
    %725 = vector.broadcast %717 : vector<8x1xf32> to vector<8x32xf32>
    %726 = arith.subf %713, %725 : vector<8x32xf32>
    %cst_307 = arith.constant 9.99999974E-6 : f32
    %727 = vector.broadcast %cst_307 : f32 to vector<8x1xf32>
    %728 = arith.addf %724, %727 : vector<8x1xf32>
    %729 = math.rsqrt %728 : vector<8x1xf32>
    %730 = vector.broadcast %729 : vector<8x1xf32> to vector<8x32xf32>
    %731 = arith.mulf %726, %730 : vector<8x32xf32>
    %732 = vector.broadcast %29 : vector<1x32xf32> to vector<8x32xf32>
    %733 = arith.mulf %731, %732 : vector<8x32xf32>
    %734 = vector.broadcast %28 : vector<1x32xf32> to vector<8x32xf32>
    %735 = arith.addf %733, %734 : vector<8x32xf32>
    %736 = vector.extract_strided_slice %22 {offsets = [0, 0], sizes = [32, 32], strides = [1, 1]} : vector<32x96xf32> to vector<32x32xf32>
    %cst_308 = arith.constant dense<0.000000e+00> : vector<8x32xf32>
    %737 = tpu.matmul %735, %736, %cst_308 {dimension_numbers = #tpu.dot_dimension_numbers<[1], [0], [0], [1], [0, 0, 1, 1], [], []>} : vector<8x32xf32>, vector<32x32xf32>, vector<8x32xf32> -> vector<8x32xf32>
    %738 = vector.extract_strided_slice %20 {offsets = [0, 0], sizes = [1, 32], strides = [1, 1]} : vector<1x96xf32> to vector<1x32xf32>
    %739 = vector.broadcast %738 : vector<1x32xf32> to vector<8x32xf32>
    %740 = arith.addf %737, %739 : vector<8x32xf32>
    %741 = vector.extract_strided_slice %22 {offsets = [0, 32], sizes = [32, 64], strides = [1, 1]} : vector<32x96xf32> to vector<32x64xf32>
    %cst_309 = arith.constant dense<0.000000e+00> : vector<8x64xf32>
    %742 = tpu.matmul %368, %741, %cst_309 {dimension_numbers = #tpu.dot_dimension_numbers<[1], [0], [0], [1], [0, 0, 1, 1], [], []>} : vector<8x32xf32>, vector<32x64xf32>, vector<8x64xf32> -> vector<8x64xf32>
    %743 = vector.extract_strided_slice %20 {offsets = [0, 32], sizes = [1, 64], strides = [1, 1]} : vector<1x96xf32> to vector<1x64xf32>
    %744 = vector.broadcast %743 : vector<1x64xf32> to vector<8x64xf32>
    %745 = arith.addf %742, %744 : vector<8x64xf32>
    %746 = vector.extract_strided_slice %745 {offsets = [0, 0], sizes = [8, 32], strides = [1, 1]} : vector<8x64xf32> to vector<8x32xf32>
    %747 = vector.extract_strided_slice %745 {offsets = [0, 32], sizes = [8, 32], strides = [1, 1]} : vector<8x64xf32> to vector<8x32xf32>
    %748 = vector.extract_strided_slice %740 {offsets = [0, 0], sizes = [8, 8], strides = [1, 1]} : vector<8x32xf32> to vector<8x8xf32>
    %749 = vector.extract_strided_slice %746 {offsets = [0, 0], sizes = [8, 8], strides = [1, 1]} : vector<8x32xf32> to vector<8x8xf32>
    %750 = vector.extract_strided_slice %747 {offsets = [0, 0], sizes = [8, 8], strides = [1, 1]} : vector<8x32xf32> to vector<8x8xf32>
    %cst_310 = arith.constant dense<0.000000e+00> : vector<8x8xf32>
    %751 = tpu.matmul %748, %749, %cst_310 {dimension_numbers = #tpu.dot_dimension_numbers<[1], [1], [0], [0], [0, 0, 1, 0], [], []>} : vector<8x8xf32>, vector<8x8xf32>, vector<8x8xf32> -> vector<8x8xf32>
    %cst_311 = arith.constant 0.353553385 : f32
    %752 = vector.broadcast %cst_311 : f32 to vector<8x8xf32>
    %753 = arith.mulf %751, %752 : vector<8x8xf32>
    %cst_312 = arith.constant dense<0xFF800000> : vector<8xf32>
    %754 = vector.multi_reduction <maximumf>, %753, %cst_312 [1] : vector<8x8xf32> to vector<8xf32>
    %755 = vector.shape_cast %754 : vector<8xf32> to vector<8x1xf32>
    %756 = vector.broadcast %755 : vector<8x1xf32> to vector<8x8xf32>
    %757 = arith.subf %753, %756 : vector<8x8xf32>
    %758 = math.exp %757 : vector<8x8xf32>
    %cst_313 = arith.constant dense<0.000000e+00> : vector<8xf32>
    %759 = vector.multi_reduction <add>, %758, %cst_313 [1] : vector<8x8xf32> to vector<8xf32>
    %760 = vector.shape_cast %759 : vector<8xf32> to vector<8x1xf32>
    %761 = tpu.reciprocal %760 {approx = true} : vector<8x1xf32> -> vector<8x1xf32>
    %762 = vector.broadcast %761 : vector<8x1xf32> to vector<8x8xf32>
    %763 = arith.mulf %758, %762 : vector<8x8xf32>
    %cst_314 = arith.constant dense<0.000000e+00> : vector<8x8xf32>
    %764 = tpu.matmul %763, %750, %cst_314 {dimension_numbers = #tpu.dot_dimension_numbers<[1], [0], [0], [1], [0, 0, 1, 1], [], []>} : vector<8x8xf32>, vector<8x8xf32>, vector<8x8xf32> -> vector<8x8xf32>
    %765 = vector.extract_strided_slice %23 {offsets = [0, 0], sizes = [8, 32], strides = [1, 1]} : vector<32x32xf32> to vector<8x32xf32>
    %cst_315 = arith.constant dense<0.000000e+00> : vector<8x32xf32>
    %766 = tpu.matmul %764, %765, %cst_315 {dimension_numbers = #tpu.dot_dimension_numbers<[1], [0], [0], [1], [0, 0, 1, 1], [], []>} : vector<8x8xf32>, vector<8x32xf32>, vector<8x32xf32> -> vector<8x32xf32>
    %767 = vector.extract_strided_slice %740 {offsets = [0, 8], sizes = [8, 8], strides = [1, 1]} : vector<8x32xf32> to vector<8x8xf32>
    %768 = vector.extract_strided_slice %746 {offsets = [0, 8], sizes = [8, 8], strides = [1, 1]} : vector<8x32xf32> to vector<8x8xf32>
    %769 = vector.extract_strided_slice %747 {offsets = [0, 8], sizes = [8, 8], strides = [1, 1]} : vector<8x32xf32> to vector<8x8xf32>
    %cst_316 = arith.constant dense<0.000000e+00> : vector<8x8xf32>
    %770 = tpu.matmul %767, %768, %cst_316 {dimension_numbers = #tpu.dot_dimension_numbers<[1], [1], [0], [0], [0, 0, 1, 0], [], []>} : vector<8x8xf32>, vector<8x8xf32>, vector<8x8xf32> -> vector<8x8xf32>
    %cst_317 = arith.constant 0.353553385 : f32
    %771 = vector.broadcast %cst_317 : f32 to vector<8x8xf32>
    %772 = arith.mulf %770, %771 : vector<8x8xf32>
    %cst_318 = arith.constant dense<0xFF800000> : vector<8xf32>
    %773 = vector.multi_reduction <maximumf>, %772, %cst_318 [1] : vector<8x8xf32> to vector<8xf32>
    %774 = vector.shape_cast %773 : vector<8xf32> to vector<8x1xf32>
    %775 = vector.broadcast %774 : vector<8x1xf32> to vector<8x8xf32>
    %776 = arith.subf %772, %775 : vector<8x8xf32>
    %777 = math.exp %776 : vector<8x8xf32>
    %cst_319 = arith.constant dense<0.000000e+00> : vector<8xf32>
    %778 = vector.multi_reduction <add>, %777, %cst_319 [1] : vector<8x8xf32> to vector<8xf32>
    %779 = vector.shape_cast %778 : vector<8xf32> to vector<8x1xf32>
    %780 = tpu.reciprocal %779 {approx = true} : vector<8x1xf32> -> vector<8x1xf32>
    %781 = vector.broadcast %780 : vector<8x1xf32> to vector<8x8xf32>
    %782 = arith.mulf %777, %781 : vector<8x8xf32>
    %cst_320 = arith.constant dense<0.000000e+00> : vector<8x8xf32>
    %783 = tpu.matmul %782, %769, %cst_320 {dimension_numbers = #tpu.dot_dimension_numbers<[1], [0], [0], [1], [0, 0, 1, 1], [], []>} : vector<8x8xf32>, vector<8x8xf32>, vector<8x8xf32> -> vector<8x8xf32>
    %784 = vector.extract_strided_slice %23 {offsets = [8, 0], sizes = [8, 32], strides = [1, 1]} : vector<32x32xf32> to vector<8x32xf32>
    %cst_321 = arith.constant dense<0.000000e+00> : vector<8x32xf32>
    %785 = tpu.matmul %783, %784, %cst_321 {dimension_numbers = #tpu.dot_dimension_numbers<[1], [0], [0], [1], [0, 0, 1, 1], [], []>} : vector<8x8xf32>, vector<8x32xf32>, vector<8x32xf32> -> vector<8x32xf32>
    %786 = arith.addf %766, %785 : vector<8x32xf32>
    %787 = vector.extract_strided_slice %740 {offsets = [0, 16], sizes = [8, 8], strides = [1, 1]} : vector<8x32xf32> to vector<8x8xf32>
    %788 = vector.extract_strided_slice %746 {offsets = [0, 16], sizes = [8, 8], strides = [1, 1]} : vector<8x32xf32> to vector<8x8xf32>
    %789 = vector.extract_strided_slice %747 {offsets = [0, 16], sizes = [8, 8], strides = [1, 1]} : vector<8x32xf32> to vector<8x8xf32>
    %cst_322 = arith.constant dense<0.000000e+00> : vector<8x8xf32>
    %790 = tpu.matmul %787, %788, %cst_322 {dimension_numbers = #tpu.dot_dimension_numbers<[1], [1], [0], [0], [0, 0, 1, 0], [], []>} : vector<8x8xf32>, vector<8x8xf32>, vector<8x8xf32> -> vector<8x8xf32>
    %cst_323 = arith.constant 0.353553385 : f32
    %791 = vector.broadcast %cst_323 : f32 to vector<8x8xf32>
    %792 = arith.mulf %790, %791 : vector<8x8xf32>
    %cst_324 = arith.constant dense<0xFF800000> : vector<8xf32>
    %793 = vector.multi_reduction <maximumf>, %792, %cst_324 [1] : vector<8x8xf32> to vector<8xf32>
    %794 = vector.shape_cast %793 : vector<8xf32> to vector<8x1xf32>
    %795 = vector.broadcast %794 : vector<8x1xf32> to vector<8x8xf32>
    %796 = arith.subf %792, %795 : vector<8x8xf32>
    %797 = math.exp %796 : vector<8x8xf32>
    %cst_325 = arith.constant dense<0.000000e+00> : vector<8xf32>
    %798 = vector.multi_reduction <add>, %797, %cst_325 [1] : vector<8x8xf32> to vector<8xf32>
    %799 = vector.shape_cast %798 : vector<8xf32> to vector<8x1xf32>
    %800 = tpu.reciprocal %799 {approx = true} : vector<8x1xf32> -> vector<8x1xf32>
    %801 = vector.broadcast %800 : vector<8x1xf32> to vector<8x8xf32>
    %802 = arith.mulf %797, %801 : vector<8x8xf32>
    %cst_326 = arith.constant dense<0.000000e+00> : vector<8x8xf32>
    %803 = tpu.matmul %802, %789, %cst_326 {dimension_numbers = #tpu.dot_dimension_numbers<[1], [0], [0], [1], [0, 0, 1, 1], [], []>} : vector<8x8xf32>, vector<8x8xf32>, vector<8x8xf32> -> vector<8x8xf32>
    %804 = vector.extract_strided_slice %23 {offsets = [16, 0], sizes = [8, 32], strides = [1, 1]} : vector<32x32xf32> to vector<8x32xf32>
    %cst_327 = arith.constant dense<0.000000e+00> : vector<8x32xf32>
    %805 = tpu.matmul %803, %804, %cst_327 {dimension_numbers = #tpu.dot_dimension_numbers<[1], [0], [0], [1], [0, 0, 1, 1], [], []>} : vector<8x8xf32>, vector<8x32xf32>, vector<8x32xf32> -> vector<8x32xf32>
    %806 = arith.addf %786, %805 : vector<8x32xf32>
    %807 = vector.extract_strided_slice %740 {offsets = [0, 24], sizes = [8, 8], strides = [1, 1]} : vector<8x32xf32> to vector<8x8xf32>
    %808 = vector.extract_strided_slice %746 {offsets = [0, 24], sizes = [8, 8], strides = [1, 1]} : vector<8x32xf32> to vector<8x8xf32>
    %809 = vector.extract_strided_slice %747 {offsets = [0, 24], sizes = [8, 8], strides = [1, 1]} : vector<8x32xf32> to vector<8x8xf32>
    %cst_328 = arith.constant dense<0.000000e+00> : vector<8x8xf32>
    %810 = tpu.matmul %807, %808, %cst_328 {dimension_numbers = #tpu.dot_dimension_numbers<[1], [1], [0], [0], [0, 0, 1, 0], [], []>} : vector<8x8xf32>, vector<8x8xf32>, vector<8x8xf32> -> vector<8x8xf32>
    %cst_329 = arith.constant 0.353553385 : f32
    %811 = vector.broadcast %cst_329 : f32 to vector<8x8xf32>
    %812 = arith.mulf %810, %811 : vector<8x8xf32>
    %cst_330 = arith.constant dense<0xFF800000> : vector<8xf32>
    %813 = vector.multi_reduction <maximumf>, %812, %cst_330 [1] : vector<8x8xf32> to vector<8xf32>
    %814 = vector.shape_cast %813 : vector<8xf32> to vector<8x1xf32>
    %815 = vector.broadcast %814 : vector<8x1xf32> to vector<8x8xf32>
    %816 = arith.subf %812, %815 : vector<8x8xf32>
    %817 = math.exp %816 : vector<8x8xf32>
    %cst_331 = arith.constant dense<0.000000e+00> : vector<8xf32>
    %818 = vector.multi_reduction <add>, %817, %cst_331 [1] : vector<8x8xf32> to vector<8xf32>
    %819 = vector.shape_cast %818 : vector<8xf32> to vector<8x1xf32>
    %820 = tpu.reciprocal %819 {approx = true} : vector<8x1xf32> -> vector<8x1xf32>
    %821 = vector.broadcast %820 : vector<8x1xf32> to vector<8x8xf32>
    %822 = arith.mulf %817, %821 : vector<8x8xf32>
    %cst_332 = arith.constant dense<0.000000e+00> : vector<8x8xf32>
    %823 = tpu.matmul %822, %809, %cst_332 {dimension_numbers = #tpu.dot_dimension_numbers<[1], [0], [0], [1], [0, 0, 1, 1], [], []>} : vector<8x8xf32>, vector<8x8xf32>, vector<8x8xf32> -> vector<8x8xf32>
    %824 = vector.extract_strided_slice %23 {offsets = [24, 0], sizes = [8, 32], strides = [1, 1]} : vector<32x32xf32> to vector<8x32xf32>
    %cst_333 = arith.constant dense<0.000000e+00> : vector<8x32xf32>
    %825 = tpu.matmul %823, %824, %cst_333 {dimension_numbers = #tpu.dot_dimension_numbers<[1], [0], [0], [1], [0, 0, 1, 1], [], []>} : vector<8x8xf32>, vector<8x32xf32>, vector<8x32xf32> -> vector<8x32xf32>
    %826 = arith.addf %806, %825 : vector<8x32xf32>
    %827 = vector.broadcast %21 : vector<1x32xf32> to vector<8x32xf32>
    %828 = arith.addf %826, %827 : vector<8x32xf32>
    %829 = arith.addf %735, %828 : vector<8x32xf32>
    %cst_334 = arith.constant dense<0.000000e+00> : vector<8xf32>
    %830 = vector.multi_reduction <add>, %829, %cst_334 [1] : vector<8x32xf32> to vector<8xf32>
    %831 = vector.shape_cast %830 : vector<8xf32> to vector<8x1xf32>
    %cst_335 = arith.constant 3.200000e+01 : f32
    %832 = vector.broadcast %cst_335 : f32 to vector<8x1xf32>
    %833 = arith.divf %831, %832 : vector<8x1xf32>
    %834 = vector.broadcast %833 : vector<8x1xf32> to vector<8x32xf32>
    %835 = arith.subf %829, %834 : vector<8x32xf32>
    %836 = arith.mulf %835, %835 : vector<8x32xf32>
    %cst_336 = arith.constant dense<0.000000e+00> : vector<8xf32>
    %837 = vector.multi_reduction <add>, %836, %cst_336 [1] : vector<8x32xf32> to vector<8xf32>
    %838 = vector.shape_cast %837 : vector<8xf32> to vector<8x1xf32>
    %cst_337 = arith.constant 3.200000e+01 : f32
    %839 = vector.broadcast %cst_337 : f32 to vector<8x1xf32>
    %840 = arith.divf %838, %839 : vector<8x1xf32>
    %841 = vector.broadcast %833 : vector<8x1xf32> to vector<8x32xf32>
    %842 = arith.subf %829, %841 : vector<8x32xf32>
    %cst_338 = arith.constant 9.99999974E-6 : f32
    %843 = vector.broadcast %cst_338 : f32 to vector<8x1xf32>
    %844 = arith.addf %840, %843 : vector<8x1xf32>
    %845 = math.rsqrt %844 : vector<8x1xf32>
    %846 = vector.broadcast %845 : vector<8x1xf32> to vector<8x32xf32>
    %847 = arith.mulf %842, %846 : vector<8x32xf32>
    %848 = vector.broadcast %31 : vector<1x32xf32> to vector<8x32xf32>
    %849 = arith.mulf %847, %848 : vector<8x32xf32>
    %850 = vector.broadcast %30 : vector<1x32xf32> to vector<8x32xf32>
    %851 = arith.addf %849, %850 : vector<8x32xf32>
    %cst_339 = arith.constant dense<0.000000e+00> : vector<8x64xf32>
    %852 = tpu.matmul %851, %25, %cst_339 {dimension_numbers = #tpu.dot_dimension_numbers<[1], [0], [0], [1], [0, 0, 1, 1], [], []>} : vector<8x32xf32>, vector<32x64xf32>, vector<8x64xf32> -> vector<8x64xf32>
    %853 = vector.broadcast %24 : vector<1x64xf32> to vector<8x64xf32>
    %854 = arith.addf %852, %853 : vector<8x64xf32>
    %cst_340 = arith.constant 0.000000e+00 : f32
    %855 = vector.broadcast %cst_340 : f32 to vector<8x64xf32>
    %856 = arith.maximumf %854, %855 : vector<8x64xf32>
    %cst_341 = arith.constant dense<0.000000e+00> : vector<8x32xf32>
    %857 = tpu.matmul %856, %27, %cst_341 {dimension_numbers = #tpu.dot_dimension_numbers<[1], [0], [0], [1], [0, 0, 1, 1], [], []>} : vector<8x64xf32>, vector<64x32xf32>, vector<8x32xf32> -> vector<8x32xf32>
    %858 = vector.broadcast %26 : vector<1x32xf32> to vector<8x32xf32>
    %859 = arith.addf %857, %858 : vector<8x32xf32>
    %860 = arith.addf %851, %859 : vector<8x32xf32>
    %cst_342 = arith.constant dense<0.000000e+00> : vector<8xf32>
    %861 = vector.multi_reduction <add>, %860, %cst_342 [1] : vector<8x32xf32> to vector<8xf32>
    %862 = vector.shape_cast %861 : vector<8xf32> to vector<8x1xf32>
    %cst_343 = arith.constant 3.200000e+01 : f32
    %863 = vector.broadcast %cst_343 : f32 to vector<8x1xf32>
    %864 = arith.divf %862, %863 : vector<8x1xf32>
    %865 = vector.broadcast %864 : vector<8x1xf32> to vector<8x32xf32>
    %866 = arith.subf %860, %865 : vector<8x32xf32>
    %867 = arith.mulf %866, %866 : vector<8x32xf32>
    %cst_344 = arith.constant dense<0.000000e+00> : vector<8xf32>
    %868 = vector.multi_reduction <add>, %867, %cst_344 [1] : vector<8x32xf32> to vector<8xf32>
    %869 = vector.shape_cast %868 : vector<8xf32> to vector<8x1xf32>
    %cst_345 = arith.constant 3.200000e+01 : f32
    %870 = vector.broadcast %cst_345 : f32 to vector<8x1xf32>
    %871 = arith.divf %869, %870 : vector<8x1xf32>
    %872 = vector.broadcast %864 : vector<8x1xf32> to vector<8x32xf32>
    %873 = arith.subf %860, %872 : vector<8x32xf32>
    %cst_346 = arith.constant 9.99999974E-6 : f32
    %874 = vector.broadcast %cst_346 : f32 to vector<8x1xf32>
    %875 = arith.addf %871, %874 : vector<8x1xf32>
    %876 = math.rsqrt %875 : vector<8x1xf32>
    %877 = vector.broadcast %876 : vector<8x1xf32> to vector<8x32xf32>
    %878 = arith.mulf %873, %877 : vector<8x32xf32>
    %879 = vector.broadcast %33 : vector<1x32xf32> to vector<8x32xf32>
    %880 = arith.mulf %878, %879 : vector<8x32xf32>
    %881 = vector.broadcast %32 : vector<1x32xf32> to vector<8x32xf32>
    %882 = arith.addf %880, %881 : vector<8x32xf32>
    %cst_347 = arith.constant dense<0.000000e+00> : vector<8xf32>
    %883 = vector.multi_reduction <add>, %882, %cst_347 [1] : vector<8x32xf32> to vector<8xf32>
    %884 = vector.shape_cast %883 : vector<8xf32> to vector<8x1xf32>
    %cst_348 = arith.constant 3.200000e+01 : f32
    %885 = vector.broadcast %cst_348 : f32 to vector<8x1xf32>
    %886 = arith.divf %884, %885 : vector<8x1xf32>
    %887 = vector.broadcast %886 : vector<8x1xf32> to vector<8x32xf32>
    %888 = arith.subf %882, %887 : vector<8x32xf32>
    %889 = arith.mulf %888, %888 : vector<8x32xf32>
    %cst_349 = arith.constant dense<0.000000e+00> : vector<8xf32>
    %890 = vector.multi_reduction <add>, %889, %cst_349 [1] : vector<8x32xf32> to vector<8xf32>
    %891 = vector.shape_cast %890 : vector<8xf32> to vector<8x1xf32>
    %cst_350 = arith.constant 3.200000e+01 : f32
    %892 = vector.broadcast %cst_350 : f32 to vector<8x1xf32>
    %893 = arith.divf %891, %892 : vector<8x1xf32>
    %894 = vector.broadcast %886 : vector<8x1xf32> to vector<8x32xf32>
    %895 = arith.subf %882, %894 : vector<8x32xf32>
    %cst_351 = arith.constant 9.99999974E-6 : f32
    %896 = vector.broadcast %cst_351 : f32 to vector<8x1xf32>
    %897 = arith.addf %893, %896 : vector<8x1xf32>
    %898 = math.rsqrt %897 : vector<8x1xf32>
    %899 = vector.broadcast %898 : vector<8x1xf32> to vector<8x32xf32>
    %900 = arith.mulf %895, %899 : vector<8x32xf32>
    %901 = vector.broadcast %1 : vector<1x32xf32> to vector<8x32xf32>
    %902 = arith.mulf %900, %901 : vector<8x32xf32>
    %903 = vector.broadcast %0 : vector<1x32xf32> to vector<8x32xf32>
    %904 = arith.addf %902, %903 : vector<8x32xf32>
    %c0_352 = arith.constant 0 : index
    %c0_353 = arith.constant 0 : index
    %905 = vector.load %arg66[%c0_352, %c0_353] : memref<8x32xf32, #tpu.memory_space<vmem>>, vector<8x32xf32>
    tpu.vector_store %arg66[%c0_352, %c0_353], %904 {strides = array<i32>} : memref<8x32xf32, #tpu.memory_space<vmem>>, vector<8x32xf32>,
    return
  }
  func.func @transform_0(%arg0: i32) -> (i32, i32) {
    %c0_i32 = arith.constant 0 : i32
    %c0_i32_0 = arith.constant 0 : i32
    return %arg0, %c0_i32 : i32, i32
  }
  func.func @transform_1(%arg0: i32) -> (i32, i32) {
    %c0_i32 = arith.constant 0 : i32
    %c0_i32_0 = arith.constant 0 : i32
    %c0_i32_1 = arith.constant 0 : i32
    return %c0_i32, %c0_i32_0 : i32, i32
  }
  func.func @transform_2(%arg0: i32) -> (i32, i32) {
    %c0_i32 = arith.constant 0 : i32
    %c0_i32_0 = arith.constant 0 : i32
    %c0_i32_1 = arith.constant 0 : i32
    return %c0_i32, %c0_i32_0 : i32, i32
  }
  func.func @transform_3(%arg0: i32) -> (i32, i32) {
    %c0_i32 = arith.constant 0 : i32
    %c0_i32_0 = arith.constant 0 : i32
    %c0_i32_1 = arith.constant 0 : i32
    return %c0_i32, %c0_i32_0 : i32, i32
  }
  func.func @transform_4(%arg0: i32) -> (i32, i32) {
    %c0_i32 = arith.constant 0 : i32
    %c0_i32_0 = arith.constant 0 : i32
    %c0_i32_1 = arith.constant 0 : i32
    return %c0_i32, %c0_i32_0 : i32, i32
  }
  func.func @transform_5(%arg0: i32) -> (i32, i32) {
    %c0_i32 = arith.constant 0 : i32
    %c0_i32_0 = arith.constant 0 : i32
    %c0_i32_1 = arith.constant 0 : i32
    return %c0_i32, %c0_i32_0 : i32, i32
  }
  func.func @transform_6(%arg0: i32) -> (i32, i32) {
    %c0_i32 = arith.constant 0 : i32
    %c0_i32_0 = arith.constant 0 : i32
    %c0_i32_1 = arith.constant 0 : i32
    return %c0_i32, %c0_i32_0 : i32, i32
  }
  func.func @transform_7(%arg0: i32) -> (i32, i32) {
    %c0_i32 = arith.constant 0 : i32
    %c0_i32_0 = arith.constant 0 : i32
    %c0_i32_1 = arith.constant 0 : i32
    return %c0_i32, %c0_i32_0 : i32, i32
  }
  func.func @transform_8(%arg0: i32) -> (i32, i32) {
    %c0_i32 = arith.constant 0 : i32
    %c0_i32_0 = arith.constant 0 : i32
    %c0_i32_1 = arith.constant 0 : i32
    return %c0_i32, %c0_i32_0 : i32, i32
  }
  func.func @transform_9(%arg0: i32) -> (i32, i32) {
    %c0_i32 = arith.constant 0 : i32
    %c0_i32_0 = arith.constant 0 : i32
    %c0_i32_1 = arith.constant 0 : i32
    return %c0_i32, %c0_i32_0 : i32, i32
  }
  func.func @transform_10(%arg0: i32) -> (i32, i32) {
    %c0_i32 = arith.constant 0 : i32
    %c0_i32_0 = arith.constant 0 : i32
    %c0_i32_1 = arith.constant 0 : i32
    return %c0_i32, %c0_i32_0 : i32, i32
  }
  func.func @transform_11(%arg0: i32) -> (i32, i32) {
    %c0_i32 = arith.constant 0 : i32
    %c0_i32_0 = arith.constant 0 : i32
    %c0_i32_1 = arith.constant 0 : i32
    return %c0_i32, %c0_i32_0 : i32, i32
  }
  func.func @transform_12(%arg0: i32) -> (i32, i32) {
    %c0_i32 = arith.constant 0 : i32
    %c0_i32_0 = arith.constant 0 : i32
    %c0_i32_1 = arith.constant 0 : i32
    return %c0_i32, %c0_i32_0 : i32, i32
  }
  func.func @transform_13(%arg0: i32) -> (i32, i32) {
    %c0_i32 = arith.constant 0 : i32
    %c0_i32_0 = arith.constant 0 : i32
    %c0_i32_1 = arith.constant 0 : i32
    return %c0_i32, %c0_i32_0 : i32, i32
  }
  func.func @transform_14(%arg0: i32) -> (i32, i32) {
    %c0_i32 = arith.constant 0 : i32
    %c0_i32_0 = arith.constant 0 : i32
    %c0_i32_1 = arith.constant 0 : i32
    return %c0_i32, %c0_i32_0 : i32, i32
  }
  func.func @transform_15(%arg0: i32) -> (i32, i32) {
    %c0_i32 = arith.constant 0 : i32
    %c0_i32_0 = arith.constant 0 : i32
    %c0_i32_1 = arith.constant 0 : i32
    return %c0_i32, %c0_i32_0 : i32, i32
  }
  func.func @transform_16(%arg0: i32) -> (i32, i32) {
    %c0_i32 = arith.constant 0 : i32
    %c0_i32_0 = arith.constant 0 : i32
    %c0_i32_1 = arith.constant 0 : i32
    return %c0_i32, %c0_i32_0 : i32, i32
  }
  func.func @transform_17(%arg0: i32) -> (i32, i32) {
    %c0_i32 = arith.constant 0 : i32
    %c0_i32_0 = arith.constant 0 : i32
    %c0_i32_1 = arith.constant 0 : i32
    return %c0_i32, %c0_i32_0 : i32, i32
  }
  func.func @transform_18(%arg0: i32) -> (i32, i32) {
    %c0_i32 = arith.constant 0 : i32
    %c0_i32_0 = arith.constant 0 : i32
    %c0_i32_1 = arith.constant 0 : i32
    return %c0_i32, %c0_i32_0 : i32, i32
  }
  func.func @transform_19(%arg0: i32) -> (i32, i32) {
    %c0_i32 = arith.constant 0 : i32
    %c0_i32_0 = arith.constant 0 : i32
    %c0_i32_1 = arith.constant 0 : i32
    return %c0_i32, %c0_i32_0 : i32, i32
  }
  func.func @transform_20(%arg0: i32) -> (i32, i32) {
    %c0_i32 = arith.constant 0 : i32
    %c0_i32_0 = arith.constant 0 : i32
    %c0_i32_1 = arith.constant 0 : i32
    return %c0_i32, %c0_i32_0 : i32, i32
  }
  func.func @transform_21(%arg0: i32) -> (i32, i32) {
    %c0_i32 = arith.constant 0 : i32
    %c0_i32_0 = arith.constant 0 : i32
    %c0_i32_1 = arith.constant 0 : i32
    return %c0_i32, %c0_i32_0 : i32, i32
  }
  func.func @transform_22(%arg0: i32) -> (i32, i32) {
    %c0_i32 = arith.constant 0 : i32
    %c0_i32_0 = arith.constant 0 : i32
    %c0_i32_1 = arith.constant 0 : i32
    return %c0_i32, %c0_i32_0 : i32, i32
  }
  func.func @transform_23(%arg0: i32) -> (i32, i32) {
    %c0_i32 = arith.constant 0 : i32
    %c0_i32_0 = arith.constant 0 : i32
    %c0_i32_1 = arith.constant 0 : i32
    return %c0_i32, %c0_i32_0 : i32, i32
  }
  func.func @transform_24(%arg0: i32) -> (i32, i32) {
    %c0_i32 = arith.constant 0 : i32
    %c0_i32_0 = arith.constant 0 : i32
    %c0_i32_1 = arith.constant 0 : i32
    return %c0_i32, %c0_i32_0 : i32, i32
  }
  func.func @transform_25(%arg0: i32) -> (i32, i32) {
    %c0_i32 = arith.constant 0 : i32
    %c0_i32_0 = arith.constant 0 : i32
    %c0_i32_1 = arith.constant 0 : i32
    return %c0_i32, %c0_i32_0 : i32, i32
  }
  func.func @transform_26(%arg0: i32) -> (i32, i32) {
    %c0_i32 = arith.constant 0 : i32
    %c0_i32_0 = arith.constant 0 : i32
    %c0_i32_1 = arith.constant 0 : i32
    return %c0_i32, %c0_i32_0 : i32, i32
  }
  func.func @transform_27(%arg0: i32) -> (i32, i32) {
    %c0_i32 = arith.constant 0 : i32
    %c0_i32_0 = arith.constant 0 : i32
    %c0_i32_1 = arith.constant 0 : i32
    return %c0_i32, %c0_i32_0 : i32, i32
  }
  func.func @transform_28(%arg0: i32) -> (i32, i32) {
    %c0_i32 = arith.constant 0 : i32
    %c0_i32_0 = arith.constant 0 : i32
    %c0_i32_1 = arith.constant 0 : i32
    return %c0_i32, %c0_i32_0 : i32, i32
  }
  func.func @transform_29(%arg0: i32) -> (i32, i32) {
    %c0_i32 = arith.constant 0 : i32
    %c0_i32_0 = arith.constant 0 : i32
    %c0_i32_1 = arith.constant 0 : i32
    return %c0_i32, %c0_i32_0 : i32, i32
  }
  func.func @transform_30(%arg0: i32) -> (i32, i32) {
    %c0_i32 = arith.constant 0 : i32
    %c0_i32_0 = arith.constant 0 : i32
    %c0_i32_1 = arith.constant 0 : i32
    return %c0_i32, %c0_i32_0 : i32, i32
  }
  func.func @transform_31(%arg0: i32) -> (i32, i32) {
    %c0_i32 = arith.constant 0 : i32
    %c0_i32_0 = arith.constant 0 : i32
    %c0_i32_1 = arith.constant 0 : i32
    return %c0_i32, %c0_i32_0 : i32, i32
  }
  func.func @transform_32(%arg0: i32) -> (i32, i32) {
    %c0_i32 = arith.constant 0 : i32
    %c0_i32_0 = arith.constant 0 : i32
    %c0_i32_1 = arith.constant 0 : i32
    return %c0_i32, %c0_i32_0 : i32, i32
  }
  func.func @transform_33(%arg0: i32) -> (i32, i32) {
    %c0_i32 = arith.constant 0 : i32
    %c0_i32_0 = arith.constant 0 : i32
    %c0_i32_1 = arith.constant 0 : i32
    return %c0_i32, %c0_i32_0 : i32, i32
  }
  func.func @transform_34(%arg0: i32) -> (i32, i32) {
    %c0_i32 = arith.constant 0 : i32
    %c0_i32_0 = arith.constant 0 : i32
    %c0_i32_1 = arith.constant 0 : i32
    return %c0_i32, %c0_i32_0 : i32, i32
  }
  func.func @transform_35(%arg0: i32) -> (i32, i32) {
    %c0_i32 = arith.constant 0 : i32
    %c0_i32_0 = arith.constant 0 : i32
    %c0_i32_1 = arith.constant 0 : i32
    return %c0_i32, %c0_i32_0 : i32, i32
  }
  func.func @transform_36(%arg0: i32) -> (i32, i32) {
    %c0_i32 = arith.constant 0 : i32
    %c0_i32_0 = arith.constant 0 : i32
    %c0_i32_1 = arith.constant 0 : i32
    return %c0_i32, %c0_i32_0 : i32, i32
  }
  func.func @transform_37(%arg0: i32) -> (i32, i32) {
    %c0_i32 = arith.constant 0 : i32
    %c0_i32_0 = arith.constant 0 : i32
    %c0_i32_1 = arith.constant 0 : i32
    return %c0_i32, %c0_i32_0 : i32, i32
  }
  func.func @transform_38(%arg0: i32) -> (i32, i32) {
    %c0_i32 = arith.constant 0 : i32
    %c0_i32_0 = arith.constant 0 : i32
    %c0_i32_1 = arith.constant 0 : i32
    return %c0_i32, %c0_i32_0 : i32, i32
  }
  func.func @transform_39(%arg0: i32) -> (i32, i32) {
    %c0_i32 = arith.constant 0 : i32
    %c0_i32_0 = arith.constant 0 : i32
    %c0_i32_1 = arith.constant 0 : i32
    return %c0_i32, %c0_i32_0 : i32, i32
  }
  func.func @transform_40(%arg0: i32) -> (i32, i32) {
    %c0_i32 = arith.constant 0 : i32
    %c0_i32_0 = arith.constant 0 : i32
    %c0_i32_1 = arith.constant 0 : i32
    return %c0_i32, %c0_i32_0 : i32, i32
  }
  func.func @transform_41(%arg0: i32) -> (i32, i32) {
    %c0_i32 = arith.constant 0 : i32
    %c0_i32_0 = arith.constant 0 : i32
    %c0_i32_1 = arith.constant 0 : i32
    return %c0_i32, %c0_i32_0 : i32, i32
  }
  func.func @transform_42(%arg0: i32) -> (i32, i32) {
    %c0_i32 = arith.constant 0 : i32
    %c0_i32_0 = arith.constant 0 : i32
    %c0_i32_1 = arith.constant 0 : i32
    return %c0_i32, %c0_i32_0 : i32, i32
  }
  func.func @transform_43(%arg0: i32) -> (i32, i32) {
    %c0_i32 = arith.constant 0 : i32
    %c0_i32_0 = arith.constant 0 : i32
    %c0_i32_1 = arith.constant 0 : i32
    return %c0_i32, %c0_i32_0 : i32, i32
  }
  func.func @transform_44(%arg0: i32) -> (i32, i32) {
    %c0_i32 = arith.constant 0 : i32
    %c0_i32_0 = arith.constant 0 : i32
    %c0_i32_1 = arith.constant 0 : i32
    return %c0_i32, %c0_i32_0 : i32, i32
  }
  func.func @transform_45(%arg0: i32) -> (i32, i32) {
    %c0_i32 = arith.constant 0 : i32
    %c0_i32_0 = arith.constant 0 : i32
    %c0_i32_1 = arith.constant 0 : i32
    return %c0_i32, %c0_i32_0 : i32, i32
  }
  func.func @transform_46(%arg0: i32) -> (i32, i32) {
    %c0_i32 = arith.constant 0 : i32
    %c0_i32_0 = arith.constant 0 : i32
    %c0_i32_1 = arith.constant 0 : i32
    return %c0_i32, %c0_i32_0 : i32, i32
  }
  func.func @transform_47(%arg0: i32) -> (i32, i32) {
    %c0_i32 = arith.constant 0 : i32
    %c0_i32_0 = arith.constant 0 : i32
    %c0_i32_1 = arith.constant 0 : i32
    return %c0_i32, %c0_i32_0 : i32, i32
  }
  func.func @transform_48(%arg0: i32) -> (i32, i32) {
    %c0_i32 = arith.constant 0 : i32
    %c0_i32_0 = arith.constant 0 : i32
    %c0_i32_1 = arith.constant 0 : i32
    return %c0_i32, %c0_i32_0 : i32, i32
  }
  func.func @transform_49(%arg0: i32) -> (i32, i32) {
    %c0_i32 = arith.constant 0 : i32
    %c0_i32_0 = arith.constant 0 : i32
    %c0_i32_1 = arith.constant 0 : i32
    return %c0_i32, %c0_i32_0 : i32, i32
  }
  func.func @transform_50(%arg0: i32) -> (i32, i32) {
    %c0_i32 = arith.constant 0 : i32
    %c0_i32_0 = arith.constant 0 : i32
    %c0_i32_1 = arith.constant 0 : i32
    return %c0_i32, %c0_i32_0 : i32, i32
  }
  func.func @transform_51(%arg0: i32) -> (i32, i32) {
    %c0_i32 = arith.constant 0 : i32
    %c0_i32_0 = arith.constant 0 : i32
    %c0_i32_1 = arith.constant 0 : i32
    return %c0_i32, %c0_i32_0 : i32, i32
  }
  func.func @transform_52(%arg0: i32) -> (i32, i32) {
    %c0_i32 = arith.constant 0 : i32
    %c0_i32_0 = arith.constant 0 : i32
    %c0_i32_1 = arith.constant 0 : i32
    return %c0_i32, %c0_i32_0 : i32, i32
  }
  func.func @transform_53(%arg0: i32) -> (i32, i32) {
    %c0_i32 = arith.constant 0 : i32
    %c0_i32_0 = arith.constant 0 : i32
    %c0_i32_1 = arith.constant 0 : i32
    return %c0_i32, %c0_i32_0 : i32, i32
  }
  func.func @transform_54(%arg0: i32) -> (i32, i32) {
    %c0_i32 = arith.constant 0 : i32
    %c0_i32_0 = arith.constant 0 : i32
    %c0_i32_1 = arith.constant 0 : i32
    return %c0_i32, %c0_i32_0 : i32, i32
  }
  func.func @transform_55(%arg0: i32) -> (i32, i32) {
    %c0_i32 = arith.constant 0 : i32
    %c0_i32_0 = arith.constant 0 : i32
    %c0_i32_1 = arith.constant 0 : i32
    return %c0_i32, %c0_i32_0 : i32, i32
  }
  func.func @transform_56(%arg0: i32) -> (i32, i32) {
    %c0_i32 = arith.constant 0 : i32
    %c0_i32_0 = arith.constant 0 : i32
    %c0_i32_1 = arith.constant 0 : i32
    return %c0_i32, %c0_i32_0 : i32, i32
  }
  func.func @transform_57(%arg0: i32) -> (i32, i32) {
    %c0_i32 = arith.constant 0 : i32
    %c0_i32_0 = arith.constant 0 : i32
    %c0_i32_1 = arith.constant 0 : i32
    return %c0_i32, %c0_i32_0 : i32, i32
  }
  func.func @transform_58(%arg0: i32) -> (i32, i32) {
    %c0_i32 = arith.constant 0 : i32
    %c0_i32_0 = arith.constant 0 : i32
    %c0_i32_1 = arith.constant 0 : i32
    return %c0_i32, %c0_i32_0 : i32, i32
  }
  func.func @transform_59(%arg0: i32) -> (i32, i32) {
    %c0_i32 = arith.constant 0 : i32
    %c0_i32_0 = arith.constant 0 : i32
    %c0_i32_1 = arith.constant 0 : i32
    return %c0_i32, %c0_i32_0 : i32, i32
  }
  func.func @transform_60(%arg0: i32) -> (i32, i32) {
    %c0_i32 = arith.constant 0 : i32
    %c0_i32_0 = arith.constant 0 : i32
    %c0_i32_1 = arith.constant 0 : i32
    return %c0_i32, %c0_i32_0 : i32, i32
  }
  func.func @transform_61(%arg0: i32) -> (i32, i32) {
    %c0_i32 = arith.constant 0 : i32
    %c0_i32_0 = arith.constant 0 : i32
    %c0_i32_1 = arith.constant 0 : i32
    return %c0_i32, %c0_i32_0 : i32, i32
  }
  func.func @transform_62(%arg0: i32) -> (i32, i32) {
    %c0_i32 = arith.constant 0 : i32
    %c0_i32_0 = arith.constant 0 : i32
    %c0_i32_1 = arith.constant 0 : i32
    return %c0_i32, %c0_i32_0 : i32, i32
  }
  func.func @transform_63(%arg0: i32) -> (i32, i32) {
    %c0_i32 = arith.constant 0 : i32
    %c0_i32_0 = arith.constant 0 : i32
    %c0_i32_1 = arith.constant 0 : i32
    return %c0_i32, %c0_i32_0 : i32, i32
  }
  func.func @transform_64(%arg0: i32) -> (i32, i32) {
    %c0_i32 = arith.constant 0 : i32
    %c0_i32_0 = arith.constant 0 : i32
    %c0_i32_1 = arith.constant 0 : i32
    return %c0_i32, %c0_i32_0 : i32, i32
  }
  func.func @transform_65(%arg0: i32) -> (i32, i32) {
    %c0_i32 = arith.constant 0 : i32
    %c0_i32_0 = arith.constant 0 : i32
    return %arg0, %c0_i32 : i32, i32
  }
}

</mosaic_0001>

<bundles_post_ra>
// kernel: transformer_forward.1
= control target key start
LH: loop header
LB: loop body
LE: loop exit
PB: predicated region body
PF: predicated region fallthrough
CT: control target
= control target key end

     0   :  { %s12176_s6 = smov 1   ;;  %s12177_s10 = smov 2   ;;  %s13701_s0 = inlined_call_operand.smem [shape: u32[66], index: -1, kind: input, shape index: {}] }
   0x1   :  { %s12284_s5 = sld [smem:[%s13701_s0]]   ;;  %s12178_s14 = smov 3  }
   0x2   :  { %s12289_s9 = sld [smem:[%s13701_s0 + %s12176_s6]]   ;;  %s12179_s18 = smov 4  }
   0x3   :  { %s12294_s13 = sld [smem:[%s13701_s0 + %s12177_s10]]   ;;  %s12180_s22 = smov 5  }
   0x4   :  { %s12299_s17 = sld [smem:[%s13701_s0 + %s12178_s14]]   ;;  %s12181_s26 = smov 6  }
   0x5   :  { %s12304_s21 = sld [smem:[%s13701_s0 + %s12179_s18]]   ;;  %s12182_s30 = smov 7  }
   0x6   :  { %s12309_s25 = sld [smem:[%s13701_s0 + %s12180_s22]]   ;;  %s12183_s4 = smov 8  }
   0x7   :  { %13763 = sst [smem:[#allocation48_spill]] %s12284_s5  ;;  %s12184_s10 = smov 9  }
   0x8   :  { %13764 = sst [smem:[#allocation49_spill]] %s12289_s9  ;;  %s12185_s15 = smov 10  }
   0x9   :  { %13765 = sst [smem:[#allocation50_spill]] %s12294_s13  ;;  %s12186_s20 = smov 11  }
   0xa   :  { %13766 = sst [smem:[#allocation51_spill]] %s12299_s17  ;;  %s12188_s1 = smov 13  }
   0xb   :  { %13767 = sst [smem:[#allocation52_spill]] %s12304_s21  ;;  %s12189_s7 = smov 14  }
   0xc   :  { %13768 = sst [smem:[#allocation53_spill]] %s12309_s25  ;;  %s12191_s22 = smov 16  }
   0xd   :  { %s12314_s29 = sld [smem:[%s13701_s0 + %s12181_s26]]   ;;  %s12187_s26 = smov 12  }
   0xe   :  { %s12319_s3 = sld [smem:[%s13701_s0 + %s12182_s30]]   ;;  %s12192_s28 = smov 17  }
   0xf   :  { %s12324_s8 = sld [smem:[%s13701_s0 + %s12183_s4]]  }
  0x10   :  { %s12329_s14 = sld [smem:[%s13701_s0 + %s12184_s10]]  }
  0x11   :  { %s12334_s19 = sld [smem:[%s13701_s0 + %s12185_s15]]   ;;  %s12190_s15 = smov 15  }
  0x12   :  { %s12339_s24 = sld [smem:[%s13701_s0 + %s12186_s20]]  }
  0x13   :  { %13769 = sst [smem:[#allocation54_spill]] %s12314_s29 }
  0x14   :  { %13770 = sst [smem:[#allocation55_spill]] %s12319_s3 }
  0x15   :  { %13771 = sst [smem:[#allocation56_spill]] %s12324_s8 }
  0x16   :  { %13772 = sst [smem:[#allocation57_spill]] %s12329_s14 }
  0x17   :  { %13773 = sst [smem:[#allocation58_spill]] %s12334_s19 }
  0x18   :  { %13774 = sst [smem:[#allocation59_spill]] %s12339_s24 }
  0x19   :  { %s12344_s30 = sld [smem:[%s13701_s0 + %s12187_s26]]  }
  0x1a   :  { %s12349_s6 = sld [smem:[%s13701_s0 + %s12188_s1]]  }
  0x1b   :  { %s12354_s12 = sld [smem:[%s13701_s0 + %s12189_s7]]   ;;  %s12193_s7 = smov 18  }
  0x1c   :  { %s12359_s20 = sld [smem:[%s13701_s0 + %s12190_s15]]   ;;  %s12194_s15 = smov 19  }
  0x1d   :  { %s12364_s27 = sld [smem:[%s13701_s0 + %s12191_s22]]   ;;  %s12195_s22 = smov 20  }
  0x1e   :  { %s12369_s4 = sld [smem:[%s13701_s0 + %s12192_s28]]   ;;  %s12196_s28 = smov 21  }
  0x1f   :  { %13775 = sst [smem:[#allocation60_spill]] %s12344_s30 }
  0x20   :  { %13776 = sst [smem:[#allocation61_spill]] %s12349_s6 }
  0x21   :  { %13777 = sst [smem:[#allocation62_spill]] %s12354_s12 }
  0x22   :  { %13778 = sst [smem:[#allocation63_spill]] %s12359_s20 }
  0x23   :  { %13779 = sst [smem:[#allocation64_spill]] %s12364_s27 }
  0x24   :  { %13780 = sst [smem:[#allocation65_spill]] %s12369_s4 }
  0x25   :  { %s12374_s9 = sld [smem:[%s13701_s0 + %s12193_s7]]   ;;  %s12197_s7 = smov 22  }
  0x26   :  { %s12379_s13 = sld [smem:[%s13701_s0 + %s12194_s15]]   ;;  %s12198_s15 = smov 23  }
  0x27   :  { %s12384_s20 = sld [smem:[%s13701_s0 + %s12195_s22]]   ;;  %s12199_s22 = smov 24  }
  0x28   :  { %s12389_s27 = sld [smem:[%s13701_s0 + %s12196_s28]]   ;;  %s12200_s28 = smov 25  }
  0x29   :  { %s12394_s14 = sld [smem:[%s13701_s0 + %s12197_s7]]   ;;  %s12201_s7 = smov 26  }
  0x2a   :  { %s12399_s3 = sld [smem:[%s13701_s0 + %s12198_s15]]   ;;  %s12202_s15 = smov 27  }
  0x2b   :  { %13781 = sst [smem:[#allocation66_spill]] %s12374_s9 }
  0x2c   :  { %13782 = sst [smem:[#allocation67_spill]] %s12379_s13 }
  0x2d   :  { %13783 = sst [smem:[#allocation68_spill]] %s12384_s20 }
  0x2e   :  { %13784 = sst [smem:[#allocation69_spill]] %s12389_s27 }
  0x2f   :  { %13785 = sst [smem:[#allocation70_spill]] %s12394_s14 }
  0x30   :  { %13786 = sst [smem:[#allocation71_spill]] %s12399_s3 }
  0x31   :  { %s12404_s6 = sld [smem:[%s13701_s0 + %s12199_s22]]   ;;  %s12203_s22 = smov 28  }
  0x32   :  { %s12409_s27 = sld [smem:[%s13701_s0 + %s12200_s28]]   ;;  %s12204_s28 = smov 29  }
  0x33   :  { %s12414_s14 = sld [smem:[%s13701_s0 + %s12201_s7]]   ;;  %s12205_s7 = smov 30  }
  0x34   :  { %s12419_s3 = sld [smem:[%s13701_s0 + %s12202_s15]]   ;;  %s12206_s15 = smov 31  }
  0x37   :  { %13787 = sst [smem:[#allocation72_spill]] %s12404_s6 }
  0x38   :  { %13788 = sst [smem:[#allocation73_spill]] %s12409_s27 }
  0x39   :  { %13789 = sst [smem:[#allocation74_spill]] %s12414_s14 }
  0x3a   :  { %13790 = sst [smem:[#allocation75_spill]] %s12419_s3 }
  0x3b   :  { %s12424_s6 = sld [smem:[%s13701_s0 + %s12203_s22]]   ;;  %s12207_s22 = smov 32  }
  0x3c   :  { %s12429_s27 = sld [smem:[%s13701_s0 + %s12204_s28]]   ;;  %s12208_s28 = smov 33  }
  0x3d   :  { %s12434_s14 = sld [smem:[%s13701_s0 + %s12205_s7]]   ;;  %s12209_s7 = smov 34  }
  0x3e   :  { %s12439_s3 = sld [smem:[%s13701_s0 + %s12206_s15]]   ;;  %s12210_s15 = smov 35  }
  0x41   :  { %13791 = sst [smem:[#allocation76_spill]] %s12424_s6 }
  0x42   :  { %13792 = sst [smem:[#allocation77_spill]] %s12429_s27 }
  0x43   :  { %13793 = sst [smem:[#allocation78_spill]] %s12434_s14 }
  0x44   :  { %13794 = sst [smem:[#allocation79_spill]] %s12439_s3 }
  0x45   :  { %s12444_s6 = sld [smem:[%s13701_s0 + %s12207_s22]]   ;;  %s12211_s22 = smov 36  }
  0x46   :  { %s12449_s27 = sld [smem:[%s13701_s0 + %s12208_s28]]   ;;  %s12212_s28 = smov 37  }
  0x47   :  { %s12454_s14 = sld [smem:[%s13701_s0 + %s12209_s7]]   ;;  %s12213_s7 = smov 38  }
  0x48   :  { %s12459_s3 = sld [smem:[%s13701_s0 + %s12210_s15]]   ;;  %s12214_s15 = smov 39  }
  0x49   :  { %s12474_s12 = sld [smem:[%s13701_s0 + %s12213_s7]]   ;;  %s12217_s7 = smov 42  }
  0x4a   :  { %s12479_s19 = sld [smem:[%s13701_s0 + %s12214_s15]]   ;;  %s12218_s15 = smov 43  }
  0x4b   :  { %13795 = sst [smem:[#allocation80_spill]] %s12444_s6 }
  0x4c   :  { %13796 = sst [smem:[#allocation81_spill]] %s12449_s27 }
  0x4d   :  { %13797 = sst [smem:[#allocation82_spill]] %s12454_s14 }
  0x4e   :  { %13798 = sst [smem:[#allocation83_spill]] %s12459_s3 }
  0x4f   :  { %s12464_s6 = sld [smem:[%s13701_s0 + %s12211_s22]]   ;;  %s12215_s22 = smov 40  }
  0x50   :  { %s12469_s27 = sld [smem:[%s13701_s0 + %s12212_s28]]   ;;  %s12216_s28 = smov 41  }
  0x51   :  { %13801 = sst [smem:[#allocation86_spill]] %s12474_s12 }
  0x52   :  { %13802 = sst [smem:[#allocation87_spill]] %s12479_s19 }
  0x53   :  { %s12484_s8 = sld [smem:[%s13701_s0 + %s12215_s22]]   ;;  %s12219_s22 = smov 44  }
  0x54   :  { %s12494_s12 = sld [smem:[%s13701_s0 + %s12217_s7]]   ;;  %s12221_s7 = smov 46  }
  0x55   :  { %13799 = sst [smem:[#allocation84_spill]] %s12464_s6 }
  0x56   :  { %13800 = sst [smem:[#allocation85_spill]] %s12469_s27 }
  0x57   :  { %s12489_s27 = sld [smem:[%s13701_s0 + %s12216_s28]]   ;;  %s12220_s28 = smov 45  }
  0x58   :  { %s12499_s21 = sld [smem:[%s13701_s0 + %s12218_s15]]   ;;  %s12222_s15 = smov 47  }
  0x59   :  { %13803 = sst [smem:[#allocation88_spill]] %s12484_s8 }
  0x5a   :  { %13804 = sst [smem:[#allocation89_spill]] %s12494_s12 }
  0x5b   :  { %s12504_s29 = sld [smem:[%s13701_s0 + %s12219_s22]]   ;;  %s12223_s22 = smov 48  }
  0x5c   :  { %s12509_s24 = sld [smem:[%s13701_s0 + %s12220_s28]]   ;;  %s12224_s28 = smov 49  }
  0x5d   :  { %s12514_s30 = sld [smem:[%s13701_s0 + %s12221_s7]]   ;;  %s12225_s7 = smov 50  }
  0x5e   :  { %s12519_s17 = sld [smem:[%s13701_s0 + %s12222_s15]]   ;;  %s12226_s15 = smov 51  }
  0x5f   :  { %s12524_s9 = sld [smem:[%s13701_s0 + %s12223_s22]]   ;;  %s12227_s22 = smov 52  }
  0x60   :  { %s12529_s25 = sld [smem:[%s13701_s0 + %s12224_s28]]   ;;  %s12228_s28 = smov 53  }
  0x61   :  { %13805 = sst [smem:[#allocation90_spill]] %s12504_s29 }
  0x62   :  { %s12534_s20 = sld [smem:[%s13701_s0 + %s12225_s7]]   ;;  %s12229_s7 = smov 54  }
  0x63   :  { %13806 = sst [smem:[#allocation91_spill]] %s12514_s30 }
  0x64   :  { %s12539_s4 = sld [smem:[%s13701_s0 + %s12226_s15]]   ;;  %s12230_s15 = smov 55  }
  0x65   :  { %13807 = sst [smem:[#allocation92_spill]] %s12524_s9 }
  0x66   :  { %s12544_s13 = sld [smem:[%s13701_s0 + %s12227_s22]]   ;;  %s12231_s22 = smov 56  }
  0x67   :  { %s12549_s29 = sld [smem:[%s13701_s0 + %s12228_s28]]   ;;  %s12232_s28 = smov 57  }
  0x68   :  { %13808 = sst [smem:[#allocation93_spill]] %s12534_s20 }
  0x69   :  { %s12554_s12 = sld [smem:[%s13701_s0 + %s12229_s7]]   ;;  %s12233_s7 = smov 58  }
  0x6a   :  { %13809 = sst [smem:[#allocation94_spill]] %s12539_s4 }
  0x6b   :  { %s12559_s5 = sld [smem:[%s13701_s0 + %s12230_s15]]   ;;  %s12234_s15 = smov 59  }
  0x6c   :  { %13810 = sst [smem:[#allocation95_spill]] %s12544_s13 }
  0x6d   :  { %s12564_s13 = sld [smem:[%s13701_s0 + %s12231_s22]]   ;;  %s12235_s22 = smov 60  }
  0x6e   :  { %s12569_s4 = sld [smem:[%s13701_s0 + %s12232_s28]]   ;;  %s12236_s28 = smov 61  }
  0x6f   :  { %13811 = sst [smem:[#allocation96_spill]] %s12554_s12 }
  0x70   :  { %s12574_s12 = sld [smem:[%s13701_s0 + %s12233_s7]]   ;;  %s12237_s7 = smov 62  }
  0x71   :  { %13812 = sst [smem:[#allocation97_spill]] %s12559_s5 }
  0x72   :  { %s12579_s5 = sld [smem:[%s13701_s0 + %s12234_s15]]   ;;  %s12238_s15 = smov 63  }
  0x73   :  { %13813 = sst [smem:[#allocation98_spill]] %s12564_s13 }
  0x74   :  { %13814 = sst [smem:[#allocation99_spill]] %s12569_s4 }
  0x75   :  { %s12584_s13 = sld [smem:[%s13701_s0 + %s12235_s22]]   ;;  %s12239_s22 = smov 64  }
  0x76   :  { %13815 = sst [smem:[#allocation100_spill]] %s12574_s12 }
  0x77   :  { %s12589_s20 = sld [smem:[%s13701_s0 + %s12236_s28]]   ;;  %s12240_s28 = smov 65  }
  0x78   :  { %13816 = sst [smem:[#allocation101_spill]] %s12579_s5 }
  0x79   :  { %s12594_s12 = sld [smem:[%s13701_s0 + %s12237_s7]]  }
  0x7a   :  { %s12599_s9 = sld [smem:[%s13701_s0 + %s12238_s15]]  }
  0x7b   :  { %13817 = sst [smem:[#allocation102_spill]] %s12584_s13 }
  0x7c   :  { %s12604_s13 = sld [smem:[%s13701_s0 + %s12239_s22]]  }
  0x7d   :  { %s12609_s30 = sld [smem:[%s13701_s0 + %s12240_s28]]  }
  0x7f   :  { %13818 = sst [smem:[#allocation103_spill]] %s12594_s12 }
  0x80   :  { %13819 = sst [smem:[#allocation104_spill]] %s12599_s9 }
  0x82   :  { %13820 = sst [smem:[#allocation105_spill]] %s12604_s13 }
  0x83   :  { %136 = vsyncpa [#allocation3], 0 }
  0x84   :  { %137 = vsyncpa [#allocation6], 0 }
  0x85   :  { %138 = vsyncpa [#allocation9], 0 }
  0x86   :  { %139 = vsyncpa [#allocation12], 0 }
  0x87   :  { %140 = vsyncpa [#allocation15], 0 }
  0x88   :  { %141 = vsyncpa [#allocation18], 0 }
  0x89   :  { %142 = vsyncpa [#allocation21], 0 }
  0x8a   :  { %143 = vsyncpa [#allocation24], 0 }
  0x8b   :  { %144 = vsyncpa [#allocation27], 0 }
  0x8c   :  { %145 = vsyncpa [#allocation30], 0 }
  0x8d   :  { %146 = vsyncpa [#allocation33], 0 }
  0x8e   :  { %147 = vsyncpa [#allocation4], 0 }
  0x8f   :  { %149 = vsyncpa [#allocation4 + $0x1], 0  ;;  %s12611_s7 = smov 0   ;;  %s12613_s10 = smov 0  }
  0x90   :  { %s12615_s11 = smov 0   ;;  %s12617_s0 = smov 0  }
  0x91 LB: > { %s13821_s13 = sld [smem:[#allocation105_spill]]  ;;  %s12632_s15 = sadd.s32 4294967295, %s12174_s0   ;;  %s12166_s10 = sphi %s12613_s10, %s13937_s10   ;;  %s12162_s7 = sphi %s12611_s7, %s13936_s7   ;;  %s12174_s0 = sphi %s12617_s0, %s13933_s0   ;;  %s12170_s11 = sphi %s12615_s11, %s13935_s11  }
  0x92   : > { %s13822_s9 = sld [smem:[#allocation104_spill]]  ;;  %s10059_s16 = sadd.s32 4294967294, %s12174_s0  }
  0x93   : > { %13823 = sst [smem:[#allocation106_spill]] %s12162_s7  ;;  %s12636_s18 = sadd.s32 1, %s12174_s0  }
  0x94   : > { %13824 = sst [smem:[#allocation107_spill]] %s12170_s11  ;;  %s1532_s22 = sadd.s32 1, %s12170_s11 }
  0x95   : > { %13825 = sst [smem:[#allocation108_spill]] %s12174_s0  ;;  %s1529_s23 = ssub.s32 %s12174_s0, %s12636_s18 }
  0x96   : > { %13826 = sst [smem:[#allocation109_spill]] %s12636_s18  ;;  %p1542_p0 = scmp.ne.s32.totalorder %s12170_s11, %s12166_s10 }
  0x97   : > { %p1530_p1 = scmp.eq.s32.totalorder %s1529_s23, 0  ;;  %p1543_p2 = scmp.eq.s32.totalorder %s12632_s15, 1 }
  0x98   : > { %p1548_p3 = scmp.ne.s32.totalorder %s12166_s10, %s12162_s7  ;;  %p1549_p4 = scmp.eq.s32.totalorder %s10059_s16, 1 }
  0x99   : > { %s12647_s26 = scalar_select %p1530_p1, %s12170_s11, %s1532_s22  }
  0x9a   : > { %p12649_p5 = por %p1543_p2, %p1542_p0  ;;  %p12653_p6 = por %p1549_p4, %p1548_p3 }
  0x9b   : > { %13827 = sst [smem:[#allocation110_spill]] %s12647_s26  ;;  %p10060_p7 = scmp.ge.s32.totalorder %s12174_s0, 1 }
  0x9c   : > { %s13828_s28 = scalar_select %p12649_p5, 1, 0 }
  0x9d   : > { %s13829_s1 = scalar_select %p12653_p6, 1, 0 }
  0x9e   : > { %p1556_p8 = scmp.lt.s32.totalorder %s12174_s0, 3  ;;  %p13725_p9 = scmp.eq.s32.totalorder %s12632_s15, 0 }
  0x9f   : > { %13830 = sst [smem:[#allocation111_spill]] %s13829_s1  ;;  %s12241_s23 = smov [#allocation5]  }
  0xa0   : > { %p12660_p10 = pnand %p10060_p7, %p1556_p8  ;;  %s1679_s16 = sshll.u32 %s12241_s23, 4  ;;  %s1680_s16 = int_to_ptr.vmem [resolvable:$true] %s1679_s16 }
  0xa1   : > { %s12242_s22 = smov [#allocation8]   ;;  %s12243_s18 = smov [#allocation11]  }
  0xa2   : > { %s13831_s2 = scalar_select %p12660_p10, 1, 0 }
  0xa3   : > { %p11161_p11 = pneg %p12660_p10  ;;  %s1707_s26 = sshll.u32 %s12242_s22, 4  ;;  %s1708_s26 = int_to_ptr.vmem [resolvable:$true] %s1707_s26 }
  0xa4   : > { %s1729_s1 = sshll.u32 %s12243_s18, 4  ;;  %s11535_s23 = scalar_lea.vmem %s1680_s16, 16  ;;  %s12672_s1 = int_to_ptr.vmem [resolvable:$true] %s1729_s1 }
  0xa5   : > { %p12668_p12 = pnand %p13725_p9, %p11161_p11  ;;  %p11536_p0 = scmp.ne.s32.totalorder %s1680_s16, %s11535_s23 }
  0xa6   : > { %s11542_s22 = scalar_lea.vmem %s1680_s16, 32  ;;  %p11543_p3 = scmp.lt.s32.totalorder %s1680_s16, %s1680_s16 }
  0xa7   : > { %p12676_p13 = pneg %p12668_p12  ;;  %p11544_p4 = scmp.lt.s32.totalorder %s11542_s22, %s11535_s23 }
  0xa9   : > { %p11538_p1 = pnand %p11536_p0, %p12676_p13  ;;  %p11545_p7 = por %p11544_p4, %p11543_p3 }
  0xab   : > { %p11539_p2 = pneg %p11538_p1 }
  0xad   : > { %p11546_p8 = pnand %p11545_p7, %p11539_p2 }
  0xaf   : > { %11549 = shalt.err (!%p11546_p8)
}
  0xb0   : > { %s13834_s3 = sld [smem:[#allocation83_spill]]  ;;  %s11561_s18 = scalar_lea.vmem %s1708_s26, 16 }
  0xb1   : > { %p11562_p11 = scmp.ne.s32.totalorder %s1708_s26, %s11561_s18  ;;  %s11568_s0 = scalar_lea.vmem %s1708_s26, 32 }
  0xb2   : > { %p11569_p5 = scmp.lt.s32.totalorder %s1708_s26, %s1708_s26  ;;  %p11570_p0 = scmp.lt.s32.totalorder %s11568_s0, %s11561_s18 }
  0xb3   : > { %p11564_p9 = pnand %p11562_p11, %p12676_p13 }
  0xb4   : > { %p11571_p1 = por %p11570_p0, %p11569_p5 }
  0xb5   : > { %p11565_p6 = pneg %p11564_p9 }
  0xb6   : > { %11167 = dma.hbm_to_vmem [thread:$0]  (!%p12668_p12), %s13834_s3, 16, %s1680_s16, [#allocation6]  }
  0xb7   : > { %p11572_p10 = pnand %p11571_p1, %p11565_p6 }
  0xb9   : > { %11575 = shalt.err (!%p11572_p10)
}
  0xba   : > { %s13835_s19 = sld [smem:[#allocation87_spill]]  ;;  %s11587_s16 = scalar_lea.vmem %s12672_s1, 16 }
  0xbb   : > { %p11588_p2 = scmp.ne.s32.totalorder %s12672_s1, %s11587_s16  ;;  %s11594_s23 = scalar_lea.vmem %s12672_s1, 32 }
  0xbc   : > { %p11595_p4 = scmp.lt.s32.totalorder %s12672_s1, %s12672_s1  ;;  %p11596_p5 = scmp.lt.s32.totalorder %s11594_s23, %s11587_s16 }
  0xbd   : > { %p11590_p3 = pnand %p11588_p2, %p12676_p13 }
  0xbe   : > { %p11597_p6 = por %p11596_p5, %p11595_p4 }
  0xbf   : > { %p11591_p9 = pneg %p11590_p3 }
  0xc0   : > { %11173 = dma.hbm_to_vmem [thread:$0]  (!%p12668_p12), %s13835_s19, 16, %s1708_s26, [#allocation9]  }
  0xc1   : > { %p11598_p10 = pnand %p11597_p6, %p11591_p9 }
  0xc3   : > { %11601 = shalt.err (!%p11598_p10)
}
  0xc4   : > { %11179 = dma.hbm_to_vmem [thread:$0]  (!%p12668_p12), %s12489_s27, 16, %s12672_s1, [#allocation12]  }
  0xc5   : > { %s12244_s0 = smov [#allocation14]   ;;  %s12245_s22 = smov [#allocation17]  }
  0xc6   : > { %s1757_s26 = sshll.u32 %s12244_s0, 4  ;;  %s1779_s18 = sshll.u32 %s12245_s22, 4  ;;  %s1758_s26 = int_to_ptr.vmem [resolvable:$true] %s1757_s26  ;;  %s1780_s18 = int_to_ptr.vmem [resolvable:$true] %s1779_s18 }
  0xc7   : > { %s11613_s3 = scalar_lea.vmem %s1758_s26, 16  ;;  %s11620_s16 = scalar_lea.vmem %s1758_s26, 32 }
  0xc8   : > { %p11614_p7 = scmp.ne.s32.totalorder %s1758_s26, %s11613_s3  ;;  %p11621_p0 = scmp.lt.s32.totalorder %s1758_s26, %s1758_s26 }
  0xc9   : > { %p11622_p1 = scmp.lt.s32.totalorder %s11620_s16, %s11613_s3 }
  0xca   : > { %p11616_p8 = pnand %p11614_p7, %p12676_p13 }
  0xcb   : > { %p11623_p2 = por %p11622_p1, %p11621_p0 }
  0xcc   : > { %p11617_p11 = pneg %p11616_p8 }
  0xce   : > { %p11624_p3 = pnand %p11623_p2, %p11617_p11 }
  0xd0   : > { %11627 = shalt.err (!%p11624_p3)
}
  0xd1   : > { %11185 = dma.hbm_to_vmem [thread:$0]  (!%p12668_p12), %s12509_s24, 16, %s1758_s26, [#allocation15]  }
  0xd2   : > { %s11639_s1 = scalar_lea.vmem %s1780_s18, 16  ;;  %s11646_s23 = scalar_lea.vmem %s1780_s18, 32 }
  0xd3   : > { %p11640_p9 = scmp.ne.s32.totalorder %s1780_s18, %s11639_s1  ;;  %p11647_p6 = scmp.lt.s32.totalorder %s1780_s18, %s1780_s18 }
  0xd4   : > { %p11648_p10 = scmp.lt.s32.totalorder %s11646_s23, %s11639_s1 }
  0xd5   : > { %p11642_p4 = pnand %p11640_p9, %p12676_p13 }
  0xd6   : > { %p11649_p7 = por %p11648_p10, %p11647_p6 }
  0xd7   : > { %p11643_p5 = pneg %p11642_p4 }
  0xd9   : > { %p11650_p8 = pnand %p11649_p7, %p11643_p5 }
  0xdb   : > { %11653 = shalt.err (!%p11650_p8)
}
  0xdc   : > { %11191 = dma.hbm_to_vmem [thread:$0]  (!%p12668_p12), %s12519_s17, 16, %s1780_s18, [#allocation18]  }
  0xdd   : > { %s12246_s3 = smov [#allocation20]   ;;  %s12247_s26 = smov [#allocation23]  }
  0xde   : > { %s1801_s0 = sshll.u32 %s12246_s3, 4  ;;  %s1829_s22 = sshll.u32 %s12247_s26, 4  ;;  %s1802_s0 = int_to_ptr.vmem [resolvable:$true] %s1801_s0  ;;  %s1830_s22 = int_to_ptr.vmem [resolvable:$true] %s1829_s22 }
  0xdf   : > { %s11665_s16 = scalar_lea.vmem %s1802_s0, 16  ;;  %s11672_s19 = scalar_lea.vmem %s1802_s0, 32 }
  0xe0   : > { %p11666_p11 = scmp.ne.s32.totalorder %s1802_s0, %s11665_s16  ;;  %p11673_p2 = scmp.lt.s32.totalorder %s1802_s0, %s1802_s0 }
  0xe1   : > { %p11674_p3 = scmp.lt.s32.totalorder %s11672_s19, %s11665_s16 }
  0xe2   : > { %p11668_p0 = pnand %p11666_p11, %p12676_p13 }
  0xe3   : > { %p11675_p9 = por %p11674_p3, %p11673_p2 }
  0xe4   : > { %p11669_p1 = pneg %p11668_p0 }
  0xe6   : > { %p11676_p4 = pnand %p11675_p9, %p11669_p1 }
  0xe8   : > { %11679 = shalt.err (!%p11676_p4)
}
  0xe9   : > { %11197 = dma.hbm_to_vmem [thread:$0]  (!%p12668_p12), %s12529_s25, 16, %s1802_s0, [#allocation21]  }
  0xea   : > { %s11691_s18 = scalar_lea.vmem %s1830_s22, 16  ;;  %s11698_s1 = scalar_lea.vmem %s1830_s22, 32 }
  0xeb   : > { %p11692_p5 = scmp.ne.s32.totalorder %s1830_s22, %s11691_s18  ;;  %p11699_p7 = scmp.lt.s32.totalorder %s1830_s22, %s1830_s22 }
  0xec   : > { %p11700_p8 = scmp.lt.s32.totalorder %s11698_s1, %s11691_s18 }
  0xed   : > { %p11694_p6 = pnand %p11692_p5, %p12676_p13 }
  0xee   : > { %p11701_p11 = por %p11700_p8, %p11699_p7 }
  0xef   : > { %p11695_p10 = pneg %p11694_p6 }
  0xf1   : > { %p11702_p0 = pnand %p11701_p11, %p11695_p10 }
  0xf3   : > { %11705 = shalt.err (!%p11702_p0)
}
  0xf4   : > { %11203 = dma.hbm_to_vmem [thread:$0]  (!%p12668_p12), %s12549_s29, 16, %s1830_s22, [#allocation24]  }
  0xf5   : > { %s12248_s19 = smov [#allocation26]   ;;  %s12249_s3 = smov [#allocation29]  }
  0xf6   : > { %s1857_s23 = sshll.u32 %s12248_s19, 4  ;;  %s1879_s0 = sshll.u32 %s12249_s3, 4  ;;  %s1858_s23 = int_to_ptr.vmem [resolvable:$true] %s1857_s23  ;;  %s1880_s0 = int_to_ptr.vmem [resolvable:$true] %s1879_s0 }
  0xf7   : > { %s11717_s26 = scalar_lea.vmem %s1858_s23, 16  ;;  %s11724_s16 = scalar_lea.vmem %s1858_s23, 32 }
  0xf8   : > { %p11718_p1 = scmp.ne.s32.totalorder %s1858_s23, %s11717_s26  ;;  %p11725_p9 = scmp.lt.s32.totalorder %s1858_s23, %s1858_s23 }
  0xf9   : > { %p11726_p4 = scmp.lt.s32.totalorder %s11724_s16, %s11717_s26 }
  0xfa   : > { %p11720_p2 = pnand %p11718_p1, %p12676_p13 }
  0xfb   : > { %p11727_p5 = por %p11726_p4, %p11725_p9 }
  0xfc   : > { %p11721_p3 = pneg %p11720_p2 }
  0xfe   : > { %p11728_p6 = pnand %p11727_p5, %p11721_p3 }
 0x100   : > { %11731 = shalt.err (!%p11728_p6)
}
 0x101   : > { %s13836_s4 = sld [smem:[#allocation99_spill]]  ;;  %s11743_s22 = scalar_lea.vmem %s1880_s0, 16 }
 0x102   : > { %p11744_p10 = scmp.ne.s32.totalorder %s1880_s0, %s11743_s22  ;;  %s11750_s18 = scalar_lea.vmem %s1880_s0, 32 }
 0x103   : > { %p11751_p11 = scmp.lt.s32.totalorder %s1880_s0, %s1880_s0  ;;  %p11752_p0 = scmp.lt.s32.totalorder %s11750_s18, %s11743_s22 }
 0x104   : > { %p11746_p7 = pnand %p11744_p10, %p12676_p13 }
 0x105   : > { %p11753_p1 = por %p11752_p0, %p11751_p11 }
 0x106   : > { %p11747_p8 = pneg %p11746_p7 }
 0x107   : > { %11209 = dma.hbm_to_vmem [thread:$0]  (!%p12668_p12), %s13836_s4, 16, %s1858_s23, [#allocation27]  }
 0x108   : > { %p11754_p2 = pnand %p11753_p1, %p11747_p8 }
 0x10a   : > { %11757 = shalt.err (!%p11754_p2)
}
 0x10b   : > { %s13837_s5 = sld [smem:[#allocation101_spill]]  ;;  %s12250_s1 = smov [#allocation32]  }
 0x10c   : > { %s1901_s19 = sshll.u32 %s12250_s1, 4  ;;  %s12251_s23 = smov [#allocation2]   ;;  %s1902_s19 = int_to_ptr.vmem [resolvable:$true] %s1901_s19 }
 0x10d   : > { %s1668_s3 = sshll.u32 %s12251_s23, 4  ;;  %s11769_s26 = scalar_lea.vmem %s1902_s19, 16  ;;  %s1669_s3 = int_to_ptr.vmem [resolvable:$true] %s1668_s3 }
 0x10e   : > { %p11770_p3 = scmp.ne.s32.totalorder %s1902_s19, %s11769_s26  ;;  %s11776_s16 = scalar_lea.vmem %s1902_s19, 32 }
 0x10f   : > { %p11777_p5 = scmp.lt.s32.totalorder %s1902_s19, %s1902_s19  ;;  %p11778_p6 = scmp.lt.s32.totalorder %s11776_s16, %s11769_s26 }
 0x110   : > { %p11772_p9 = pnand %p11770_p3, %p12676_p13 }
 0x111   : > { %11215 = dma.hbm_to_vmem [thread:$0]  (!%p12668_p12), %s13837_s5, 16, %s1880_s0, [#allocation30]  }
 0x112   : > { %p11773_p4 = pneg %p11772_p9  ;;  %p11779_p10 = por %p11778_p6, %p11777_p5 }
 0x114   : > { %p11780_p7 = pnand %p11779_p10, %p11773_p4 }
 0x116   : > { %11783 = shalt.err (!%p11780_p7)
}
 0x117   : > { %11221 = dma.hbm_to_vmem [thread:$0]  (!%p12668_p12), %s12589_s20, 16, %s1902_s19, [#allocation33]  }
 0x118   : > { %s11795_s0 = scalar_lea.vmem %s1669_s3, 16  ;;  %s11802_s22 = scalar_lea.vmem %s1669_s3, 32 }
 0x119   : > { %p11796_p8 = scmp.ne.s32.totalorder %s1669_s3, %s11795_s0  ;;  %p11803_p1 = scmp.lt.s32.totalorder %s1669_s3, %s1669_s3 }
 0x11a   : > { %p11804_p2 = scmp.lt.s32.totalorder %s11802_s22, %s11795_s0 }
 0x11b   : > { %p11798_p11 = pnand %p11796_p8, %p12676_p13 }
 0x11c   : > { %p11805_p3 = por %p11804_p2, %p11803_p1 }
 0x11d   : > { %p11799_p0 = pneg %p11798_p11 }
 0x11f   : > { %p11806_p9 = pnand %p11805_p3, %p11799_p0 }
 0x121   : > { %11809 = shalt.err (!%p11806_p9)
}
 0x122   : > { %s13838_s14 = sld [smem:[#allocation82_spill]]  ;;  %s12252_s18 = smov [#allocation7]  }
 0x123   : > { %s1690_s1 = sshll.u32 %s12252_s18, 4  ;;  %s12253_s19 = smov [#allocation10]   ;;  %s1691_s1 = int_to_ptr.vmem [resolvable:$true] %s1690_s1 }
 0x124   : > { %s1718_s23 = sshll.u32 %s12253_s19, 4  ;;  %s11821_s26 = scalar_lea.vmem %s1691_s1, 16  ;;  %s1719_s23 = int_to_ptr.vmem [resolvable:$true] %s1718_s23 }
 0x125   : > { %p11822_p4 = scmp.ne.s32.totalorder %s1691_s1, %s11821_s26  ;;  %s11828_s16 = scalar_lea.vmem %s1691_s1, 32 }
 0x126   : > { %p11829_p10 = scmp.lt.s32.totalorder %s1691_s1, %s1691_s1  ;;  %p11830_p7 = scmp.lt.s32.totalorder %s11828_s16, %s11821_s26 }
 0x127   : > { %p11824_p5 = pnand %p11822_p4, %p12676_p13 }
 0x128   : > { %11164 = dma.hbm_to_vmem [thread:$0]  (!%p12668_p12), %s13838_s14, 16, %s1669_s3, [#allocation3]  }
 0x129   : > { %p11825_p6 = pneg %p11824_p5  ;;  %p11831_p8 = por %p11830_p7, %p11829_p10 }
 0x12b   : > { %p11832_p11 = pnand %p11831_p8, %p11825_p6 }
 0x12d   : > { %11835 = shalt.err (!%p11832_p11)
}
 0x12e   : > { %s13839_s6 = sld [smem:[#allocation84_spill]]  ;;  %s11847_s3 = scalar_lea.vmem %s1719_s23, 16 }
 0x12f   : > { %p11848_p0 = scmp.ne.s32.totalorder %s1719_s23, %s11847_s3  ;;  %s11854_s0 = scalar_lea.vmem %s1719_s23, 32 }
 0x130   : > { %p11855_p3 = scmp.lt.s32.totalorder %s1719_s23, %s1719_s23  ;;  %p11856_p9 = scmp.lt.s32.totalorder %s11854_s0, %s11847_s3 }
 0x131   : > { %p11850_p1 = pnand %p11848_p0, %p12676_p13 }
 0x132   : > { %p11857_p4 = por %p11856_p9, %p11855_p3 }
 0x133   : > { %p11851_p2 = pneg %p11850_p1 }
 0x134   : > { %11170 = dma.hbm_to_vmem [thread:$0]  (!%p12668_p12), %s13839_s6, 16, %s1691_s1, [#allocation6]  }
 0x135   : > { %p11858_p5 = pnand %p11857_p4, %p11851_p2 }
 0x137   : > { %11861 = shalt.err (!%p11858_p5)
}
 0x138   : > { %s13840_s8 = sld [smem:[#allocation88_spill]]  ;;  %s12254_s22 = smov [#allocation13]  }
 0x139   : > { %s1743_s18 = sshll.u32 %s12254_s22, 4  ;;  %s12255_s1 = smov [#allocation16]   ;;  %s1744_s18 = int_to_ptr.vmem [resolvable:$true] %s1743_s18 }
 0x13a   : > { %s1768_s19 = sshll.u32 %s12255_s1, 4  ;;  %s11873_s26 = scalar_lea.vmem %s1744_s18, 16  ;;  %s1769_s19 = int_to_ptr.vmem [resolvable:$true] %s1768_s19 }
 0x13b   : > { %p11874_p6 = scmp.ne.s32.totalorder %s1744_s18, %s11873_s26  ;;  %s11880_s16 = scalar_lea.vmem %s1744_s18, 32 }
 0x13c   : > { %p11881_p8 = scmp.lt.s32.totalorder %s1744_s18, %s1744_s18  ;;  %p11882_p11 = scmp.lt.s32.totalorder %s11880_s16, %s11873_s26 }
 0x13d   : > { %p11876_p10 = pnand %p11874_p6, %p12676_p13 }
 0x13e   : > { %11176 = dma.hbm_to_vmem [thread:$0]  (!%p12668_p12), %s13840_s8, 16, %s1719_s23, [#allocation9]  }
 0x13f   : > { %p11877_p7 = pneg %p11876_p10  ;;  %p11883_p0 = por %p11882_p11, %p11881_p8 }
 0x141   : > { %p11884_p1 = pnand %p11883_p0, %p11877_p7 }
 0x143   : > { %11887 = shalt.err (!%p11884_p1)
}
 0x144   : > { %11182 = dma.hbm_to_vmem [thread:$0]  (!%p12668_p12), %s12499_s21, 16, %s1744_s18, [#allocation12]  }
 0x145   : > { %s11899_s23 = scalar_lea.vmem %s1769_s19, 16  ;;  %s11906_s3 = scalar_lea.vmem %s1769_s19, 32 }
 0x146   : > { %p11900_p2 = scmp.ne.s32.totalorder %s1769_s19, %s11899_s23  ;;  %p11907_p4 = scmp.lt.s32.totalorder %s1769_s19, %s1769_s19 }
 0x147   : > { %p11908_p5 = scmp.lt.s32.totalorder %s11906_s3, %s11899_s23 }
 0x148   : > { %p11902_p3 = pnand %p11900_p2, %p12676_p13 }
 0x149   : > { %p11909_p6 = por %p11908_p5, %p11907_p4 }
 0x14a   : > { %p11903_p9 = pneg %p11902_p3 }
 0x14c   : > { %p11910_p10 = pnand %p11909_p6, %p11903_p9 }
 0x14e   : > { %11913 = shalt.err (!%p11910_p10)
}
 0x14f   : > { %s13841_s0 = sld [smem:[#allocation91_spill]]  ;;  %s12256_s22 = smov [#allocation19]  }
 0x150   : > { %s1790_s1 = sshll.u32 %s12256_s22, 4  ;;  %s12257_s18 = smov [#allocation22]   ;;  %s1791_s1 = int_to_ptr.vmem [resolvable:$true] %s1790_s1 }
 0x151   : > { %s1812_s26 = sshll.u32 %s12257_s18, 4  ;;  %s11925_s16 = scalar_lea.vmem %s1791_s1, 16  ;;  %s1813_s26 = int_to_ptr.vmem [resolvable:$true] %s1812_s26 }
 0x152   : > { %p11926_p7 = scmp.ne.s32.totalorder %s1791_s1, %s11925_s16  ;;  %s11932_s4 = scalar_lea.vmem %s1791_s1, 32 }
 0x153   : > { %p11933_p0 = scmp.lt.s32.totalorder %s1791_s1, %s1791_s1  ;;  %p11934_p1 = scmp.lt.s32.totalorder %s11932_s4, %s11925_s16 }
 0x154   : > { %p11928_p8 = pnand %p11926_p7, %p12676_p13 }
 0x155   : > { %11188 = dma.hbm_to_vmem [thread:$0]  (!%p12668_p12), %s13841_s0, 16, %s1769_s19, [#allocation15]  }
 0x156   : > { %p11929_p11 = pneg %p11928_p8  ;;  %p11935_p2 = por %p11934_p1, %p11933_p0 }
 0x158   : > { %p11936_p3 = pnand %p11935_p2, %p11929_p11 }
 0x15a   : > { %11939 = shalt.err (!%p11936_p3)
}
 0x15b   : > { %s13842_s23 = sld [smem:[#allocation92_spill]]  ;;  %s11951_s19 = scalar_lea.vmem %s1813_s26, 16 }
 0x15c   : > { %p11952_p9 = scmp.ne.s32.totalorder %s1813_s26, %s11951_s19  ;;  %s11958_s3 = scalar_lea.vmem %s1813_s26, 32 }
 0x15d   : > { %p11959_p6 = scmp.lt.s32.totalorder %s1813_s26, %s1813_s26  ;;  %p11960_p10 = scmp.lt.s32.totalorder %s11958_s3, %s11951_s19 }
 0x15e   : > { %p11954_p4 = pnand %p11952_p9, %p12676_p13 }
 0x15f   : > { %p11961_p7 = por %p11960_p10, %p11959_p6 }
 0x160   : > { %p11955_p5 = pneg %p11954_p4 }
 0x161   : > { %11194 = dma.hbm_to_vmem [thread:$0]  (!%p12668_p12), %s13842_s23, 16, %s1791_s1, [#allocation18]  }
 0x162   : > { %p11962_p8 = pnand %p11961_p7, %p11955_p5 }
 0x164   : > { %11965 = shalt.err (!%p11962_p8)
}
 0x165   : > { %s13843_s4 = sld [smem:[#allocation93_spill]]  ;;  %s12258_s0 = smov [#allocation25]  }
 0x166   : > { %s1843_s22 = sshll.u32 %s12258_s0, 4  ;;  %s12259_s1 = smov [#allocation28]   ;;  %s1844_s22 = int_to_ptr.vmem [resolvable:$true] %s1843_s22 }
 0x167   : > { %s1868_s18 = sshll.u32 %s12259_s1, 4  ;;  %s11977_s16 = scalar_lea.vmem %s1844_s22, 16  ;;  %s1869_s18 = int_to_ptr.vmem [resolvable:$true] %s1868_s18 }
 0x168   : > { %p11978_p11 = scmp.ne.s32.totalorder %s1844_s22, %s11977_s16  ;;  %s11984_s23 = scalar_lea.vmem %s1844_s22, 32 }
 0x169   : > { %p11985_p2 = scmp.lt.s32.totalorder %s1844_s22, %s1844_s22  ;;  %p11986_p3 = scmp.lt.s32.totalorder %s11984_s23, %s11977_s16 }
 0x16a   : > { %p11980_p0 = pnand %p11978_p11, %p12676_p13 }
 0x16b   : > { %11200 = dma.hbm_to_vmem [thread:$0]  (!%p12668_p12), %s13843_s4, 16, %s1813_s26, [#allocation21]  }
 0x16c   : > { %p11981_p1 = pneg %p11980_p0  ;;  %p11987_p9 = por %p11986_p3, %p11985_p2 }
 0x16e   : > { %p11988_p4 = pnand %p11987_p9, %p11981_p1 }
 0x170   : > { %11991 = shalt.err (!%p11988_p4)
}
 0x171   : > { %s13844_s19 = sld [smem:[#allocation97_spill]]  ;;  %s12003_s26 = scalar_lea.vmem %s1869_s18, 16 }
 0x172   : > { %p12004_p5 = scmp.ne.s32.totalorder %s1869_s18, %s12003_s26  ;;  %s12010_s3 = scalar_lea.vmem %s1869_s18, 32 }
 0x173   : > { %p12011_p7 = scmp.lt.s32.totalorder %s1869_s18, %s1869_s18  ;;  %p12012_p8 = scmp.lt.s32.totalorder %s12010_s3, %s12003_s26 }
 0x174   : > { %p12006_p6 = pnand %p12004_p5, %p12676_p13 }
 0x175   : > { %p12013_p11 = por %p12012_p8, %p12011_p7 }
 0x176   : > { %p12007_p10 = pneg %p12006_p6 }
 0x177   : > { %11206 = dma.hbm_to_vmem [thread:$0]  (!%p12668_p12), %s13844_s19, 16, %s1844_s22, [#allocation24]  }
 0x178   : > { %p12014_p0 = pnand %p12013_p11, %p12007_p10 }
 0x17a   : > { %12017 = shalt.err (!%p12014_p0)
}
 0x17b   : > { %s13845_s4 = sld [smem:[#allocation100_spill]]  ;;  %s12260_s0 = smov [#allocation31]  }
 0x17c   : > { %s1890_s1 = sshll.u32 %s12260_s0, 4  ;;  %s12261_s22 = smov [#allocation34]   ;;  %s1891_s1 = int_to_ptr.vmem [resolvable:$true] %s1890_s1 }
 0x17d   : > { %s1912_s16 = sshll.u32 %s12261_s22, 4  ;;  %s12029_s23 = scalar_lea.vmem %s1891_s1, 16  ;;  %s1913_s16 = int_to_ptr.vmem [resolvable:$true] %s1912_s16 }
 0x17e   : > { %p12030_p1 = scmp.ne.s32.totalorder %s1891_s1, %s12029_s23  ;;  %s12036_s19 = scalar_lea.vmem %s1891_s1, 32 }
 0x17f   : > { %p12037_p9 = scmp.lt.s32.totalorder %s1891_s1, %s1891_s1  ;;  %p12038_p4 = scmp.lt.s32.totalorder %s12036_s19, %s12029_s23 }
 0x180   : > { %p12032_p2 = pnand %p12030_p1, %p12676_p13 }
 0x181   : > { %11212 = dma.hbm_to_vmem [thread:$0]  (!%p12668_p12), %s13845_s4, 16, %s1869_s18, [#allocation27]  }
 0x182   : > { %p12033_p3 = pneg %p12032_p2  ;;  %p12039_p5 = por %p12038_p4, %p12037_p9 }
 0x184   : > { %p12040_p6 = pnand %p12039_p5, %p12033_p3 }
 0x186   : > { %12043 = shalt.err (!%p12040_p6)
}
 0x187   : > { %s13846_s26 = sld [smem:[#allocation102_spill]]  ;;  %s12055_s18 = scalar_lea.vmem %s1913_s16, 16 }
 0x188   : > { %p12056_p10 = scmp.ne.s32.totalorder %s1913_s16, %s12055_s18  ;;  %s12062_s3 = scalar_lea.vmem %s1913_s16, 32 }
 0x189   : > { %p12063_p11 = scmp.lt.s32.totalorder %s1913_s16, %s1913_s16  ;;  %p12064_p0 = scmp.lt.s32.totalorder %s12062_s3, %s12055_s18 }
 0x18a   : > { %p12058_p7 = pnand %p12056_p10, %p12676_p13 }
 0x18b   : > { %p12065_p1 = por %p12064_p0, %p12063_p11 }
 0x18c   : > { %p12059_p8 = pneg %p12058_p7 }
 0x18d   : > { %11218 = dma.hbm_to_vmem [thread:$0]  (!%p12668_p12), %s13846_s26, 16, %s1891_s1, [#allocation30]  }
 0x18e   : > { %p12066_p2 = pnand %p12065_p1, %p12059_p8 }
 0x190   : > { %12069 = shalt.err (!%p12066_p2)
}
 0x191   : > { %s13847_s12 = sld [smem:[#allocation103_spill]]  ;;  %p13848_p3 = scmp.ne.s32.totalorder %s13831_s2, 0 }
 0x192   : > { %p13849_p9 = scmp.eq.s32.totalorder (!%p13848_p3), %s12632_s15, 0 }
 0x193   : > { %1938 = sbr.rel (%p13848_p3) target bundleno = 19309 (0x4b6d), region = 280 }
 0x197   : > { %11224 = dma.hbm_to_vmem [thread:$0]  (!%p12668_p12), %s13847_s12, 16, %s1913_s16, [#allocation33]  }
 0x198   : > { %12113 = dma.done.wait (%p13849_p9), [#allocation3], 16   ;;  %p13850_p4 = pmov %p13849_p9 }
 0x19a   : > { %12115 = vsyncadd (%p13850_p4), [#allocation3], 4294967280  ;;  %p13851_p13 = pmov %p13850_p4 }
 0x19b   : > { %p13852_p5 = pmov %p13850_p4 }
 0x19c   : > { %12117 = dma.done.wait (%p13851_p13), [#allocation6], 32  }
 0x19d   : > { %12119 = vsyncadd (%p13852_p5), [#allocation6], 4294967264  ;;  %p13853_p6 = pmov %p13850_p4 }
 0x19e   : > { %p13854_p12 = pmov %p13850_p4 }
 0x19f   : > { %12121 = dma.done.wait (%p13853_p6), [#allocation9], 32  }
 0x1a0   : > { %12123 = vsyncadd (%p13854_p12), [#allocation9], 4294967264  ;;  %p13855_p10 = pmov %p13850_p4 }
 0x1a1   : > { %p13856_p7 = pmov %p13850_p4 }
 0x1a2   : > { %12125 = dma.done.wait (%p13855_p10), [#allocation12], 32  }
 0x1a3   : > { %12127 = vsyncadd (%p13856_p7), [#allocation12], 4294967264  ;;  %p13857_p8 = pmov %p13850_p4 }
 0x1a4   : > { %p13858_p11 = pmov %p13850_p4 }
 0x1a5   : > { %12129 = dma.done.wait (%p13857_p8), [#allocation15], 32  }
 0x1a6   : > { %12131 = vsyncadd (%p13858_p11), [#allocation15], 4294967264  ;;  %p13859_p0 = pmov %p13850_p4 }
 0x1a8   : > { %12133 = dma.done.wait (%p13859_p0), [#allocation18], 32   ;;  %p13860_p1 = pmov %p13859_p0 }
 0x1a9   : > { %p13861_p2 = pmov %p13859_p0 }
 0x1aa   : > { %12135 = vsyncadd (%p13860_p1), [#allocation18], 4294967264 }
 0x1ab   : > { %12137 = dma.done.wait (%p13861_p2), [#allocation21], 32   ;;  %p13862_p3 = pmov %p13859_p0 }
 0x1ac   : > { %p13863_p9 = pmov %p13859_p0 }
 0x1ad   : > { %12139 = vsyncadd (%p13862_p3), [#allocation21], 4294967264 }
 0x1ae   : > { %12141 = dma.done.wait (%p13863_p9), [#allocation24], 32   ;;  %p13864_p4 = pmov %p13859_p0 }
 0x1af   : > { %p13865_p13 = pmov %p13859_p0 }
 0x1b0   : > { %12143 = vsyncadd (%p13864_p4), [#allocation24], 4294967264 }
 0x1b1   : > { %12145 = dma.done.wait (%p13865_p13), [#allocation27], 32   ;;  %p13866_p5 = pmov %p13859_p0 }
 0x1b2   : > { %p13867_p6 = pmov %p13859_p0 }
 0x1b3   : > { %12147 = vsyncadd (%p13866_p5), [#allocation27], 4294967264 }
 0x1b4   : > { %12149 = dma.done.wait (%p13867_p6), [#allocation30], 32   ;;  %p13868_p12 = pmov %p13859_p0 }
 0x1b5   : > { %p13869_p10 = pmov %p13859_p0 }
 0x1b6   : > { %12151 = vsyncadd (%p13868_p12), [#allocation30], 4294967264 }
 0x1b7   : > { %12153 = dma.done.wait (%p13869_p10), [#allocation33], 32   ;;  %p13870_p7 = pmov %p13859_p0 }
 0x1b8   : > { %s13871_s7 = sld [smem:[#allocation94_spill]]  ;;  %p2165_p8 = scmp.lt.s32.totalorder %s12632_s15, 1  ;;  %v12262_v0 = vmov 0.0   ;;  %vm12263_vm0 = vmmov 0   ;;  %vm2316_vm1 = vcmask 261120   ;;  %vm2393_vm2 = vcmask 64512  }
 0x1b9   : > { %12155 = vsyncadd (%p13870_p7), [#allocation33], 4294967264  ;;  %s13873_s11 = sld [smem:[#allocation48_spill]]  ;;  %10507 = vmatprep.subr.mxu0 %v12262_v0  ;;  %10515 = vmatprep.mubr.msk.f32.mxu0 %vm12263_vm0, %v12262_v0  ;;  %v10107_v6 = vld [vmem:[#allocation20] ss:$0 sm:$0xff]  ;;  %s13745_s22 = smov 120  }
 0x1ba   : > { %s2166_s4 = scalar_select %p2165_p8, %s12632_s15, 1  ;;  %10523 = vmatprep.subr.mxu1 %v12262_v0  ;;  %10525 = vmatprep.mubr.msk.f32.mxu1 %vm12263_vm0, %v12262_v0  ;;  %vm3470_vm3 = vcmask 523264  }
 0x1bb   : > { %s13747_s16 = smov 96   ;;  %s13749_s23 = smov 88  }
 0x1bc   : > { %s10106_s0 = sshll.u32 %s2166_s4, 3  ;;  %s13741_s19 = smov 56  }
 0x1bd   : > { %s13737_s26 = smov 64   ;;  %s13733_s18 = smov 80  }
 0x1be   : > { %s13872_s2 = smov %s13871_s7  ;;  %v2276_v1 = vld [vmem:[%s13871_s7 + $0x18] sm:$0xff]  ;;  %s13739_s3 = smov 112  }
 0x1bf   : > { %v2275_v2 = vld [vmem:[%s13872_s2 + $0x10] sm:$0xff]  ;;  %10508 = vmatpush3.msra.mxu0 %v2276_v1  ;;  %v2274_v3 = vld [vmem:[%s13872_s2 + $0x8] sm:$0xff]  ;;  %s12850_s1 = scalar_lea.vmem %s13873_s11, %s10106_s0  ;;  %v2273_v4 = vld [vmem:[%s13872_s2] sm:$0xff]  ;;  %s13874_s7 = sld [smem:[#allocation95_spill]] }
 0x1c0   : > { %10509 = vmatprep.subr.mxu0 %v12262_v0  ;;  %v12855_v5 = vld [vmem:[%s12850_s1] sm:$0xff]  ;;  %s13729_s11 = smov 72   ;;  %s13735_s0 = smov 104  }
 0x1c1   : > { %10510 = vmatpush3.msra.mxu0 %v2275_v2  ;;  %s13888_s2 = sld [smem:[#allocation65_spill]]  ;;  %s13890_s5 = smov 96  }
 0x1c2   : > { %10511 = vmatprep.subr.mxu0 %v12262_v0  ;;  %s13891_s6 = smov 120   ;;  %s13893_s8 = smov 112  }
 0x1c3   : > { %10512 = vmatpush3.msra.mxu0 %v2274_v3  ;;  %s13895_s12 = smov 48   ;;  %s13906_s14 = sld [smem:[#allocation61_spill]] }
 0x1c4   : > { %10513 = vmatprep.subr.mxu0 %v12262_v0  ;;  %p13928_p0 = scmp.ne.s32.totalorder %s13828_s28, 0 }
 0x1c5   : > { %10514 = vmatpush3.msra.mxu0 %v2273_v4  ;;  %s13875_s4 = smov %s13874_s7  ;;  %v2277_v39 = vld [vmem:[%s13874_s7] sm:$0xff]  ;;  %s13743_s7 = smov 48  }
 0x1c6   : > { %10516 = vmatmul.mubr.msk.f32.vlgmr.msra.gmra.mxu0 %vm2316_vm1, %v12855_v5  ;;  %10518 = vmatprep.subr.mxu0 %v12262_v0  ;;  %v2278_v40 = vld [vmem:[%s13875_s4 + $0x8] sm:$0xff]  ;;  %v2279_v4 = vld [vmem:[%s13875_s4 + $0x10] sm:$0xff] }
 0x1c7   : > { %10520 = vmatprep.mubr.msk.f32.mxu0 %vm12263_vm0, %v12262_v0 }
 0x286   : > { %v2386_v7 = vpop.f32.mrf.mxu0 }
 0x287   : > { %v12863_v8 = vadd.f32 %v10107_v6, %v2386_v7 }
 0x288   : > { %v10517_v9 = vpop.f32.mrf.mxu0 }
 0x289   : > { %2556 = vrot.lane.b32.xlu1 %v12863_v8, %s13745_s22  ;;  %2391 = vrot.lane.b32.xlu0 %v12863_v8, %s13747_s16 }
 0x28d   : > { %2558 = vrot.lane.b32.xlu0 %v12863_v8, %s13749_s23 }
 0x2fb   : > { %v2392_v10 = vpop.permute.xlu0 %2391  ;;  %v2557_v12 = vpop.permute.xlu1 %2556 }
 0x2fc   : > { %10519 = vmatpush3.xpose.msk.msra.mxu0 %vm2393_vm2, %v2392_v10 }
 0x2fd   : > { %10528 = vmatprep.subr.mxu0 %v12262_v0 }
 0x2ff   : > { %10521 = vmatmul.mubr.msk.f32.vlgmr.msra.gmra.mxu0 %vm2393_vm2, %v12863_v8  ;;  %v2559_v11 = vpop.permute.xlu0 %2558 }
 0x300   : > { %10529 = vmatpush3.xpose.msk.msra.mxu0 %vm2393_vm2, %v2559_v11  ;;  %10530 = vmatprep.mubr.msk.f32.mxu0 %vm12263_vm0, %v12262_v0 }
 0x301   : > { %10538 = vmatprep.subr.mxu0 %v12262_v0 }
 0x303   : > { %10531 = vmatmul.mubr.msk.f32.vlgmr.msra.gmra.mxu0 %vm2393_vm2, %v2557_v12 }
 0x304   : > { %10540 = vmatprep.mubr.msk.f32.mxu0 %vm12263_vm0, %v12262_v0  ;;  %10539 = vmatpush3.msra.mxu0 %v2278_v40 }
 0x305   : > { %10548 = vmatprep.subr.mxu0 %v12262_v0 }
 0x3bf   : > { %v2464_v13 = vpop.f32.mrf.mxu0 }
 0x3c0   : > { %v2468_v14 = vmul.f32 0.35355338, %v2464_v13 }
 0x3c1   : > { %v10522_v15 = vpop.f32.mrf.mxu0 }
 0x3c2   : > { %v2469_v16 = vsel %vm2393_vm2, %v2468_v14, -inf }
 0x3c3   : > { %2470 = vmax.xlane.f32.xlu1 %v2469_v16  ;;  %v2630_v17 = vpop.f32.mrf.mxu0 }
 0x3c4   : > { %v2634_v18 = vmul.f32 0.35355338, %v2630_v17 }
 0x3c5   : > { %v10532_v19 = vpop.f32.mrf.mxu0 }
 0x3c6   : > { %v2635_v20 = vsel %vm2393_vm2, %v2634_v18, -inf  ;;  %v2280_v19 = vld [vmem:[%s13875_s4 + $0x18] sm:$0xff]  ;;  %s13889_s4 = smov 88  }
 0x3c7   : > { %2636 = vmax.xlane.f32.xlu0 %v2635_v20 }
 0x44c   : > { %v2471_v21 = vpop.xlane.xlu1 %2470 }
 0x44d   : > { %v2472_v22 = vsub.f32 %v2468_v14, %v2471_v21 }
 0x44f   : > { %v2473_v23 = vmul.f32 1.442695, %v2472_v22 }
 0x450   : > { %v2637_v24 = vpop.xlane.xlu0 %2636 }
 0x451   : > { %11403 = vpow2.f32 %v2473_v23  ;;  %v2638_v25 = vsub.f32 %v2634_v18, %v2637_v24 }
 0x453   : > { %v2639_v26 = vmul.f32 1.442695, %v2638_v25 }
 0x455   : > { %11405 = vpow2.f32 %v2639_v26 }
 0x45e   : > { %v11404_v27 = vpop.eup %11403 }
 0x45f   : > { %v2475_v28 = vsel %vm2393_vm2, %v11404_v27, 0.0 }
 0x460   : > { %2476 = vadd.xlane.f32.xlu0 %v2475_v28 }
 0x462   : > { %v11406_v29 = vpop.eup %11405 }
 0x463   : > { %v2641_v30 = vsel %vm2393_vm2, %v11406_v29, 0.0 }
 0x464   : > { %2642 = vadd.xlane.f32.xlu1 %v2641_v30 }
 0x475   : > { %2646 = vrot.lane.b32.xlu1 %v12863_v8, %s13741_s19 }
 0x476   : > { %2480 = vrot.lane.b32.xlu0 %v12863_v8, %s13737_s26 }
 0x479   : > { %2870 = vrot.lane.b32.xlu1 %v12863_v8, %s13733_s18 }
 0x47a   : > { %2868 = vrot.lane.b32.xlu0 %v12863_v8, %s13739_s3 }
 0x4e9   : > { %v2477_v31 = vpop.xlane.xlu0 %2476 }
 0x4ea   : > { %11407 = vrcp.f32 %v2477_v31 }
 0x4ed   : > { %v2643_v32 = vpop.xlane.xlu1 %2642  ;;  %v2481_v33 = vpop.permute.xlu0 %2480 }
 0x4ee   : > { %11409 = vrcp.f32 %v2643_v32  ;;  %10524 = vmatpush3.msra.mxu1 %v2481_v33 }
 0x4ef   : > { %10533 = vmatprep.subr.mxu1 %v12262_v0 }
 0x4f1   : > { %v2647_v36 = vpop.permute.xlu1 %2646  ;;  %v2869_v46 = vpop.permute.xlu0 %2868 }
 0x4f5   : > { %v2871_v44 = vpop.permute.xlu1 %2870 }
 0x4f7   : > { %v11408_v34 = vpop.eup %11407 }
 0x4f8   : > { %v2479_v35 = vmul.f32 %v11408_v34, %v11404_v27  ;;  %v10125_v27 = vld [vmem:[#allocation22] ss:$0 sm:$0xff] }
 0x4fa   : > { %10526 = vmatmul.mubr.msk.f32.vlgmr.msra.gmra.mxu1 %vm2393_vm2, %v2479_v35 }
 0x4fb   : > { %v11410_v37 = vpop.eup %11409  ;;  %10534 = vmatpush3.msra.mxu1 %v2647_v36  ;;  %10535 = vmatprep.mubr.msk.f32.mxu1 %vm12263_vm0, %v12262_v0 }
 0x4fc   : > { %v2645_v38 = vmul.f32 %v11410_v37, %v11406_v29  ;;  %10543 = vmatprep.subr.mxu1 %v12262_v0 }
 0x4fe   : > { %10536 = vmatmul.mubr.msk.f32.vlgmr.msra.gmra.mxu1 %vm2393_vm2, %v2645_v38 }
 0x4ff   : > { %10545 = vmatprep.mubr.msk.f32.mxu1 %vm12263_vm0, %v12262_v0  ;;  %10544 = vmatpush3.msra.mxu1 %v2277_v39 }
 0x500   : > { %10553 = vmatprep.subr.mxu1 %v12262_v0 }
 0x5ba   : > { %v2552_v41 = vpop.f32.mrf.mxu1 }
 0x5bb   : > { %10546 = vmatmul.mubr.msk.f32.vlgmr.msra.gmra.mxu1 %vm2393_vm2, %v2552_v41 }
 0x5bc   : > { %v10527_v42 = vpop.f32.mrf.mxu1  ;;  %10555 = vmatprep.mubr.msk.f32.mxu1 %vm12263_vm0, %v12262_v0 }
 0x5be   : > { %v2718_v43 = vpop.f32.mrf.mxu1 }
 0x5bf   : > { %10541 = vmatmul.mubr.msk.f32.vlgmr.msra.gmra.mxu0 %vm2393_vm2, %v2718_v43 }
 0x5c0   : > { %10549 = vmatpush3.xpose.msk.msra.mxu0 %vm2393_vm2, %v2871_v44  ;;  %v10537_v45 = vpop.f32.mrf.mxu1  ;;  %10550 = vmatprep.mubr.msk.f32.mxu0 %vm12263_vm0, %v12262_v0 }
 0x5c1   : > { %10558 = vmatprep.subr.mxu0 %v12262_v0 }
 0x5c3   : > { %10551 = vmatmul.mubr.msk.f32.vlgmr.msra.gmra.mxu0 %vm2393_vm2, %v2869_v46 }
 0x5c4   : > { %10560 = vmatprep.mubr.msk.f32.mxu0 %vm12263_vm0, %v12262_v0  ;;  %10559 = vmatpush3.msra.mxu0 %v2279_v4 }
 0x5c5   : > { %10568 = vmatprep.subr.mxu0 %v12262_v0 }
 0x67b   : > { %v2864_v47 = vpop.f32.mrf.mxu1 }
 0x67d   : > { %v10547_v48 = vpop.f32.mrf.mxu1 }
 0x67f   : > { %v2791_v49 = vpop.f32.mrf.mxu0 }
 0x680   : > { %v12917_v50 = vadd.f32 %v2864_v47, %v2791_v49 }
 0x681   : > { %v10542_v51 = vpop.f32.mrf.mxu0 }
 0x683   : > { %v2942_v52 = vpop.f32.mrf.mxu0 }
 0x684   : > { %v2946_v53 = vmul.f32 0.35355338, %v2942_v52  ;;  %v10126_v52 = vld [vmem:[#allocation16] ss:$0 sm:$0xff] }
 0x685   : > { %v10552_v54 = vpop.f32.mrf.mxu0 }
 0x686   : > { %v2947_v55 = vsel %vm2393_vm2, %v2946_v53, -inf  ;;  %v10127_v54 = vld [vmem:[#allocation14] ss:$0 sm:$0xff] }
 0x687   : > { %2948 = vmax.xlane.f32.xlu1 %v2947_v55 }
 0x698   : > { %3110 = vrot.lane.b32.xlu1 %v12863_v8, %s13729_s11  ;;  %s13731_s11 = smov 40  }
 0x69c   : > { %3108 = vrot.lane.b32.xlu1 %v12863_v8, %s13735_s0  ;;  %s13878_s0 = sld [smem:[#allocation90_spill]] }
 0x6a2   : > { %s13879_s26 = smov %s13878_s0  ;;  %v2266_v43 = vld [vmem:[%s13878_s0 + $0x38] sm:$0xff]  ;;  %s13881_s0 = smov 80  }
 0x6a3   : > { %v2265_v44 = vld [vmem:[%s13879_s26 + $0x30] sm:$0xff]  ;;  %v2264_v45 = vld [vmem:[%s13879_s26 + $0x28] sm:$0xff]  ;;  %v2263_v46 = vld [vmem:[%s13879_s26 + $0x20] sm:$0xff] }
 0x6a4   : > { %v2262_v47 = vld [vmem:[%s13879_s26 + $0x18] sm:$0xff] }
 0x710   : > { %v2949_v56 = vpop.xlane.xlu1 %2948 }
 0x711   : > { %v2950_v57 = vsub.f32 %v2946_v53, %v2949_v56 }
 0x713   : > { %v2951_v58 = vmul.f32 1.442695, %v2950_v57  ;;  %v2261_v57 = vld [vmem:[%s13879_s26 + $0x10] sm:$0xff] }
 0x714   : > { %v3111_v1 = vpop.permute.xlu1 %3110 }
 0x715   : > { %11411 = vpow2.f32 %v2951_v58  ;;  %v2260_v58 = vld [vmem:[%s13879_s26 + $0x8] sm:$0xff] }
 0x718   : > { %v3109_v3 = vpop.permute.xlu1 %3108 }
 0x722   : > { %v11412_v59 = vpop.eup %11411 }
 0x723   : > { %v2953_v60 = vsel %vm2393_vm2, %v11412_v59, 0.0 }
 0x724   : > { %2954 = vadd.xlane.f32.xlu0 %v2953_v60  ;;  %v10128_v60 = vld [vmem:[#allocation11] ss:$0 sm:$0xff] }
 0x73a   : > { %2958 = vrot.lane.b32.xlu0 %v12863_v8, %s13743_s7 }
 0x7ad   : > { %v2955_v61 = vpop.xlane.xlu0 %2954 }
 0x7ae   : > { %11413 = vrcp.f32 %v2955_v61 }
 0x7b1   : > { %v2959_v62 = vpop.permute.xlu0 %2958 }
 0x7b2   : > { %10554 = vmatpush3.msra.mxu1 %v2959_v62 }
 0x7b3   : > { %10563 = vmatprep.subr.mxu1 %v12262_v0 }
 0x7bb   : > { %v11414_v63 = vpop.eup %11413 }
 0x7bc   : > { %v2957_v2 = vmul.f32 %v11414_v63, %v11412_v59  ;;  %v2259_v59 = vld [vmem:[%s13879_s26] sm:$0xff] }
 0x7be   : > { %10556 = vmatmul.mubr.msk.f32.vlgmr.msra.gmra.mxu1 %vm2393_vm2, %v2957_v2  ;;  %v10130_v2 = vld [vmem:[#allocation13] ss:$0 sm:$0xff] }
 0x7bf   : > { %10564 = vmatpush3.xpose.msk.msra.mxu1 %vm2393_vm2, %v3111_v1  ;;  %10565 = vmatprep.mubr.msk.f32.mxu1 %vm12263_vm0, %v12262_v0 }
 0x7c0   : > { %10573 = vmatprep.subr.mxu1 %v12262_v0 }
 0x7c2   : > { %10566 = vmatmul.mubr.msk.f32.vlgmr.msra.gmra.mxu1 %vm2393_vm2, %v3109_v3 }
 0x7c3   : > { %10575 = vmatprep.mubr.msk.f32.mxu1 %vm12263_vm0, %v12262_v0  ;;  %10574 = vmatpush3.msra.mxu1 %v2280_v19 }
 0x7c4   : > { %10589 = vmatprep.subr.mxu1 %v12262_v0 }
 0x87e   : > { %v3030_v6 = vpop.f32.mrf.mxu1 }
 0x87f   : > { %10561 = vmatmul.mubr.msk.f32.vlgmr.msra.gmra.mxu0 %vm2393_vm2, %v3030_v6 }
 0x880   : > { %v10557_v7 = vpop.f32.mrf.mxu1  ;;  %10570 = vmatprep.mubr.msk.f32.mxu0 %vm12263_vm0, %v12262_v0 }
 0x882   : > { %v3182_v9 = vpop.f32.mrf.mxu1 }
 0x883   : > { %v3186_v10 = vmul.f32 0.35355338, %v3182_v9 }
 0x884   : > { %v10567_v11 = vpop.f32.mrf.mxu1 }
 0x885   : > { %v3187_v12 = vsel %vm2393_vm2, %v3186_v10, -inf }
 0x886   : > { %3188 = vmax.xlane.f32.xlu0 %v3187_v12 }
 0x89c   : > { %3198 = vrot.lane.b32.xlu0 %v12863_v8, %s13731_s11  ;;  %s13876_s11 = sld [smem:[#allocation89_spill]] }
 0x8a2   : > { %s13877_s18 = smov %s13876_s11  ;;  %v2257_v39 = vld [vmem:[%s13876_s11 + $0x18] sm:$0xff]  ;;  %s13880_s11 = smov 64  }
 0x8a3   : > { %v2256_v40 = vld [vmem:[%s13877_s18 + $0x10] sm:$0xff]  ;;  %v2255_v41 = vld [vmem:[%s13877_s18 + $0x8] sm:$0xff]  ;;  %v2254_v42 = vld [vmem:[%s13877_s18] sm:$0xff] }
 0x90f   : > { %v3189_v13 = vpop.xlane.xlu0 %3188 }
 0x910   : > { %v3190_v14 = vsub.f32 %v3186_v10, %v3189_v13 }
 0x912   : > { %v3191_v15 = vmul.f32 1.442695, %v3190_v14 }
 0x913   : > { %v3199_v16 = vpop.permute.xlu0 %3198 }
 0x914   : > { %11415 = vpow2.f32 %v3191_v15  ;;  %10569 = vmatpush3.msra.mxu0 %v3199_v16  ;;  %v2304_v15 = vld [vmem:[%s13822_s9 + $0x18] sm:$0xff]  ;;  %v2303_v16 = vld [vmem:[%s13822_s9 + $0x10] sm:$0xff] }
 0x915   : > { %10578 = vmatprep.subr.mxu0 %v12262_v0 }
 0x921   : > { %v11416_v17 = vpop.eup %11415 }
 0x922   : > { %v3193_v18 = vsel %vm2393_vm2, %v11416_v17, 0.0 }
 0x923   : > { %3194 = vadd.xlane.f32.xlu1 %v3193_v18  ;;  %v2301_v18 = vld [vmem:[%s13822_s9] sm:$0xff] }
 0x93f   : > { %v3103_v20 = vpop.f32.mrf.mxu0 }
 0x940   : > { %v3107_v21 = vadd.f32 %v3103_v20, %v12917_v50 }
 0x941   : > { %v10562_v8 = vpop.f32.mrf.mxu0 }
 0x9ac   : > { %v3195_v22 = vpop.xlane.xlu1 %3194 }
 0x9ad   : > { %11417 = vrcp.f32 %v3195_v22  ;;  %v10132_v22 = vld [vmem:[#allocation19] ss:$0 sm:$0xff] }
 0x9ba   : > { %v11418_v23 = vpop.eup %11417 }
 0x9bb   : > { %v3197_v24 = vmul.f32 %v11418_v23, %v11416_v17  ;;  %v2302_v17 = vld [vmem:[%s13822_s9 + $0x8] sm:$0xff]  ;;  %s13894_s9 = sld [smem:[#allocation68_spill]] }
 0x9bd   : > { %10571 = vmatmul.mubr.msk.f32.vlgmr.msra.gmra.mxu0 %vm2393_vm2, %v3197_v24  ;;  %v10133_v24 = vld [vmem:[#allocation17] ss:$0 sm:$0xff] }
 0x9be   : > { %10586 = vmatprep.mubr.msk.f32.mxu0 %vm12263_vm0, %v12262_v0  ;;  %10579 = vmatpush3.msra.mxu0 %v2257_v39 }
 0x9bf   : > { %10580 = vmatprep.subr.mxu0 %v12262_v0 }
 0x9c0   : > { %10581 = vmatpush3.msra.mxu0 %v2256_v40 }
 0x9c1   : > { %10582 = vmatprep.subr.mxu0 %v12262_v0 }
 0x9c2   : > { %10583 = vmatpush3.msra.mxu0 %v2255_v41 }
 0x9c3   : > { %10584 = vmatprep.subr.mxu0 %v12262_v0 }
 0x9c4   : > { %10585 = vmatpush3.msra.mxu0 %v2254_v42 }
 0x9c5   : > { %10608 = vmatprep.subr.mxu0 %v12262_v0 }
 0xa7d   : > { %v3270_v25 = vpop.f32.mrf.mxu0 }
 0xa7e   : > { %10576 = vmatmul.mubr.msk.f32.vlgmr.msra.gmra.mxu1 %vm2393_vm2, %v3270_v25 }
 0xa7f   : > { %v10572_v26 = vpop.f32.mrf.mxu0  ;;  %10605 = vmatprep.mubr.msk.f32.mxu1 %vm12263_vm0, %v12262_v0  ;;  %10590 = vmatpush3.msra.mxu1 %v2266_v43 }
 0xa80   : > { %10591 = vmatprep.subr.mxu1 %v12262_v0 }
 0xa81   : > { %10592 = vmatpush3.msra.mxu1 %v2265_v44 }
 0xa82   : > { %10593 = vmatprep.subr.mxu1 %v12262_v0 }
 0xa83   : > { %10594 = vmatpush3.msra.mxu1 %v2264_v45 }
 0xa84   : > { %10595 = vmatprep.subr.mxu1 %v12262_v0 }
 0xa85   : > { %10596 = vmatpush3.msra.mxu1 %v2263_v46 }
 0xa86   : > { %10597 = vmatprep.subr.mxu1 %v12262_v0 }
 0xa87   : > { %10598 = vmatpush3.msra.mxu1 %v2262_v47 }
 0xa88   : > { %10599 = vmatprep.subr.mxu1 %v12262_v0 }
 0xa89   : > { %10600 = vmatpush3.msra.mxu1 %v2261_v57 }
 0xa8a   : > { %10601 = vmatprep.subr.mxu1 %v12262_v0 }
 0xa8b   : > { %10602 = vmatpush3.msra.mxu1 %v2260_v58 }
 0xa8c   : > { %10603 = vmatprep.subr.mxu1 %v12262_v0 }
 0xa8d   : > { %10604 = vmatpush3.msra.mxu1 %v2259_v59 }
 0xa8e   : > { %10624 = vmatprep.subr.mxu1 %v12262_v0 }
 0xb3e   : > { %v3343_v28 = vpop.f32.mrf.mxu1 }
 0xb3f   : > { %v3347_v29 = vadd.f32 %v3343_v28, %v3107_v21 }
 0xb40   : > { %v10577_v30 = vpop.f32.mrf.mxu1 }
 0xb41   : > { %v3354_v31 = vadd.f32 %v10125_v27, %v3347_v29  ;;  %v10134_v27 = vld [vmem:[#allocation32] ss:$0 sm:$0xff] }
 0xb43   : > { %v3355_v32 = vadd.f32 %v3354_v31, %v12855_v5 }
 0xb45   : > { %v3356_v33 = vsel %vm2316_vm1, %v3355_v32, 0.0 }
 0xb46   : > { %3357 = vadd.xlane.f32.xlu1 %v3356_v33 }
 0xbcf   : > { %v3358_v34 = vpop.xlane.xlu1 %3357 }
 0xbd0   : > { %v3360_v35 = vmul.f32 0.03125, %v3358_v34 }
 0xbd2   : > { %v3361_v36 = vsub.f32 %v3355_v32, %v3360_v35 }
 0xbd4   : > { %v3362_v37 = vmul.f32 %v3361_v36, %v3361_v36 }
 0xbd6   : > { %v3363_v38 = vsel %vm2316_vm1, %v3362_v37, 0.0 }
 0xbd7   : > { %3364 = vadd.xlane.f32.xlu1 %v3363_v38 }
 0xc60   : > { %v3365_v48 = vpop.xlane.xlu1 %3364 }
 0xc61   : > { %v3366_v49 = vmul.f32 0.03125, %v3365_v48 }
 0xc63   : > { %v3367_v50 = vadd.f32 1e-05, %v3366_v49 }
 0xc65   : > { %11419 = vrsqrt.f32 %v3367_v50 }
 0xc72   : > { %v11420_v51 = vpop.eup %11419 }
 0xc73   : > { %v3369_v53 = vmul.f32 %v11420_v51, %v3361_v36 }
 0xc75   : > { %v3376_v55 = vmul.f32 %v10126_v52, %v3369_v53 }
 0xc77   : > { %v3383_v56 = vadd.f32 %v10127_v54, %v3376_v55 }
 0xc79   : > { %10587 = vmatmul.mubr.msk.f32.vlgmr.msra.gmra.mxu0 %vm2316_vm1, %v3383_v56 }
 0xc7a   : > { %10616 = vmatprep.mubr.msk.f32.mxu0 %vm12263_vm0, %v12262_v0  ;;  %10609 = vmatpush3.msra.mxu0 %v2304_v15 }
 0xc7b   : > { %10610 = vmatprep.subr.mxu0 %v12262_v0 }
 0xc7c   : > { %10611 = vmatpush3.msra.mxu0 %v2303_v16 }
 0xc7d   : > { %10612 = vmatprep.subr.mxu0 %v12262_v0 }
 0xc7e   : > { %10613 = vmatpush3.msra.mxu0 %v2302_v17 }
 0xc7f   : > { %10614 = vmatprep.subr.mxu0 %v12262_v0 }
 0xc80   : > { %10615 = vmatpush3.msra.mxu0 %v2301_v18 }
 0xc81   : > { %10619 = vmatprep.subr.mxu0 %v12262_v0 }
 0xd39   : > { %v3459_v61 = vpop.f32.mrf.mxu0 }
 0xd3a   : > { %v3460_v62 = vadd.f32 %v10128_v60, %v3459_v61  ;;  %v2305_v60 = vld [vmem:[%s13821_s13] sm:$0xff]  ;;  %v2306_v61 = vld [vmem:[%s13821_s13 + $0x8] sm:$0xff] }
 0xd3b   : > { %v10588_v63 = vpop.f32.mrf.mxu0 }
 0xd3c   : > { %v3463_v1 = vmax.f32 %v3460_v62, 0.0 }
 0xd3e   : > { %10606 = vmatmul.mubr.msk.f32.vlgmr.msra.gmra.mxu1 %vm3470_vm3, %v3463_v1 }
 0xd3f   : > { %10626 = vmatprep.mubr.msk.f32.mxu1 %vm12263_vm0, %v12262_v0 }
 0xdfe   : > { %v3540_v3 = vpop.f32.mrf.mxu1 }
 0xdff   : > { %v3541_v4 = vadd.f32 %v10130_v2, %v3540_v3 }
 0xe00   : > { %v10607_v6 = vpop.f32.mrf.mxu1 }
 0xe01   : > { %v3544_v7 = vadd.f32 %v3541_v4, %v3383_v56 }
 0xe03   : > { %v3545_v9 = vsel %vm2316_vm1, %v3544_v7, 0.0 }
 0xe04   : > { %3546 = vadd.xlane.f32.xlu1 %v3545_v9 }
 0xe8d   : > { %v3547_v10 = vpop.xlane.xlu1 %3546 }
 0xe8e   : > { %v3548_v11 = vmul.f32 0.03125, %v3547_v10 }
 0xe90   : > { %v3549_v12 = vsub.f32 %v3544_v7, %v3548_v11 }
 0xe92   : > { %v3550_v13 = vmul.f32 %v3549_v12, %v3549_v12 }
 0xe94   : > { %v3551_v14 = vsel %vm2316_vm1, %v3550_v13, 0.0 }
 0xe95   : > { %3552 = vadd.xlane.f32.xlu1 %v3551_v14 }
 0xf1e   : > { %v3553_v19 = vpop.xlane.xlu1 %3552 }
 0xf1f   : > { %v3554_v20 = vmul.f32 0.03125, %v3553_v19 }
 0xf21   : > { %v3555_v21 = vadd.f32 1e-05, %v3554_v20 }
 0xf23   : > { %11421 = vrsqrt.f32 %v3555_v21 }
 0xf30   : > { %v11422_v8 = vpop.eup %11421 }
 0xf31   : > { %v3557_v23 = vmul.f32 %v11422_v8, %v3549_v12 }
 0xf33   : > { %v3564_v25 = vmul.f32 %v10132_v22, %v3557_v23 }
 0xf35   : > { %v12998_v26 = vadd.f32 %v10133_v24, %v3564_v25 }
 0xf37   : > { %10617 = vmatmul.mubr.msk.f32.vlgmr.msra.gmra.mxu0 %vm2316_vm1, %v12998_v26 }
 0xf38   : > { %10621 = vmatprep.mubr.msk.f32.mxu0 %vm12263_vm0, %v12262_v0 }
 0xff7   : > { %v3647_v28 = vpop.f32.mrf.mxu0 }
 0xff8   : > { %v13004_v29 = vadd.f32 %v10134_v27, %v3647_v28  ;;  %v2307_v27 = vld [vmem:[%s13821_s13 + $0x10] sm:$0xff] }
 0xff9   : > { %v10618_v30 = vpop.f32.mrf.mxu0 }
 0xffa   : > { %3818 = vrot.lane.b32.xlu0 %v13004_v29, %s13749_s23  ;;  %3652 = vrot.lane.b32.xlu1 %v13004_v29, %s13747_s16  ;;  %s13886_s16 = sld [smem:[#allocation98_spill]] }
 0xffb   : > { %s13887_s23 = sld [smem:[#allocation67_spill]] }
 0xffe   : > { %3816 = vrot.lane.b32.xlu0 %v13004_v29, %s13745_s22  ;;  %s13885_s22 = sld [smem:[#allocation96_spill]] }
0x106c   : > { %v3653_v31 = vpop.permute.xlu1 %3652  ;;  %v3819_v32 = vpop.permute.xlu0 %3818 }
0x106d   : > { %10620 = vmatpush3.xpose.msk.msra.mxu0 %vm2393_vm2, %v3653_v31 }
0x106e   : > { %10629 = vmatprep.subr.mxu0 %v12262_v0 }
0x1070   : > { %10622 = vmatmul.mubr.msk.f32.vlgmr.msra.gmra.mxu0 %vm2393_vm2, %v13004_v29  ;;  %v3817_v33 = vpop.permute.xlu0 %3816 }
0x1071   : > { %10630 = vmatpush3.xpose.msk.msra.mxu0 %vm2393_vm2, %v3819_v32  ;;  %10631 = vmatprep.mubr.msk.f32.mxu0 %vm12263_vm0, %v12262_v0 }
0x1072   : > { %10639 = vmatprep.subr.mxu0 %v12262_v0 }
0x1074   : > { %10632 = vmatmul.mubr.msk.f32.vlgmr.msra.gmra.mxu0 %vm2393_vm2, %v3817_v33 }
0x1075   : > { %10641 = vmatprep.mubr.msk.f32.mxu0 %vm12263_vm0, %v12262_v0  ;;  %10640 = vmatpush3.msra.mxu0 %v2306_v61  ;;  %v2285_v61 = vld [vmem:[%s13885_s22 + $0x18] sm:$0xff] }
0x1076   : > { %10649 = vmatprep.subr.mxu0 %v12262_v0 }
0x1130   : > { %v3724_v34 = vpop.f32.mrf.mxu0 }
0x1131   : > { %v3728_v35 = vmul.f32 0.35355338, %v3724_v34 }
0x1132   : > { %v10623_v36 = vpop.f32.mrf.mxu0 }
0x1133   : > { %v3729_v37 = vsel %vm2393_vm2, %v3728_v35, -inf }
0x1134   : > { %3730 = vmax.xlane.f32.xlu0 %v3729_v37  ;;  %v3890_v38 = vpop.f32.mrf.mxu0 }
0x1135   : > { %v3894_v39 = vmul.f32 0.35355338, %v3890_v38 }
0x1136   : > { %v10633_v40 = vpop.f32.mrf.mxu0 }
0x1137   : > { %v3895_v41 = vsel %vm2393_vm2, %v3894_v39, -inf  ;;  %v2308_v40 = vld [vmem:[%s13821_s13 + $0x18] sm:$0xff]  ;;  %s13896_s13 = sld [smem:[#allocation53_spill]] }
0x1138   : > { %3896 = vmax.xlane.f32.xlu1 %v3895_v41 }
0x1149   : > { %3906 = vrot.lane.b32.xlu1 %v13004_v29, %s13741_s19  ;;  %s13883_s19 = smov 72  }
0x114d   : > { %4128 = vrot.lane.b32.xlu1 %v13004_v29, %s13739_s3  ;;  %s13882_s3 = smov 104  }
0x11bd   : > { %v3731_v42 = vpop.xlane.xlu0 %3730 }
0x11be   : > { %v3732_v43 = vsub.f32 %v3728_v35, %v3731_v42 }
0x11c0   : > { %v3733_v44 = vmul.f32 1.442695, %v3732_v43 }
0x11c1   : > { %v3897_v45 = vpop.xlane.xlu1 %3896 }
0x11c2   : > { %11423 = vpow2.f32 %v3733_v44  ;;  %v3898_v46 = vsub.f32 %v3894_v39, %v3897_v45 }
0x11c4   : > { %v3899_v47 = vmul.f32 1.442695, %v3898_v46 }
0x11c5   : > { %v3907_v57 = vpop.permute.xlu1 %3906 }
0x11c6   : > { %11425 = vpow2.f32 %v3899_v47 }
0x11c9   : > { %v4129_v4 = vpop.permute.xlu1 %4128 }
0x11cf   : > { %v11424_v48 = vpop.eup %11423 }
0x11d0   : > { %v3735_v49 = vsel %vm2393_vm2, %v11424_v48, 0.0 }
0x11d1   : > { %3736 = vadd.xlane.f32.xlu0 %v3735_v49  ;;  %v10152_v49 = vld [vmem:[#allocation34] ss:$0 sm:$0xff] }
0x11d3   : > { %v11426_v50 = vpop.eup %11425 }
0x11d4   : > { %v3901_v51 = vsel %vm2393_vm2, %v11426_v50, 0.0 }
0x11d5   : > { %3902 = vadd.xlane.f32.xlu0 %v3901_v51 }
0x11eb   : > { %3740 = vrot.lane.b32.xlu0 %v13004_v29, %s13880_s11 }
0x11ef   : > { %4130 = vrot.lane.b32.xlu0 %v13004_v29, %s13881_s0 }
0x125a   : > { %v3737_v52 = vpop.xlane.xlu0 %3736 }
0x125b   : > { %11427 = vrcp.f32 %v3737_v52 }
0x125e   : > { %v3903_v53 = vpop.xlane.xlu0 %3902 }
0x125f   : > { %11429 = vrcp.f32 %v3903_v53 }
0x1262   : > { %v3741_v54 = vpop.permute.xlu0 %3740 }
0x1263   : > { %10625 = vmatpush3.msra.mxu1 %v3741_v54 }
0x1264   : > { %10634 = vmatprep.subr.mxu1 %v12262_v0 }
0x1266   : > { %v4131_v2 = vpop.permute.xlu0 %4130 }
0x1268   : > { %v11428_v55 = vpop.eup %11427 }
0x1269   : > { %v3739_v56 = vmul.f32 %v11428_v55, %v11424_v48 }
0x126b   : > { %10627 = vmatmul.mubr.msk.f32.vlgmr.msra.gmra.mxu1 %vm2393_vm2, %v3739_v56 }
0x126c   : > { %v11430_v58 = vpop.eup %11429  ;;  %10635 = vmatpush3.msra.mxu1 %v3907_v57  ;;  %10636 = vmatprep.mubr.msk.f32.mxu1 %vm12263_vm0, %v12262_v0 }
0x126d   : > { %v3905_v59 = vmul.f32 %v11430_v58, %v11426_v50  ;;  %10644 = vmatprep.subr.mxu1 %v12262_v0 }
0x126f   : > { %10637 = vmatmul.mubr.msk.f32.vlgmr.msra.gmra.mxu1 %vm2393_vm2, %v3905_v59 }
0x1270   : > { %10646 = vmatprep.mubr.msk.f32.mxu1 %vm12263_vm0, %v12262_v0  ;;  %10645 = vmatpush3.msra.mxu1 %v2305_v60 }
0x1271   : > { %10654 = vmatprep.subr.mxu1 %v12262_v0 }
0x132b   : > { %v3812_v62 = vpop.f32.mrf.mxu1 }
0x132c   : > { %10647 = vmatmul.mubr.msk.f32.vlgmr.msra.gmra.mxu1 %vm2393_vm2, %v3812_v62  ;;  %v2284_v62 = vld [vmem:[%s13885_s22 + $0x10] sm:$0xff] }
0x132d   : > { %v10628_v63 = vpop.f32.mrf.mxu1  ;;  %10656 = vmatprep.mubr.msk.f32.mxu1 %vm12263_vm0, %v12262_v0 }
0x132e   : > { %v2282_v63 = vld [vmem:[%s13885_s22] sm:$0xff] }
0x132f   : > { %v3978_v1 = vpop.f32.mrf.mxu1 }
0x1330   : > { %10642 = vmatmul.mubr.msk.f32.vlgmr.msra.gmra.mxu0 %vm2393_vm2, %v3978_v1  ;;  %v2294_v1 = vld [vmem:[%s13886_s16 + $0x38] sm:$0xff] }
0x1331   : > { %10650 = vmatpush3.xpose.msk.msra.mxu0 %vm2393_vm2, %v4131_v2  ;;  %v10638_v3 = vpop.f32.mrf.mxu1  ;;  %10651 = vmatprep.mubr.msk.f32.mxu0 %vm12263_vm0, %v12262_v0  ;;  %v2293_v2 = vld [vmem:[%s13886_s16 + $0x30] sm:$0xff] }
0x1332   : > { %10659 = vmatprep.subr.mxu0 %v12262_v0  ;;  %v2292_v3 = vld [vmem:[%s13886_s16 + $0x28] sm:$0xff] }
0x1334   : > { %10652 = vmatmul.mubr.msk.f32.vlgmr.msra.gmra.mxu0 %vm2393_vm2, %v4129_v4  ;;  %v2291_v4 = vld [vmem:[%s13886_s16 + $0x20] sm:$0xff] }
0x1335   : > { %10661 = vmatprep.mubr.msk.f32.mxu0 %vm12263_vm0, %v12262_v0  ;;  %10660 = vmatpush3.msra.mxu0 %v2307_v27 }
0x1336   : > { %10669 = vmatprep.subr.mxu0 %v12262_v0 }
0x13ec   : > { %v4124_v6 = vpop.f32.mrf.mxu1 }
0x13ee   : > { %v10648_v7 = vpop.f32.mrf.mxu1 }
0x13f0   : > { %v4051_v9 = vpop.f32.mrf.mxu0 }
0x13f1   : > { %v4125_v10 = vadd.f32 %v4124_v6, %v4051_v9  ;;  %v2290_v6 = vld [vmem:[%s13886_s16 + $0x18] sm:$0xff] }
0x13f2   : > { %v10643_v11 = vpop.f32.mrf.mxu0 }
0x13f4   : > { %v4202_v12 = vpop.f32.mrf.mxu0 }
0x13f5   : > { %v4206_v13 = vmul.f32 0.35355338, %v4202_v12  ;;  %v10153_v12 = vld [vmem:[#allocation28] ss:$0 sm:$0xff] }
0x13f6   : > { %v10653_v14 = vpop.f32.mrf.mxu0 }
0x13f7   : > { %v4207_v15 = vsel %vm2393_vm2, %v4206_v13, -inf  ;;  %v10154_v14 = vld [vmem:[#allocation26] ss:$0 sm:$0xff] }
0x13f8   : > { %4208 = vmax.xlane.f32.xlu0 %v4207_v15 }
0x140e   : > { %4218 = vrot.lane.b32.xlu0 %v13004_v29, %s13743_s7  ;;  %s13884_s7 = smov 40  }
0x1412   : > { %4368 = vrot.lane.b32.xlu0 %v13004_v29, %s13882_s3 }
0x1481   : > { %v4209_v16 = vpop.xlane.xlu0 %4208 }
0x1482   : > { %v4210_v17 = vsub.f32 %v4206_v13, %v4209_v16 }
0x1484   : > { %v4211_v18 = vmul.f32 1.442695, %v4210_v17  ;;  %v2206_v17 = vld [vmem:[%s13887_s23 + $0x18] sm:$0xff] }
0x1485   : > { %v4219_v19 = vpop.permute.xlu0 %4218 }
0x1486   : > { %11431 = vpow2.f32 %v4211_v18  ;;  %10655 = vmatpush3.msra.mxu1 %v4219_v19  ;;  %v2205_v18 = vld [vmem:[%s13887_s23 + $0x10] sm:$0xff]  ;;  %v2204_v19 = vld [vmem:[%s13887_s23 + $0x8] sm:$0xff] }
0x1487   : > { %10664 = vmatprep.subr.mxu1 %v12262_v0 }
0x1489   : > { %v4369_v25 = vpop.permute.xlu0 %4368 }
0x1493   : > { %v11432_v20 = vpop.eup %11431 }
0x1494   : > { %v4213_v21 = vsel %vm2393_vm2, %v11432_v20, 0.0 }
0x1495   : > { %4214 = vadd.xlane.f32.xlu1 %v4213_v21  ;;  %v2289_v21 = vld [vmem:[%s13886_s16 + $0x10] sm:$0xff] }
0x14a6   : > { %4370 = vrot.lane.b32.xlu1 %v13004_v29, %s13883_s19 }
0x151e   : > { %v4215_v8 = vpop.xlane.xlu1 %4214 }
0x151f   : > { %11433 = vrcp.f32 %v4215_v8  ;;  %v2288_v8 = vld [vmem:[%s13886_s16 + $0x8] sm:$0xff] }
0x1522   : > { %v4371_v24 = vpop.permute.xlu1 %4370 }
0x152c   : > { %v11434_v22 = vpop.eup %11433 }
0x152d   : > { %v4217_v23 = vmul.f32 %v11434_v22, %v11432_v20  ;;  %v2203_v20 = vld [vmem:[%s13887_s23] sm:$0xff] }
0x152e   : > { %v2287_v22 = vld [vmem:[%s13886_s16] sm:$0xff]  ;;  %s13908_s16 = sld [smem:[#allocation57_spill]] }
0x152f   : > { %10657 = vmatmul.mubr.msk.f32.vlgmr.msra.gmra.mxu1 %vm2393_vm2, %v4217_v23  ;;  %v10155_v23 = vld [vmem:[#allocation23] ss:$0 sm:$0xff] }
0x1530   : > { %10665 = vmatpush3.xpose.msk.msra.mxu1 %vm2393_vm2, %v4371_v24  ;;  %10666 = vmatprep.mubr.msk.f32.mxu1 %vm12263_vm0, %v12262_v0 }
0x1531   : > { %10674 = vmatprep.subr.mxu1 %v12262_v0 }
0x1533   : > { %10667 = vmatmul.mubr.msk.f32.vlgmr.msra.gmra.mxu1 %vm2393_vm2, %v4369_v25 }
0x1534   : > { %10676 = vmatprep.mubr.msk.f32.mxu1 %vm12263_vm0, %v12262_v0  ;;  %10675 = vmatpush3.msra.mxu1 %v2308_v40 }
0x1535   : > { %10690 = vmatprep.subr.mxu1 %v12262_v0 }
0x15ef   : > { %v4290_v28 = vpop.f32.mrf.mxu1 }
0x15f0   : > { %10662 = vmatmul.mubr.msk.f32.vlgmr.msra.gmra.mxu0 %vm2393_vm2, %v4290_v28  ;;  %v10163_v28 = vld [vmem:[%s13888_s2] ss:$0 sm:$0xff]  ;;  %s13892_s2 = smov 56  }
0x15f1   : > { %v10658_v30 = vpop.f32.mrf.mxu1  ;;  %10671 = vmatprep.mubr.msk.f32.mxu0 %vm12263_vm0, %v12262_v0 }
0x15f3   : > { %v4442_v31 = vpop.f32.mrf.mxu1 }
0x15f4   : > { %v4446_v32 = vmul.f32 0.35355338, %v4442_v31 }
0x15f5   : > { %v10668_v33 = vpop.f32.mrf.mxu1 }
0x15f6   : > { %v4447_v34 = vsel %vm2393_vm2, %v4446_v32, -inf }
0x15f7   : > { %4448 = vmax.xlane.f32.xlu1 %v4447_v34 }
0x1680   : > { %v4449_v35 = vpop.xlane.xlu1 %4448 }
0x1681   : > { %v4450_v36 = vsub.f32 %v4446_v32, %v4449_v35 }
0x1683   : > { %v4451_v37 = vmul.f32 1.442695, %v4450_v36 }
0x1685   : > { %11435 = vpow2.f32 %v4451_v37 }
0x1692   : > { %v11436_v38 = vpop.eup %11435 }
0x1693   : > { %v4453_v39 = vsel %vm2393_vm2, %v11436_v38, 0.0 }
0x1694   : > { %4454 = vadd.xlane.f32.xlu0 %v4453_v39 }
0x16aa   : > { %4458 = vrot.lane.b32.xlu0 %v13004_v29, %s13884_s7 }
0x16b0   : > { %v4363_v41 = vpop.f32.mrf.mxu0 }
0x16b1   : > { %v4367_v42 = vadd.f32 %v4363_v41, %v4125_v10 }
0x16b2   : > { %v10663_v43 = vpop.f32.mrf.mxu0 }
0x171d   : > { %v4455_v44 = vpop.xlane.xlu0 %4454 }
0x171e   : > { %11437 = vrcp.f32 %v4455_v44 }
0x1721   : > { %v4459_v45 = vpop.permute.xlu0 %4458 }
0x1722   : > { %10670 = vmatpush3.msra.mxu0 %v4459_v45 }
0x1723   : > { %10679 = vmatprep.subr.mxu0 %v12262_v0 }
0x172b   : > { %v11438_v46 = vpop.eup %11437 }
0x172c   : > { %v4457_v47 = vmul.f32 %v11438_v46, %v11436_v38 }
0x172e   : > { %10672 = vmatmul.mubr.msk.f32.vlgmr.msra.gmra.mxu0 %vm2393_vm2, %v4457_v47 }
0x172f   : > { %10687 = vmatprep.mubr.msk.f32.mxu0 %vm12263_vm0, %v12262_v0  ;;  %10680 = vmatpush3.msra.mxu0 %v2285_v61 }
0x1730   : > { %10681 = vmatprep.subr.mxu0 %v12262_v0 }
0x1731   : > { %10682 = vmatpush3.msra.mxu0 %v2284_v62 }
0x1732   : > { %10683 = vmatprep.subr.mxu0 %v12262_v0 }
0x17ee   : > { %v4530_v29 = vpop.f32.mrf.mxu0 }
0x17ef   : > { %10677 = vmatmul.mubr.msk.f32.vlgmr.msra.gmra.mxu1 %vm2393_vm2, %v4530_v29 }
0x17f0   : > { %v10673_v48 = vpop.f32.mrf.mxu0  ;;  %10706 = vmatprep.mubr.msk.f32.mxu1 %vm12263_vm0, %v12262_v0  ;;  %10691 = vmatpush3.msra.mxu1 %v2294_v1 }
0x17f1   : > { %10692 = vmatprep.subr.mxu1 %v12262_v0 }
0x17f2   : > { %10693 = vmatpush3.msra.mxu1 %v2293_v2 }
0x17f3   : > { %10694 = vmatprep.subr.mxu1 %v12262_v0 }
0x17f4   : > { %10695 = vmatpush3.msra.mxu1 %v2292_v3 }
0x17f5   : > { %10696 = vmatprep.subr.mxu1 %v12262_v0 }
0x17f6   : > { %10697 = vmatpush3.msra.mxu1 %v2291_v4 }
0x17f7   : > { %10698 = vmatprep.subr.mxu1 %v12262_v0 }
0x17f8   : > { %10699 = vmatpush3.msra.mxu1 %v2290_v6 }
0x17f9   : > { %10700 = vmatprep.subr.mxu1 %v12262_v0 }
0x17fa   : > { %10701 = vmatpush3.msra.mxu1 %v2289_v21 }
0x17fb   : > { %10702 = vmatprep.subr.mxu1 %v12262_v0 }
0x17fc   : > { %10703 = vmatpush3.msra.mxu1 %v2288_v8 }
0x17fd   : > { %10704 = vmatprep.subr.mxu1 %v12262_v0 }
0x17fe   : > { %10705 = vmatpush3.msra.mxu1 %v2287_v22 }
0x17ff   : > { %10725 = vmatprep.subr.mxu1 %v12262_v0 }
0x18af   : > { %v4603_v50 = vpop.f32.mrf.mxu1 }
0x18b0   : > { %v4607_v51 = vadd.f32 %v4603_v50, %v4367_v42 }
0x18b1   : > { %v10678_v52 = vpop.f32.mrf.mxu1 }
0x18b2   : > { %v4614_v53 = vadd.f32 %v10152_v49, %v4607_v51 }
0x18b4   : > { %v4615_v54 = vadd.f32 %v4614_v53, %v12998_v26  ;;  %v2283_v26 = vld [vmem:[%s13885_s22 + $0x8] sm:$0xff] }
0x18b5   : > { %10684 = vmatpush3.msra.mxu0 %v2283_v26  ;;  %v2207_v26 = vld [vmem:[%s13894_s9] sm:$0xff] }
0x18b6   : > { %v4616_v55 = vsel %vm2316_vm1, %v4615_v54, 0.0  ;;  %10685 = vmatprep.subr.mxu0 %v12262_v0 }
0x18b7   : > { %4617 = vadd.xlane.f32.xlu1 %v4616_v55  ;;  %10686 = vmatpush3.msra.mxu0 %v2282_v63  ;;  %v2208_v63 = vld [vmem:[%s13894_s9 + $0x8] sm:$0xff] }
0x18b8   : > { %10709 = vmatprep.subr.mxu0 %v12262_v0 }
0x1940   : > { %v4618_v56 = vpop.xlane.xlu1 %4617 }
0x1941   : > { %v4619_v57 = vmul.f32 0.03125, %v4618_v56 }
0x1943   : > { %v4620_v58 = vsub.f32 %v4615_v54, %v4619_v57 }
0x1945   : > { %v4621_v59 = vmul.f32 %v4620_v58, %v4620_v58 }
0x1947   : > { %v4622_v60 = vsel %vm2316_vm1, %v4621_v59, 0.0 }
0x1948   : > { %4623 = vadd.xlane.f32.xlu1 %v4622_v60 }
0x19d1   : > { %v4624_v7 = vpop.xlane.xlu1 %4623 }
0x19d2   : > { %v4625_v9 = vmul.f32 0.03125, %v4624_v7 }
0x19d4   : > { %v4626_v10 = vadd.f32 1e-05, %v4625_v9 }
0x19d6   : > { %11439 = vrsqrt.f32 %v4626_v10 }
0x19e3   : > { %v11440_v11 = vpop.eup %11439 }
0x19e4   : > { %v4628_v13 = vmul.f32 %v11440_v11, %v4620_v58 }
0x19e6   : > { %v4635_v15 = vmul.f32 %v10153_v12, %v4628_v13 }
0x19e8   : > { %v13114_v16 = vadd.f32 %v10154_v14, %v4635_v15 }
0x19ea   : > { %10688 = vmatmul.mubr.msk.f32.vlgmr.msra.gmra.mxu0 %vm2316_vm1, %v13114_v16 }
0x19eb   : > { %10710 = vmatpush3.msra.mxu0 %v2206_v17  ;;  %10717 = vmatprep.mubr.msk.f32.mxu0 %vm12263_vm0, %v12262_v0 }
0x19ec   : > { %10711 = vmatprep.subr.mxu0 %v12262_v0 }
0x19ed   : > { %10712 = vmatpush3.msra.mxu0 %v2205_v18 }
0x19ee   : > { %10713 = vmatprep.subr.mxu0 %v12262_v0 }
0x19ef   : > { %10714 = vmatpush3.msra.mxu0 %v2204_v19 }
0x19f0   : > { %10715 = vmatprep.subr.mxu0 %v12262_v0 }
0x19f1   : > { %10716 = vmatpush3.msra.mxu0 %v2203_v20 }
0x19f2   : > { %10718 = vmatmul.mubr.msk.f32.vlgmr.msra.gmra.mxu0 %vm2316_vm1, %v12855_v5  ;;  %10720 = vmatprep.subr.mxu0 %v12262_v0 }
0x19f3   : > { %10722 = vmatprep.mubr.msk.f32.mxu0 %vm12263_vm0, %v12262_v0 }
0x1aaa   : > { %v4718_v5 = vpop.f32.mrf.mxu0 }
0x1aab   : > { %v4719_v24 = vadd.f32 %v10155_v23, %v4718_v5 }
0x1aac   : > { %v10689_v25 = vpop.f32.mrf.mxu0 }
0x1aad   : > { %v4722_v27 = vmax.f32 %v4719_v24, 0.0 }
0x1aaf   : > { %10707 = vmatmul.mubr.msk.f32.vlgmr.msra.gmra.mxu1 %vm3470_vm3, %v4722_v27 }
0x1ab0   : > { %10727 = vmatprep.mubr.msk.f32.mxu1 %vm12263_vm0, %v12262_v0 }
0x1ab2   : > { %v4929_v30 = vpop.f32.mrf.mxu0 }
0x1ab3   : > { %v13142_v31 = vadd.f32 %v10163_v28, %v4929_v30  ;;  %v2209_v30 = vld [vmem:[%s13894_s9 + $0x10] sm:$0xff] }
0x1ab4   : > { %v10719_v32 = vpop.f32.mrf.mxu0 }
0x1ab5   : > { %5100 = vrot.lane.b32.xlu0 %v13142_v31, %s13889_s4  ;;  %4934 = vrot.lane.b32.xlu1 %v13142_v31, %s13890_s5 }
0x1ab9   : > { %5098 = vrot.lane.b32.xlu0 %v13142_v31, %s13891_s6 }
0x1b27   : > { %v4935_v33 = vpop.permute.xlu1 %4934  ;;  %v5101_v34 = vpop.permute.xlu0 %5100 }
0x1b28   : > { %10721 = vmatpush3.xpose.msk.msra.mxu0 %vm2393_vm2, %v4935_v33 }
0x1b29   : > { %10730 = vmatprep.subr.mxu0 %v12262_v0 }
0x1b2b   : > { %10723 = vmatmul.mubr.msk.f32.vlgmr.msra.gmra.mxu0 %vm2393_vm2, %v13142_v31  ;;  %v5099_v35 = vpop.permute.xlu0 %5098 }
0x1b2c   : > { %10731 = vmatpush3.xpose.msk.msra.mxu0 %vm2393_vm2, %v5101_v34  ;;  %10732 = vmatprep.mubr.msk.f32.mxu0 %vm12263_vm0, %v12262_v0 }
0x1b2d   : > { %10740 = vmatprep.subr.mxu0 %v12262_v0 }
0x1b2f   : > { %10733 = vmatmul.mubr.msk.f32.vlgmr.msra.gmra.mxu0 %vm2393_vm2, %v5099_v35 }
0x1b30   : > { %10742 = vmatprep.mubr.msk.f32.mxu0 %vm12263_vm0, %v12262_v0  ;;  %10741 = vmatpush3.msra.mxu0 %v2208_v63 }
0x1b31   : > { %10750 = vmatprep.subr.mxu0 %v12262_v0 }
0x1b6f   : > { %v13161_v36 = vpop.f32.mrf.mxu1 }
0x1b71   : > { %v10708_v37 = vpop.f32.mrf.mxu1 }
0x1beb   : > { %v5006_v38 = vpop.f32.mrf.mxu0 }
0x1bec   : > { %v5010_v39 = vmul.f32 0.35355338, %v5006_v38 }
0x1bed   : > { %v10724_v40 = vpop.f32.mrf.mxu0 }
0x1bee   : > { %v5011_v41 = vsel %vm2393_vm2, %v5010_v39, -inf }
0x1bef   : > { %5012 = vmax.xlane.f32.xlu1 %v5011_v41  ;;  %v5172_v42 = vpop.f32.mrf.mxu0 }
0x1bf0   : > { %v5176_v43 = vmul.f32 0.35355338, %v5172_v42 }
0x1bf1   : > { %v10734_v44 = vpop.f32.mrf.mxu0 }
0x1bf2   : > { %v5177_v45 = vsel %vm2393_vm2, %v5176_v43, -inf }
0x1bf3   : > { %5178 = vmax.xlane.f32.xlu0 %v5177_v45 }
0x1c78   : > { %v5013_v46 = vpop.xlane.xlu1 %5012 }
0x1c79   : > { %v5014_v47 = vsub.f32 %v5010_v39, %v5013_v46 }
0x1c7b   : > { %v5015_v29 = vmul.f32 1.442695, %v5014_v47 }
0x1c7c   : > { %v5179_v48 = vpop.xlane.xlu0 %5178 }
0x1c7d   : > { %11441 = vpow2.f32 %v5015_v29  ;;  %v5180_v49 = vsub.f32 %v5176_v43, %v5179_v48  ;;  %v10157_v43 = vld [vmem:[#allocation25] ss:$0 sm:$0xff] }
0x1c7e   : > { %v4799_v44 = vadd.f32 %v10157_v43, %v13161_v36 }
0x1c7f   : > { %v5181_v50 = vmul.f32 1.442695, %v5180_v49 }
0x1c80   : > { %v4802_v47 = vadd.f32 %v4799_v44, %v13114_v16  ;;  %v2210_v16 = vld [vmem:[%s13894_s9 + $0x18] sm:$0xff]  ;;  %s13897_s9 = sld [smem:[#allocation66_spill]] }
0x1c81   : > { %11443 = vpow2.f32 %v5181_v50 }
0x1c82   : > { %v4803_v29 = vsel %vm2316_vm1, %v4802_v47, 0.0 }
0x1c8a   : > { %v11442_v51 = vpop.eup %11441 }
0x1c8b   : > { %v5017_v52 = vsel %vm2393_vm2, %v11442_v51, 0.0 }
0x1c8c   : > { %5018 = vadd.xlane.f32.xlu0 %v5017_v52 }
0x1c8e   : > { %v11444_v53 = vpop.eup %11443 }
0x1c8f   : > { %v5183_v54 = vsel %vm2393_vm2, %v11444_v53, 0.0 }
0x1c90   : > { %5184 = vadd.xlane.f32.xlu1 %v5183_v54 }
0x1ca1   : > { %5188 = vrot.lane.b32.xlu1 %v13142_v31, %s13892_s2 }
0x1ca2   : > { %5022 = vrot.lane.b32.xlu0 %v13142_v31, %s13880_s11 }
0x1ca5   : > { %5412 = vrot.lane.b32.xlu1 %v13142_v31, %s13881_s0 }
0x1ca6   : > { %5410 = vrot.lane.b32.xlu0 %v13142_v31, %s13893_s8 }
0x1d15   : > { %v5019_v55 = vpop.xlane.xlu0 %5018 }
0x1d16   : > { %11445 = vrcp.f32 %v5019_v55 }
0x1d19   : > { %v5185_v56 = vpop.xlane.xlu1 %5184  ;;  %v5023_v57 = vpop.permute.xlu0 %5022 }
0x1d1a   : > { %11447 = vrcp.f32 %v5185_v56  ;;  %10726 = vmatpush3.msra.mxu1 %v5023_v57 }
0x1d1b   : > { %10735 = vmatprep.subr.mxu1 %v12262_v0 }
0x1d1d   : > { %v5189_v60 = vpop.permute.xlu1 %5188  ;;  %v5411_v7 = vpop.permute.xlu0 %5410 }
0x1d21   : > { %v5413_v4 = vpop.permute.xlu1 %5412 }
0x1d23   : > { %v11446_v58 = vpop.eup %11445 }
0x1d24   : > { %v5021_v59 = vmul.f32 %v11446_v58, %v11442_v51 }
0x1d26   : > { %10728 = vmatmul.mubr.msk.f32.vlgmr.msra.gmra.mxu1 %vm2393_vm2, %v5021_v59 }
0x1d27   : > { %v11448_v61 = vpop.eup %11447  ;;  %10736 = vmatpush3.msra.mxu1 %v5189_v60  ;;  %10737 = vmatprep.mubr.msk.f32.mxu1 %vm12263_vm0, %v12262_v0 }
0x1d28   : > { %v5187_v62 = vmul.f32 %v11448_v61, %v11444_v53  ;;  %10745 = vmatprep.subr.mxu1 %v12262_v0  ;;  %v10159_v61 = vld [vmem:[#allocation31] ss:$0 sm:$0xff] }
0x1d2a   : > { %10738 = vmatmul.mubr.msk.f32.vlgmr.msra.gmra.mxu1 %vm2393_vm2, %v5187_v62 }
0x1d2b   : > { %10747 = vmatprep.mubr.msk.f32.mxu1 %vm12263_vm0, %v12262_v0  ;;  %10746 = vmatpush3.msra.mxu1 %v2207_v26  ;;  %v10160_v26 = vld [vmem:[#allocation29] ss:$0 sm:$0xff] }
0x1d2c   : > { %10755 = vmatprep.subr.mxu1 %v12262_v0 }
0x1de6   : > { %v5094_v1 = vpop.f32.mrf.mxu1 }
0x1de7   : > { %10748 = vmatmul.mubr.msk.f32.vlgmr.msra.gmra.mxu1 %vm2393_vm2, %v5094_v1 }
0x1de8   : > { %v10729_v2 = vpop.f32.mrf.mxu1  ;;  %10757 = vmatprep.mubr.msk.f32.mxu1 %vm12263_vm0, %v12262_v0 }
0x1dea   : > { %v5260_v3 = vpop.f32.mrf.mxu1 }
0x1deb   : > { %10743 = vmatmul.mubr.msk.f32.vlgmr.msra.gmra.mxu0 %vm2393_vm2, %v5260_v3 }
0x1dec   : > { %10751 = vmatpush3.xpose.msk.msra.mxu0 %vm2393_vm2, %v5413_v4  ;;  %v10739_v6 = vpop.f32.mrf.mxu1  ;;  %10752 = vmatprep.mubr.msk.f32.mxu0 %vm12263_vm0, %v12262_v0 }
0x1ded   : > { %10760 = vmatprep.subr.mxu0 %v12262_v0  ;;  %v2176_v6 = vld [vmem:[%s13896_s13 + $0x18] sm:$0xff] }
0x1def   : > { %10753 = vmatmul.mubr.msk.f32.vlgmr.msra.gmra.mxu0 %vm2393_vm2, %v5411_v7  ;;  %v2175_v7 = vld [vmem:[%s13896_s13 + $0x10] sm:$0xff] }
0x1df0   : > { %10762 = vmatprep.mubr.msk.f32.mxu0 %vm12263_vm0, %v12262_v0  ;;  %10761 = vmatpush3.msra.mxu0 %v2209_v30 }
0x1df1   : > { %10770 = vmatprep.subr.mxu0 %v12262_v0 }
0x1ea7   : > { %v5406_v9 = vpop.f32.mrf.mxu1 }
0x1ea9   : > { %v10749_v10 = vpop.f32.mrf.mxu1 }
0x1eaa   : > { %v2173_v10 = vld [vmem:[%s13896_s13] sm:$0xff] }
0x1eab   : > { %v5333_v11 = vpop.f32.mrf.mxu0 }
0x1eac   : > { %v5407_v12 = vadd.f32 %v5406_v9, %v5333_v11  ;;  %v2174_v9 = vld [vmem:[%s13896_s13 + $0x8] sm:$0xff]  ;;  %s13900_s13 = sld [smem:[#allocation59_spill]] }
0x1ead   : > { %v10744_v13 = vpop.f32.mrf.mxu0 }
0x1eae   : > { %v10181_v13 = vld [vmem:[%s13897_s9] ss:$0 sm:$0xff]  ;;  %s13898_s9 = sld [smem:[#allocation51_spill]] }
0x1eaf   : > { %v5484_v14 = vpop.f32.mrf.mxu0 }
0x1eb0   : > { %v5488_v15 = vmul.f32 0.35355338, %v5484_v14 }
0x1eb1   : > { %v10754_v17 = vpop.f32.mrf.mxu0 }
0x1eb2   : > { %v5489_v18 = vsel %vm2393_vm2, %v5488_v15, -inf }
0x1eb3   : > { %5490 = vmax.xlane.f32.xlu1 %v5489_v18 }
0x1ec4   : > { %5652 = vrot.lane.b32.xlu1 %v13142_v31, %s13883_s19 }
0x1ec8   : > { %5650 = vrot.lane.b32.xlu1 %v13142_v31, %s13882_s3 }
0x1f3c   : > { %v5491_v19 = vpop.xlane.xlu1 %5490 }
0x1f3d   : > { %v5492_v20 = vsub.f32 %v5488_v15, %v5491_v19 }
0x1f3f   : > { %v5493_v21 = vmul.f32 1.442695, %v5492_v20  ;;  %v11523_v20 = vld [vmem:[%s12850_s1] sm:$0xff]  ;;  %s13899_s1 = sld [smem:[#allocation60_spill]] }
0x1f40   : > { %v5653_v25 = vpop.permute.xlu1 %5652 }
0x1f41   : > { %11449 = vpow2.f32 %v5493_v21 }
0x1f44   : > { %v5651_v28 = vpop.permute.xlu1 %5650 }
0x1f4e   : > { %v11450_v8 = vpop.eup %11449 }
0x1f4f   : > { %v5495_v22 = vsel %vm2393_vm2, %v11450_v8, 0.0 }
0x1f50   : > { %5496 = vadd.xlane.f32.xlu0 %v5495_v22 }
0x1f66   : > { %5500 = vrot.lane.b32.xlu0 %v13142_v31, %s13895_s12 }
0x1fd9   : > { %v5497_v23 = vpop.xlane.xlu0 %5496 }
0x1fda   : > { %11451 = vrcp.f32 %v5497_v23 }
0x1fdd   : > { %v5501_v5 = vpop.permute.xlu0 %5500 }
0x1fde   : > { %10756 = vmatpush3.msra.mxu1 %v5501_v5 }
0x1fdf   : > { %10765 = vmatprep.subr.mxu1 %v12262_v0 }
0x1fe7   : > { %v11452_v24 = vpop.eup %11451 }
0x1fe8   : > { %v5499_v27 = vmul.f32 %v11452_v24, %v11450_v8 }
0x1fea   : > { %10758 = vmatmul.mubr.msk.f32.vlgmr.msra.gmra.mxu1 %vm2393_vm2, %v5499_v27 }
0x1feb   : > { %10766 = vmatpush3.xpose.msk.msra.mxu1 %vm2393_vm2, %v5653_v25  ;;  %10767 = vmatprep.mubr.msk.f32.mxu1 %vm12263_vm0, %v12262_v0 }
0x1fec   : > { %10775 = vmatprep.subr.mxu1 %v12262_v0 }
0x1fee   : > { %10768 = vmatmul.mubr.msk.f32.vlgmr.msra.gmra.mxu1 %vm2393_vm2, %v5651_v28 }
0x1fef   : > { %10777 = vmatprep.mubr.msk.f32.mxu1 %vm12263_vm0, %v12262_v0  ;;  %10776 = vmatpush3.msra.mxu1 %v2210_v16 }
0x1ff0   : > { %10791 = vmatprep.subr.mxu1 %v12262_v0 }
0x20aa   : > { %v5572_v32 = vpop.f32.mrf.mxu1 }
0x20ab   : > { %10763 = vmatmul.mubr.msk.f32.vlgmr.msra.gmra.mxu0 %vm2393_vm2, %v5572_v32 }
0x20ac   : > { %v10759_v33 = vpop.f32.mrf.mxu1  ;;  %10772 = vmatprep.mubr.msk.f32.mxu0 %vm12263_vm0, %v12262_v0 }
0x20ae   : > { %v5724_v34 = vpop.f32.mrf.mxu1 }
0x20af   : > { %v5728_v35 = vmul.f32 0.35355338, %v5724_v34 }
0x20b0   : > { %v10769_v37 = vpop.f32.mrf.mxu1 }
0x20b1   : > { %v5729_v38 = vsel %vm2393_vm2, %v5728_v35, -inf }
0x20b2   : > { %5730 = vmax.xlane.f32.xlu0 %v5729_v38 }
0x20c8   : > { %5740 = vrot.lane.b32.xlu0 %v13142_v31, %s13884_s7 }
0x213b   : > { %v5731_v39 = vpop.xlane.xlu0 %5730 }
0x213c   : > { %v5732_v40 = vsub.f32 %v5728_v35, %v5731_v39 }
0x213e   : > { %v5733_v41 = vmul.f32 1.442695, %v5732_v40  ;;  %v10161_v40 = vld [vmem:[#allocation10] ss:$0 sm:$0xff] }
0x213f   : > { %v5741_v42 = vpop.permute.xlu0 %5740 }
0x2140   : > { %11453 = vpow2.f32 %v5733_v41  ;;  %10771 = vmatpush3.msra.mxu0 %v5741_v42  ;;  %v10162_v42 = vld [vmem:[#allocation8] ss:$0 sm:$0xff] }
0x2141   : > { %10780 = vmatprep.subr.mxu0 %v12262_v0 }
0x214d   : > { %v11454_v45 = vpop.eup %11453 }
0x214e   : > { %v5735_v46 = vsel %vm2393_vm2, %v11454_v45, 0.0 }
0x214f   : > { %5736 = vadd.xlane.f32.xlu1 %v5735_v46 }
0x2153   : > { %4804 = vadd.xlane.f32.xlu1 %v4803_v29 }
0x216b   : > { %v5645_v31 = vpop.f32.mrf.mxu0 }
0x216c   : > { %v5649_v48 = vadd.f32 %v5645_v31, %v5407_v12 }
0x216d   : > { %v10764_v49 = vpop.f32.mrf.mxu0 }
0x21d8   : > { %v5737_v50 = vpop.xlane.xlu1 %5736 }
0x21d9   : > { %11455 = vrcp.f32 %v5737_v50  ;;  %v10183_v50 = vld [vmem:[%s13900_s13] ss:$0 sm:$0xff]  ;;  %s13901_s13 = sld [smem:[#allocation54_spill]] }
0x21dc   : > { %v4805_v51 = vpop.xlane.xlu1 %4804 }
0x21dd   : > { %v4806_v52 = vmul.f32 0.03125, %v4805_v51 }
0x21df   : > { %v4807_v53 = vsub.f32 %v4802_v47, %v4806_v52 }
0x21e1   : > { %v4808_v54 = vmul.f32 %v4807_v53, %v4807_v53 }
0x21e3   : > { %v4809_v36 = vsel %vm2316_vm1, %v4808_v54, 0.0 }
0x21e4   : > { %4810 = vadd.xlane.f32.xlu1 %v4809_v36 }
0x21e6   : > { %v11456_v55 = vpop.eup %11455 }
0x21e7   : > { %v5739_v56 = vmul.f32 %v11456_v55, %v11454_v45  ;;  %v10184_v45 = vld [vmem:[%s13898_s9] ss:$0 sm:$0xff]  ;;  %s13902_s9 = sld [smem:[#allocation52_spill]] }
0x21e9   : > { %10773 = vmatmul.mubr.msk.f32.vlgmr.msra.gmra.mxu0 %vm2393_vm2, %v5739_v56 }
0x21ea   : > { %10788 = vmatprep.mubr.msk.f32.mxu0 %vm12263_vm0, %v12262_v0  ;;  %10781 = vmatpush3.msra.mxu0 %v2176_v6 }
0x21eb   : > { %10782 = vmatprep.subr.mxu0 %v12262_v0 }
0x21ec   : > { %10783 = vmatpush3.msra.mxu0 %v2175_v7 }
0x21ed   : > { %10784 = vmatprep.subr.mxu0 %v12262_v0 }
0x21ee   : > { %10785 = vmatpush3.msra.mxu0 %v2174_v9 }
0x21ef   : > { %10786 = vmatprep.subr.mxu0 %v12262_v0 }
0x21f0   : > { %10787 = vmatpush3.msra.mxu0 %v2173_v10 }
0x21f1   : > { %10802 = vmatprep.subr.mxu0 %v12262_v0 }
0x226d   : > { %v4811_v57 = vpop.xlane.xlu1 %4810 }
0x226e   : > { %v4812_v58 = vmul.f32 0.03125, %v4811_v57 }
0x2270   : > { %v4813_v59 = vadd.f32 1e-05, %v4812_v58 }
0x2272   : > { %11457 = vrsqrt.f32 %v4813_v59 }
0x227f   : > { %v11458_v60 = vpop.eup %11457 }
0x2280   : > { %v4815_v62 = vmul.f32 %v11458_v60, %v4807_v53 }
0x2282   : > { %v4822_v63 = vmul.f32 %v10159_v61, %v4815_v62 }
0x2284   : > { %v4829_v1 = vadd.f32 %v10160_v26, %v4822_v63 }
0x2286   : > { %v4830_v2 = vsel %vm2316_vm1, %v4829_v1, 0.0 }
0x2287   : > { %4831 = vadd.xlane.f32.xlu1 %v4830_v2 }
0x22a9   : > { %v5812_v3 = vpop.f32.mrf.mxu0 }
0x22aa   : > { %10778 = vmatmul.mubr.msk.f32.vlgmr.msra.gmra.mxu1 %vm2393_vm2, %v5812_v3 }
0x22ab   : > { %v10774_v4 = vpop.f32.mrf.mxu0  ;;  %10799 = vmatprep.mubr.msk.f32.mxu1 %vm12263_vm0, %v12262_v0 }
0x2310   : > { %v4832_v11 = vpop.xlane.xlu1 %4831 }
0x2311   : > { %v4833_v12 = vmul.f32 0.03125, %v4832_v11 }
0x2313   : > { %v4834_v18 = vsub.f32 %v4829_v1, %v4833_v12 }
0x2315   : > { %v4835_v22 = vmul.f32 %v4834_v18, %v4834_v18 }
0x2317   : > { %v4836_v23 = vsel %vm2316_vm1, %v4835_v22, 0.0 }
0x236a   : > { %v5885_v14 = vpop.f32.mrf.mxu1 }
0x236b   : > { %v5889_v15 = vadd.f32 %v5885_v14, %v5649_v48  ;;  %v10182_v48 = vld [vmem:[%s13899_s1] ss:$0 sm:$0xff]  ;;  %s13903_s1 = sld [smem:[#allocation56_spill]] }
0x236c   : > { %v10779_v17 = vpop.f32.mrf.mxu1 }
0x236d   : > { %v5896_v19 = vadd.f32 %v10181_v13, %v5889_v15 }
0x236f   : > { %v5897_v21 = vadd.f32 %v11523_v20, %v5896_v19 }
0x2371   : > { %v5898_v8 = vsel %vm2316_vm1, %v5897_v21, 0.0 }
0x2372   : > { %5899 = vadd.xlane.f32.xlu1 %v5898_v8 }
0x2376   : > { %4837 = vadd.xlane.f32.xlu1 %v4836_v23 }
0x2387   : > { %6014 = vrot.lane.b32.xlu1 %v2176_v6, %s13890_s5 }
0x238b   : > { %6012 = vrot.lane.b32.xlu1 %v2175_v7, %s13890_s5 }
0x238f   : > { %6010 = vrot.lane.b32.xlu1 %v2174_v9, %s13890_s5 }
0x2393   : > { %6008 = vrot.lane.b32.xlu1 %v2173_v10, %s13890_s5 }
0x23fb   : > { %v5900_v5 = vpop.xlane.xlu1 %5899 }
0x23fc   : > { %v5901_v24 = vmul.f32 0.03125, %v5900_v5 }
0x23fe   : > { %v5902_v25 = vsub.f32 %v5897_v21, %v5901_v24  ;;  %v2178_v21 = vld [vmem:[%s13901_s13 + $0x8] sm:$0xff]  ;;  %v2177_v24 = vld [vmem:[%s13901_s13] sm:$0xff] }
0x23ff   : > { %v4838_v27 = vpop.xlane.xlu1 %4837 }
0x2400   : > { %v4839_v28 = vmul.f32 0.03125, %v4838_v27  ;;  %v5903_v30 = vmul.f32 %v5902_v25, %v5902_v25 }
0x2402   : > { %v4840_v32 = vadd.f32 1e-05, %v4839_v28  ;;  %v5904_v33 = vsel %vm2316_vm1, %v5903_v30, 0.0 }
0x2403   : > { %5905 = vadd.xlane.f32.xlu0 %v5904_v33  ;;  %v6015_v34 = vpop.permute.xlu1 %6014 }
0x2404   : > { %11459 = vrsqrt.f32 %v4840_v32  ;;  %10792 = vmatpush3.msra.mxu1 %v6015_v34 }
0x2405   : > { %10793 = vmatprep.subr.mxu1 %v12262_v0 }
0x2407   : > { %v6013_v35 = vpop.permute.xlu1 %6012 }
0x2408   : > { %10794 = vmatpush3.msra.mxu1 %v6013_v35 }
0x2409   : > { %10795 = vmatprep.subr.mxu1 %v12262_v0 }
0x240b   : > { %v6011_v37 = vpop.permute.xlu1 %6010 }
0x240c   : > { %10796 = vmatpush3.msra.mxu1 %v6011_v37 }
0x240d   : > { %10797 = vmatprep.subr.mxu1 %v12262_v0 }
0x240f   : > { %v6009_v38 = vpop.permute.xlu1 %6008 }
0x2410   : > { %10798 = vmatpush3.msra.mxu1 %v6009_v38 }
0x2411   : > { %v11460_v39 = vpop.eup %11459  ;;  %10807 = vmatprep.subr.mxu1 %v12262_v0 }
0x2412   : > { %v4842_v41 = vmul.f32 %v11460_v39, %v4834_v18 }
0x2414   : > { %v4849_v43 = vmul.f32 %v10161_v40, %v4842_v41 }
0x2416   : > { %v13259_v44 = vadd.f32 %v10162_v42, %v4849_v43 }
0x2418   : > { %10800 = vmatmul.mubr.msk.f32.vlgmr.msra.gmra.mxu1 %vm2316_vm1, %v13259_v44 }
0x2419   : > { %6020 = vrot.lane.b32.xlu0 %v10184_v45, %s13890_s5  ;;  %10809 = vmatprep.mubr.msk.f32.mxu1 %vm12263_vm0, %v12262_v0 }
0x248c   : > { %v5906_v46 = vpop.xlane.xlu0 %5905 }
0x248d   : > { %v5907_v47 = vmul.f32 0.03125, %v5906_v46 }
0x248f   : > { %v5908_v29 = vadd.f32 1e-05, %v5907_v47 }
0x2490   : > { %v6021_v53 = vpop.permute.xlu0 %6020 }
0x2491   : > { %11461 = vrsqrt.f32 %v5908_v29 }
0x249e   : > { %v11462_v31 = vpop.eup %11461 }
0x249f   : > { %v5910_v49 = vmul.f32 %v11462_v31, %v5902_v25 }
0x24a1   : > { %v5917_v51 = vmul.f32 %v10182_v48, %v5910_v49 }
0x24a3   : > { %v13269_v52 = vadd.f32 %v10183_v50, %v5917_v51 }
0x24a5   : > { %10789 = vmatmul.mubr.msk.f32.vlgmr.msra.gmra.mxu0 %vm2316_vm1, %v13269_v52 }
0x24a6   : > { %10804 = vmatprep.mubr.msk.f32.mxu0 %vm12263_vm0, %v12262_v0 }
0x24d8   : > { %v6092_v54 = vpop.f32.mrf.mxu1 }
0x24d9   : > { %v13275_v36 = vadd.f32 %v6092_v54, %v6021_v53  ;;  %v2179_v54 = vld [vmem:[%s13901_s13 + $0x10] sm:$0xff] }
0x24da   : > { %v10801_v55 = vpop.f32.mrf.mxu1 }
0x24db   : > { %6262 = vrot.lane.b32.xlu1 %v13275_v36, %s13891_s6  ;;  %10803 = vmatpush3.xpose.msk.msra.mxu0 %vm2393_vm2, %v13275_v36 }
0x24dc   : > { %10812 = vmatprep.subr.mxu0 %v12262_v0 }
0x254d   : > { %v6263_v58 = vpop.permute.xlu1 %6262 }
0x2565   : > { %v6000_v56 = vpop.f32.mrf.mxu0 }
0x2566   : > { %v13282_v16 = vadd.f32 %v10184_v45, %v6000_v56 }
0x2567   : > { %v10790_v57 = vpop.f32.mrf.mxu0 }
0x2568   : > { %6260 = vrot.lane.b32.xlu1 %v13282_v16, %s13891_s6  ;;  %10805 = vmatmul.mubr.msk.f32.vlgmr.msra.gmra.mxu0 %vm2393_vm2, %v13282_v16 }
0x2569   : > { %10813 = vmatpush3.xpose.msk.msra.mxu0 %vm2393_vm2, %v6263_v58  ;;  %10814 = vmatprep.mubr.msk.f32.mxu0 %vm12263_vm0, %v12262_v0 }
0x256a   : > { %10822 = vmatprep.subr.mxu0 %v12262_v0 }
0x25da   : > { %v6261_v59 = vpop.permute.xlu1 %6260 }
0x25db   : > { %10815 = vmatmul.mubr.msk.f32.vlgmr.msra.gmra.mxu0 %vm2393_vm2, %v6261_v59 }
0x25dc   : > { %10824 = vmatprep.mubr.msk.f32.mxu0 %vm12263_vm0, %v12262_v0  ;;  %10823 = vmatpush3.msra.mxu0 %v2178_v21 }
0x25dd   : > { %10832 = vmatprep.subr.mxu0 %v12262_v0 }
0x2628   : > { %v6168_v60 = vpop.f32.mrf.mxu0 }
0x2629   : > { %v6172_v61 = vmul.f32 0.35355338, %v6168_v60 }
0x262a   : > { %v10806_v62 = vpop.f32.mrf.mxu0 }
0x262b   : > { %v6173_v26 = vsel %vm2393_vm2, %v6172_v61, -inf }
0x262c   : > { %6174 = vmax.xlane.f32.xlu1 %v6173_v26 }
0x269b   : > { %v6334_v63 = vpop.f32.mrf.mxu0 }
0x269c   : > { %v6338_v1 = vmul.f32 0.35355338, %v6334_v63 }
0x269d   : > { %v10816_v2 = vpop.f32.mrf.mxu0 }
0x269e   : > { %v6339_v3 = vsel %vm2393_vm2, %v6338_v1, -inf }
0x269f   : > { %6340 = vmax.xlane.f32.xlu0 %v6339_v3 }
0x26b5   : > { %v6175_v4 = vpop.xlane.xlu1 %6174  ;;  %6184 = vrot.lane.b32.xlu0 %v13275_v36, %s13890_s5 }
0x26b6   : > { %v6176_v6 = vsub.f32 %v6172_v61, %v6175_v4 }
0x26b8   : > { %v6177_v7 = vmul.f32 1.442695, %v6176_v6 }
0x26ba   : > { %11463 = vpow2.f32 %v6177_v7 }
0x26c7   : > { %v11464_v9 = vpop.eup %11463 }
0x26c8   : > { %v6179_v10 = vsel %vm2393_vm2, %v11464_v9, 0.0 }
0x26c9   : > { %6180 = vadd.xlane.f32.xlu1 %v6179_v10 }
0x2728   : > { %v6341_v11 = vpop.xlane.xlu0 %6340 }
0x2729   : > { %v6342_v12 = vsub.f32 %v6338_v1, %v6341_v11  ;;  %v2180_v1 = vld [vmem:[%s13901_s13 + $0x18] sm:$0xff]  ;;  %s13904_s13 = sld [smem:[#allocation58_spill]] }
0x272b   : > { %v6343_v13 = vmul.f32 1.442695, %v6342_v12 }
0x272c   : > { %v6185_v14 = vpop.permute.xlu0 %6184 }
0x272d   : > { %11465 = vpow2.f32 %v6343_v13  ;;  %10808 = vmatpush3.msra.mxu1 %v6185_v14  ;;  %v10203_v13 = vld [vmem:[%s13902_s9] ss:$0 sm:$0xff]  ;;  %s13905_s9 = sld [smem:[#allocation62_spill]] }
0x272e   : > { %10817 = vmatprep.subr.mxu1 %v12262_v0 }
0x273a   : > { %v11466_v15 = vpop.eup %11465 }
0x273b   : > { %v6345_v17 = vsel %vm2393_vm2, %v11466_v15, 0.0 }
0x273c   : > { %6346 = vadd.xlane.f32.xlu1 %v6345_v17 }
0x274d   : > { %6350 = vrot.lane.b32.xlu1 %v13275_v36, %s13889_s4 }
0x2751   : > { %6574 = vrot.lane.b32.xlu1 %v13275_v36, %s13893_s8 }
0x2752   : > { %v6181_v18 = vpop.xlane.xlu1 %6180 }
0x2753   : > { %11467 = vrcp.f32 %v6181_v18 }
0x2755   : > { %6572 = vrot.lane.b32.xlu1 %v13282_v16, %s13893_s8 }
0x2760   : > { %v11468_v19 = vpop.eup %11467 }
0x2761   : > { %v6183_v20 = vmul.f32 %v11468_v19, %v11464_v9 }
0x2763   : > { %10810 = vmatmul.mubr.msk.f32.vlgmr.msra.gmra.mxu1 %vm2393_vm2, %v6183_v20 }
0x2764   : > { %10819 = vmatprep.mubr.msk.f32.mxu1 %vm12263_vm0, %v12262_v0 }
0x27c5   : > { %v6347_v8 = vpop.xlane.xlu1 %6346 }
0x27c6   : > { %11469 = vrcp.f32 %v6347_v8 }
0x27c9   : > { %v6351_v22 = vpop.permute.xlu1 %6350 }
0x27ca   : > { %10818 = vmatpush3.msra.mxu1 %v6351_v22 }
0x27cb   : > { %10827 = vmatprep.subr.mxu1 %v12262_v0 }
0x27cd   : > { %v6575_v28 = vpop.permute.xlu1 %6574 }
0x27d1   : > { %v6573_v33 = vpop.permute.xlu1 %6572 }
0x27d3   : > { %v11470_v23 = vpop.eup %11469 }
0x27d4   : > { %v6349_v5 = vmul.f32 %v11470_v23, %v11466_v15 }
0x27d6   : > { %10820 = vmatmul.mubr.msk.f32.vlgmr.msra.gmra.mxu1 %vm2393_vm2, %v6349_v5 }
0x27d7   : > { %10828 = vmatpush3.msra.mxu1 %v2177_v24  ;;  %10829 = vmatprep.mubr.msk.f32.mxu1 %vm12263_vm0, %v12262_v0  ;;  %v2185_v24 = vld [vmem:[%s13903_s1 + $0x18] sm:$0xff] }
0x27d8   : > { %10837 = vmatprep.subr.mxu1 %v12262_v0 }
0x2823   : > { %v6256_v25 = vpop.f32.mrf.mxu1 }
0x2824   : > { %10830 = vmatmul.mubr.msk.f32.vlgmr.msra.gmra.mxu1 %vm2393_vm2, %v6256_v25  ;;  %v2184_v25 = vld [vmem:[%s13903_s1 + $0x10] sm:$0xff] }
0x2825   : > { %v10811_v27 = vpop.f32.mrf.mxu1  ;;  %10839 = vmatprep.mubr.msk.f32.mxu1 %vm12263_vm0, %v12262_v0 }
0x2826   : > { %v2182_v27 = vld [vmem:[%s13903_s1] sm:$0xff] }
0x2896   : > { %v6422_v30 = vpop.f32.mrf.mxu1 }
0x2897   : > { %10825 = vmatmul.mubr.msk.f32.vlgmr.msra.gmra.mxu0 %vm2393_vm2, %v6422_v30  ;;  %v2193_v30 = vld [vmem:[%s13904_s13 + $0x30] sm:$0xff] }
0x2898   : > { %10833 = vmatpush3.xpose.msk.msra.mxu0 %vm2393_vm2, %v6575_v28  ;;  %v10821_v32 = vpop.f32.mrf.mxu1  ;;  %10834 = vmatprep.mubr.msk.f32.mxu0 %vm12263_vm0, %v12262_v0  ;;  %v2194_v28 = vld [vmem:[%s13904_s13 + $0x38] sm:$0xff] }
0x2899   : > { %10842 = vmatprep.subr.mxu0 %v12262_v0  ;;  %v2192_v32 = vld [vmem:[%s13904_s13 + $0x28] sm:$0xff] }
0x289b   : > { %10835 = vmatmul.mubr.msk.f32.vlgmr.msra.gmra.mxu0 %vm2393_vm2, %v6573_v33  ;;  %v2191_v33 = vld [vmem:[%s13904_s13 + $0x20] sm:$0xff] }
0x289c   : > { %10844 = vmatprep.mubr.msk.f32.mxu0 %vm12263_vm0, %v12262_v0  ;;  %10843 = vmatpush3.msra.mxu0 %v2179_v54 }
0x289d   : > { %10852 = vmatprep.subr.mxu0 %v12262_v0 }
0x28e4   : > { %v6568_v34 = vpop.f32.mrf.mxu1 }
0x28e6   : > { %v10831_v35 = vpop.f32.mrf.mxu1 }
0x2957   : > { %v6495_v37 = vpop.f32.mrf.mxu0 }
0x2958   : > { %v6569_v2 = vadd.f32 %v6568_v34, %v6495_v37  ;;  %v2190_v34 = vld [vmem:[%s13904_s13 + $0x18] sm:$0xff] }
0x2959   : > { %v10826_v38 = vpop.f32.mrf.mxu0 }
0x295b   : > { %v6646_v39 = vpop.f32.mrf.mxu0 }
0x295c   : > { %v6650_v40 = vmul.f32 0.35355338, %v6646_v39 }
0x295d   : > { %v10836_v41 = vpop.f32.mrf.mxu0 }
0x295e   : > { %v6651_v42 = vsel %vm2393_vm2, %v6650_v40, -inf }
0x295f   : > { %6652 = vmax.xlane.f32.xlu0 %v6651_v42  ;;  %v10205_v42 = vld [vmem:[%s13906_s14] ss:$0 sm:$0xff]  ;;  %s13909_s14 = sld [smem:[#allocation85_spill]] }
0x2975   : > { %6662 = vrot.lane.b32.xlu0 %v13275_v36, %s13881_s0 }
0x2979   : > { %6812 = vrot.lane.b32.xlu0 %v13282_v16, %s13882_s3 }
0x29e8   : > { %v6653_v43 = vpop.xlane.xlu0 %6652 }
0x29e9   : > { %v6654_v45 = vsub.f32 %v6650_v40, %v6653_v43  ;;  %v10204_v40 = vld [vmem:[%s13905_s9] ss:$0 sm:$0xff]  ;;  %s13916_s9 = sld [smem:[#allocation77_spill]] }
0x29eb   : > { %v6655_v46 = vmul.f32 1.442695, %v6654_v45 }
0x29ec   : > { %v6663_v47 = vpop.permute.xlu0 %6662 }
0x29ed   : > { %11471 = vpow2.f32 %v6655_v46  ;;  %10838 = vmatpush3.msra.mxu1 %v6663_v47  ;;  %v2189_v46 = vld [vmem:[%s13904_s13 + $0x10] sm:$0xff]  ;;  %v2188_v47 = vld [vmem:[%s13904_s13 + $0x8] sm:$0xff] }
0x29ee   : > { %10847 = vmatprep.subr.mxu1 %v12262_v0 }
0x29f0   : > { %v6813_v53 = vpop.permute.xlu0 %6812 }
0x29fa   : > { %v11472_v29 = vpop.eup %11471 }
0x29fb   : > { %v6657_v31 = vsel %vm2393_vm2, %v11472_v29, 0.0 }
0x29fc   : > { %6658 = vadd.xlane.f32.xlu1 %v6657_v31 }
0x2a0d   : > { %6814 = vrot.lane.b32.xlu1 %v13275_v36, %s13882_s3 }
0x2a85   : > { %v6659_v48 = vpop.xlane.xlu1 %6658 }
0x2a86   : > { %11473 = vrcp.f32 %v6659_v48 }
0x2a89   : > { %v6815_v51 = vpop.permute.xlu1 %6814 }
0x2a93   : > { %v11474_v49 = vpop.eup %11473 }
0x2a94   : > { %v6661_v50 = vmul.f32 %v11474_v49, %v11472_v29  ;;  %v2187_v29 = vld [vmem:[%s13904_s13] sm:$0xff] }
0x2a96   : > { %10840 = vmatmul.mubr.msk.f32.vlgmr.msra.gmra.mxu1 %vm2393_vm2, %v6661_v50 }
0x2a97   : > { %10848 = vmatpush3.xpose.msk.msra.mxu1 %vm2393_vm2, %v6815_v51  ;;  %10849 = vmatprep.mubr.msk.f32.mxu1 %vm12263_vm0, %v12262_v0 }
0x2a98   : > { %10857 = vmatprep.subr.mxu1 %v12262_v0 }
0x2a9a   : > { %10850 = vmatmul.mubr.msk.f32.vlgmr.msra.gmra.mxu1 %vm2393_vm2, %v6813_v53  ;;  %v10208_v53 = vld [vmem:[%s13908_s16] ss:$0 sm:$0xff]  ;;  %s13911_s16 = sld [smem:[#allocation63_spill]] }
0x2a9b   : > { %10859 = vmatprep.mubr.msk.f32.mxu1 %vm12263_vm0, %v12262_v0  ;;  %10858 = vmatpush3.msra.mxu1 %v2180_v1  ;;  %v2244_v1 = vld [vmem:[%s13909_s14 + $0x8] sm:$0xff] }
0x2a9c   : > { %10873 = vmatprep.subr.mxu1 %v12262_v0 }
0x2b56   : > { %v6734_v55 = vpop.f32.mrf.mxu1 }
0x2b57   : > { %10845 = vmatmul.mubr.msk.f32.vlgmr.msra.gmra.mxu0 %vm2393_vm2, %v6734_v55 }
0x2b58   : > { %v10841_v56 = vpop.f32.mrf.mxu1  ;;  %10854 = vmatprep.mubr.msk.f32.mxu0 %vm12263_vm0, %v12262_v0 }
0x2b5a   : > { %v6886_v16 = vpop.f32.mrf.mxu1 }
0x2b5b   : > { %v6890_v57 = vmul.f32 0.35355338, %v6886_v16 }
0x2b5c   : > { %v10851_v58 = vpop.f32.mrf.mxu1 }
0x2b5d   : > { %v6891_v59 = vsel %vm2393_vm2, %v6890_v57, -inf }
0x2b5e   : > { %6892 = vmax.xlane.f32.xlu1 %v6891_v59 }
0x2be7   : > { %v6893_v60 = vpop.xlane.xlu1 %6892 }
0x2be8   : > { %v6894_v61 = vsub.f32 %v6890_v57, %v6893_v60 }
0x2bea   : > { %v6895_v62 = vmul.f32 1.442695, %v6894_v61 }
0x2bec   : > { %11475 = vpow2.f32 %v6895_v62 }
0x2bf9   : > { %v11476_v26 = vpop.eup %11475 }
0x2bfa   : > { %v6897_v63 = vsel %vm2393_vm2, %v11476_v26, 0.0 }
0x2bfb   : > { %6898 = vadd.xlane.f32.xlu0 %v6897_v63  ;;  %v2245_v63 = vld [vmem:[%s13909_s14 + $0x10] sm:$0xff] }
0x2c11   : > { %6902 = vrot.lane.b32.xlu0 %v13275_v36, %s13883_s19 }
0x2c17   : > { %v6807_v3 = vpop.f32.mrf.mxu0 }
0x2c18   : > { %v6811_v4 = vadd.f32 %v6807_v3, %v6569_v2  ;;  %v2243_v2 = vld [vmem:[%s13909_s14] sm:$0xff] }
0x2c19   : > { %v10846_v6 = vpop.f32.mrf.mxu0 }
0x2c84   : > { %v6899_v7 = vpop.xlane.xlu0 %6898 }
0x2c85   : > { %11477 = vrcp.f32 %v6899_v7 }
0x2c88   : > { %v6903_v9 = vpop.permute.xlu0 %6902 }
0x2c89   : > { %10853 = vmatpush3.msra.mxu0 %v6903_v9 }
0x2c8a   : > { %10862 = vmatprep.subr.mxu0 %v12262_v0 }
0x2c92   : > { %v11478_v10 = vpop.eup %11477 }
0x2c93   : > { %v6901_v11 = vmul.f32 %v11478_v10, %v11476_v26  ;;  %v2246_v26 = vld [vmem:[%s13909_s14 + $0x18] sm:$0xff] }
0x2c95   : > { %10855 = vmatmul.mubr.msk.f32.vlgmr.msra.gmra.mxu0 %vm2393_vm2, %v6901_v11  ;;  %v10211_v11 = vld [vmem:[%s13911_s16] ss:$0 sm:$0xff]  ;;  %s13925_s16 = sld [smem:[#allocation81_spill]] }
0x2c96   : > { %10870 = vmatprep.mubr.msk.f32.mxu0 %vm12263_vm0, %v12262_v0  ;;  %10863 = vmatpush3.msra.mxu0 %v2185_v24 }
0x2c97   : > { %10864 = vmatprep.subr.mxu0 %v12262_v0 }
0x2c98   : > { %10865 = vmatpush3.msra.mxu0 %v2184_v25 }
0x2c99   : > { %10866 = vmatprep.subr.mxu0 %v12262_v0 }
0x2d55   : > { %v6974_v36 = vpop.f32.mrf.mxu0 }
0x2d56   : > { %10860 = vmatmul.mubr.msk.f32.vlgmr.msra.gmra.mxu1 %vm2393_vm2, %v6974_v36 }
0x2d57   : > { %v10856_v12 = vpop.f32.mrf.mxu0  ;;  %10889 = vmatprep.mubr.msk.f32.mxu1 %vm12263_vm0, %v12262_v0  ;;  %10874 = vmatpush3.msra.mxu1 %v2194_v28 }
0x2d58   : > { %10875 = vmatprep.subr.mxu1 %v12262_v0 }
0x2d59   : > { %10876 = vmatpush3.msra.mxu1 %v2193_v30 }
0x2d5a   : > { %10877 = vmatprep.subr.mxu1 %v12262_v0 }
0x2d5b   : > { %10878 = vmatpush3.msra.mxu1 %v2192_v32 }
0x2d5c   : > { %10879 = vmatprep.subr.mxu1 %v12262_v0 }
0x2d5d   : > { %10880 = vmatpush3.msra.mxu1 %v2191_v33 }
0x2d5e   : > { %10881 = vmatprep.subr.mxu1 %v12262_v0 }
0x2d5f   : > { %10882 = vmatpush3.msra.mxu1 %v2190_v34 }
0x2d60   : > { %10883 = vmatprep.subr.mxu1 %v12262_v0 }
0x2d61   : > { %10884 = vmatpush3.msra.mxu1 %v2189_v46 }
0x2d62   : > { %10885 = vmatprep.subr.mxu1 %v12262_v0 }
0x2d63   : > { %10886 = vmatpush3.msra.mxu1 %v2188_v47 }
0x2d64   : > { %10887 = vmatprep.subr.mxu1 %v12262_v0 }
0x2d65   : > { %10888 = vmatpush3.msra.mxu1 %v2187_v29 }
0x2d66   : > { %10908 = vmatprep.subr.mxu1 %v12262_v0 }
0x2e16   : > { %v7047_v14 = vpop.f32.mrf.mxu1 }
0x2e17   : > { %v7051_v15 = vadd.f32 %v7047_v14, %v6811_v4 }
0x2e18   : > { %v10861_v17 = vpop.f32.mrf.mxu1 }
0x2e19   : > { %v7058_v18 = vadd.f32 %v10203_v13, %v7051_v15  ;;  %v10212_v13 = vld [vmem:[#allocation5] ss:$0 sm:$0xff] }
0x2e1b   : > { %v7059_v19 = vadd.f32 %v7058_v18, %v13269_v52  ;;  %v2183_v52 = vld [vmem:[%s13903_s1 + $0x8] sm:$0xff]  ;;  %s13907_s1 = sld [smem:[#allocation55_spill]] }
0x2e1c   : > { %10867 = vmatpush3.msra.mxu0 %v2183_v52 }
0x2e1d   : > { %v7060_v20 = vsel %vm2316_vm1, %v7059_v19, 0.0  ;;  %10868 = vmatprep.subr.mxu0 %v12262_v0 }
0x2e1e   : > { %7061 = vadd.xlane.f32.xlu1 %v7060_v20  ;;  %10869 = vmatpush3.msra.mxu0 %v2182_v27 }
0x2e1f   : > { %10892 = vmatprep.subr.mxu0 %v12262_v0 }
0x2e21   : > { %v10206_v31 = vld [vmem:[%s13907_s1] ss:$0 sm:$0xff]  ;;  %s13910_s1 = sld [smem:[#allocation64_spill]] }
0x2e27   : > { %v10210_v9 = vld [vmem:[%s13910_s1] ss:$0 sm:$0xff]  ;;  %s13924_s1 = sld [smem:[#allocation75_spill]] }
0x2ea7   : > { %v7062_v21 = vpop.xlane.xlu1 %7061 }
0x2ea8   : > { %v7063_v8 = vmul.f32 0.03125, %v7062_v21 }
0x2eaa   : > { %v7064_v22 = vsub.f32 %v7059_v19, %v7063_v8 }
0x2eac   : > { %v7065_v23 = vmul.f32 %v7064_v22, %v7064_v22 }
0x2eae   : > { %v7066_v5 = vsel %vm2316_vm1, %v7065_v23, 0.0 }
0x2eaf   : > { %7067 = vadd.xlane.f32.xlu1 %v7066_v5 }
0x2f38   : > { %v7068_v35 = vpop.xlane.xlu1 %7067 }
0x2f39   : > { %v7069_v37 = vmul.f32 0.03125, %v7068_v35 }
0x2f3b   : > { %v7070_v38 = vadd.f32 1e-05, %v7069_v37 }
0x2f3d   : > { %11479 = vrsqrt.f32 %v7070_v38 }
0x2f4a   : > { %v11480_v39 = vpop.eup %11479 }
0x2f4b   : > { %v7072_v41 = vmul.f32 %v11480_v39, %v7064_v22 }
0x2f4d   : > { %v7079_v43 = vmul.f32 %v10204_v40, %v7072_v41 }
0x2f4f   : > { %v7086_v45 = vadd.f32 %v10205_v42, %v7079_v43 }
0x2f51   : > { %10871 = vmatmul.mubr.msk.f32.vlgmr.msra.gmra.mxu0 %vm2316_vm1, %v7086_v45 }
0x2f52   : > { %10900 = vmatprep.mubr.msk.f32.mxu0 %vm12263_vm0, %v12262_v0  ;;  %10893 = vmatpush3.msra.mxu0 %v2246_v26 }
0x2f53   : > { %10894 = vmatprep.subr.mxu0 %v12262_v0 }
0x2f54   : > { %10895 = vmatpush3.msra.mxu0 %v2245_v63 }
0x2f55   : > { %10896 = vmatprep.subr.mxu0 %v12262_v0 }
0x2f56   : > { %10897 = vmatpush3.msra.mxu0 %v2244_v1 }
0x2f57   : > { %10898 = vmatprep.subr.mxu0 %v12262_v0 }
0x2f58   : > { %10899 = vmatpush3.msra.mxu0 %v2243_v2 }
0x2f59   : > { %10903 = vmatprep.subr.mxu0 %v12262_v0 }
0x3011   : > { %v7162_v48 = vpop.f32.mrf.mxu0 }
0x3012   : > { %v7163_v49 = vadd.f32 %v10206_v31, %v7162_v48 }
0x3013   : > { %v10872_v50 = vpop.f32.mrf.mxu0 }
0x3014   : > { %v7166_v51 = vmax.f32 %v7163_v49, 0.0 }
0x3016   : > { %10890 = vmatmul.mubr.msk.f32.vlgmr.msra.gmra.mxu1 %vm3470_vm3, %v7166_v51 }
0x3017   : > { %10910 = vmatprep.mubr.msk.f32.mxu1 %vm12263_vm0, %v12262_v0 }
0x30d6   : > { %v7242_v54 = vpop.f32.mrf.mxu1 }
0x30d7   : > { %v7243_v55 = vadd.f32 %v10208_v53, %v7242_v54 }
0x30d8   : > { %v10891_v56 = vpop.f32.mrf.mxu1 }
0x30d9   : > { %v7246_v16 = vadd.f32 %v7243_v55, %v7086_v45 }
0x30db   : > { %v7247_v57 = vsel %vm2316_vm1, %v7246_v16, 0.0 }
0x30dc   : > { %7248 = vadd.xlane.f32.xlu1 %v7247_v57 }
0x3165   : > { %v7249_v58 = vpop.xlane.xlu1 %7248 }
0x3166   : > { %v7250_v59 = vmul.f32 0.03125, %v7249_v58 }
0x3168   : > { %v7251_v60 = vsub.f32 %v7246_v16, %v7250_v59 }
0x316a   : > { %v7252_v61 = vmul.f32 %v7251_v60, %v7251_v60 }
0x316c   : > { %v7253_v62 = vsel %vm2316_vm1, %v7252_v61, 0.0 }
0x316d   : > { %7254 = vadd.xlane.f32.xlu1 %v7253_v62 }
0x31f6   : > { %v7255_v3 = vpop.xlane.xlu1 %7254 }
0x31f7   : > { %v7256_v4 = vmul.f32 0.03125, %v7255_v3 }
0x31f9   : > { %v7257_v6 = vadd.f32 1e-05, %v7256_v4 }
0x31fb   : > { %11481 = vrsqrt.f32 %v7257_v6 }
0x3208   : > { %v11482_v7 = vpop.eup %11481 }
0x3209   : > { %v7259_v10 = vmul.f32 %v11482_v7, %v7251_v60 }
0x320b   : > { %v7266_v36 = vmul.f32 %v10210_v9, %v7259_v10 }
0x320d   : > { %v13415_v12 = vadd.f32 %v10211_v11, %v7266_v36 }
0x320f   : > { %10901 = vmatmul.mubr.msk.f32.vlgmr.msra.gmra.mxu0 %vm2316_vm1, %v13415_v12 }
0x3210   : > { %10905 = vmatprep.mubr.msk.f32.mxu0 %vm12263_vm0, %v12262_v0 }
0x32cf   : > { %v7349_v14 = vpop.f32.mrf.mxu0 }
0x32d0   : > { %v13421_v15 = vadd.f32 %v10212_v13, %v7349_v14 }
0x32d1   : > { %v10902_v17 = vpop.f32.mrf.mxu0 }
0x32d2   : > { %7520 = vrot.lane.b32.xlu0 %v13421_v15, %s13889_s4  ;;  %7354 = vrot.lane.b32.xlu1 %v13421_v15, %s13890_s5 }
0x32d6   : > { %7518 = vrot.lane.b32.xlu0 %v13421_v15, %s13891_s6 }
0x3344   : > { %v7355_v18 = vpop.permute.xlu1 %7354  ;;  %v7521_v19 = vpop.permute.xlu0 %7520 }
0x3345   : > { %10904 = vmatpush3.xpose.msk.msra.mxu0 %vm2393_vm2, %v7355_v18 }
0x3346   : > { %10913 = vmatprep.subr.mxu0 %v12262_v0 }
0x3348   : > { %10906 = vmatmul.mubr.msk.f32.vlgmr.msra.gmra.mxu0 %vm2393_vm2, %v13421_v15  ;;  %v7519_v20 = vpop.permute.xlu0 %7518 }
0x3349   : > { %10914 = vmatpush3.xpose.msk.msra.mxu0 %vm2393_vm2, %v7521_v19  ;;  %10915 = vmatprep.mubr.msk.f32.mxu0 %vm12263_vm0, %v12262_v0 }
0x334a   : > { %10923 = vmatprep.subr.mxu0 %v12262_v0 }
0x334c   : > { %10916 = vmatmul.mubr.msk.f32.vlgmr.msra.gmra.mxu0 %vm2393_vm2, %v7519_v20 }
0x334d   : > { %10925 = vmatprep.mubr.msk.f32.mxu0 %vm12263_vm0, %v12262_v0 }
0x3408   : > { %v7426_v21 = vpop.f32.mrf.mxu0 }
0x3409   : > { %v7430_v8 = vmul.f32 0.35355338, %v7426_v21 }
0x340a   : > { %v10907_v22 = vpop.f32.mrf.mxu0 }
0x340b   : > { %v7431_v23 = vsel %vm2393_vm2, %v7430_v8, -inf }
0x340c   : > { %7432 = vmax.xlane.f32.xlu0 %v7431_v23  ;;  %v7592_v5 = vpop.f32.mrf.mxu0 }
0x340d   : > { %v7596_v24 = vmul.f32 0.35355338, %v7592_v5 }
0x340e   : > { %v10917_v25 = vpop.f32.mrf.mxu0 }
0x340f   : > { %v7597_v52 = vsel %vm2393_vm2, %v7596_v24, -inf }
0x3410   : > { %7598 = vmax.xlane.f32.xlu1 %v7597_v52 }
0x3421   : > { %7608 = vrot.lane.b32.xlu1 %v13421_v15, %s13892_s2  ;;  %s13912_s2 = sld [smem:[#allocation86_spill]] }
0x3425   : > { %7832 = vrot.lane.b32.xlu1 %v13421_v15, %s13881_s0 }
0x3427   : > { %v2247_v31 = vld [vmem:[%s13912_s2] sm:$0xff]  ;;  %v2248_v48 = vld [vmem:[%s13912_s2 + $0x8] sm:$0xff]  ;;  %v2249_v13 = vld [vmem:[%s13912_s2 + $0x10] sm:$0xff] }
0x3428   : > { %10924 = vmatpush3.msra.mxu0 %v2248_v48  ;;  %v2250_v52 = vld [vmem:[%s13912_s2 + $0x18] sm:$0xff] }
0x3429   : > { %10933 = vmatprep.subr.mxu0 %v12262_v0 }
0x3495   : > { %v7433_v27 = vpop.xlane.xlu0 %7432 }
0x3496   : > { %v7434_v28 = vsub.f32 %v7430_v8, %v7433_v27 }
0x3498   : > { %v7435_v30 = vmul.f32 1.442695, %v7434_v28 }
0x3499   : > { %v7599_v32 = vpop.xlane.xlu1 %7598 }
0x349a   : > { %11483 = vpow2.f32 %v7435_v30  ;;  %v7600_v33 = vsub.f32 %v7596_v24, %v7599_v32 }
0x349c   : > { %v7601_v34 = vmul.f32 1.442695, %v7600_v33 }
0x349d   : > { %v7609_v46 = vpop.permute.xlu1 %7608 }
0x349e   : > { %11485 = vpow2.f32 %v7601_v34 }
0x34a1   : > { %v7833_v53 = vpop.permute.xlu1 %7832 }
0x34a7   : > { %v11484_v35 = vpop.eup %11483 }
0x34a8   : > { %v7437_v37 = vsel %vm2393_vm2, %v11484_v35, 0.0 }
0x34a9   : > { %7438 = vadd.xlane.f32.xlu0 %v7437_v37  ;;  %v10230_v37 = vld [vmem:[#allocation7] ss:$0 sm:$0xff] }
0x34ab   : > { %v11486_v38 = vpop.eup %11485 }
0x34ac   : > { %v7603_v39 = vsel %vm2393_vm2, %v11486_v38, 0.0 }
0x34ad   : > { %7604 = vadd.xlane.f32.xlu0 %v7603_v39 }
0x34c3   : > { %7442 = vrot.lane.b32.xlu0 %v13421_v15, %s13880_s11  ;;  %s13915_s11 = sld [smem:[#allocation78_spill]] }
0x34c7   : > { %7830 = vrot.lane.b32.xlu0 %v13421_v15, %s13893_s8 }
0x3532   : > { %v7439_v40 = vpop.xlane.xlu0 %7438 }
0x3533   : > { %11487 = vrcp.f32 %v7439_v40 }
0x3536   : > { %v7605_v41 = vpop.xlane.xlu0 %7604 }
0x3537   : > { %11489 = vrcp.f32 %v7605_v41 }
0x353a   : > { %v7443_v42 = vpop.permute.xlu0 %7442 }
0x353b   : > { %10909 = vmatpush3.msra.mxu1 %v7443_v42 }
0x353c   : > { %10918 = vmatprep.subr.mxu1 %v12262_v0 }
0x353e   : > { %v7831_v55 = vpop.permute.xlu0 %7830 }
0x3540   : > { %v11488_v43 = vpop.eup %11487 }
0x3541   : > { %v7441_v45 = vmul.f32 %v11488_v43, %v11484_v35 }
0x3543   : > { %10911 = vmatmul.mubr.msk.f32.vlgmr.msra.gmra.mxu1 %vm2393_vm2, %v7441_v45 }
0x3544   : > { %v11490_v47 = vpop.eup %11489  ;;  %10919 = vmatpush3.msra.mxu1 %v7609_v46  ;;  %10920 = vmatprep.mubr.msk.f32.mxu1 %vm12263_vm0, %v12262_v0 }
0x3545   : > { %v7607_v29 = vmul.f32 %v11490_v47, %v11486_v38  ;;  %10928 = vmatprep.subr.mxu1 %v12262_v0 }
0x3547   : > { %10921 = vmatmul.mubr.msk.f32.vlgmr.msra.gmra.mxu1 %vm2393_vm2, %v7607_v29 }
0x3548   : > { %10930 = vmatprep.mubr.msk.f32.mxu1 %vm12263_vm0, %v12262_v0  ;;  %10929 = vmatpush3.msra.mxu1 %v2247_v31 }
0x3549   : > { %10938 = vmatprep.subr.mxu1 %v12262_v0 }
0x3603   : > { %v7514_v49 = vpop.f32.mrf.mxu1 }
0x3604   : > { %10931 = vmatmul.mubr.msk.f32.vlgmr.msra.gmra.mxu1 %vm2393_vm2, %v7514_v49 }
0x3605   : > { %v10912_v50 = vpop.f32.mrf.mxu1  ;;  %10940 = vmatprep.mubr.msk.f32.mxu1 %vm12263_vm0, %v12262_v0 }
0x3607   : > { %v7680_v51 = vpop.f32.mrf.mxu1 }
0x3608   : > { %10926 = vmatmul.mubr.msk.f32.vlgmr.msra.gmra.mxu0 %vm2393_vm2, %v7680_v51 }
0x3609   : > { %10934 = vmatpush3.xpose.msk.msra.mxu0 %vm2393_vm2, %v7833_v53  ;;  %v10922_v54 = vpop.f32.mrf.mxu1  ;;  %10935 = vmatprep.mubr.msk.f32.mxu0 %vm12263_vm0, %v12262_v0 }
0x360a   : > { %10943 = vmatprep.subr.mxu0 %v12262_v0 }
0x360c   : > { %10936 = vmatmul.mubr.msk.f32.vlgmr.msra.gmra.mxu0 %vm2393_vm2, %v7831_v55 }
0x360d   : > { %10945 = vmatprep.mubr.msk.f32.mxu0 %vm12263_vm0, %v12262_v0  ;;  %10944 = vmatpush3.msra.mxu0 %v2249_v13 }
0x360e   : > { %10953 = vmatprep.subr.mxu0 %v12262_v0 }
0x36c4   : > { %v7826_v56 = vpop.f32.mrf.mxu1 }
0x36c6   : > { %v10932_v16 = vpop.f32.mrf.mxu1 }
0x36c8   : > { %v7753_v57 = vpop.f32.mrf.mxu0 }
0x36c9   : > { %v7827_v58 = vadd.f32 %v7826_v56, %v7753_v57 }
0x36ca   : > { %v10927_v59 = vpop.f32.mrf.mxu0 }
0x36cc   : > { %v7904_v60 = vpop.f32.mrf.mxu0 }
0x36cd   : > { %v7908_v61 = vmul.f32 0.35355338, %v7904_v60  ;;  %v10231_v60 = vld [vmem:[%s13915_s11] ss:$0 sm:$0xff]  ;;  %s13927_s11 = sld [smem:[#allocation49_spill]] }
0x36ce   : > { %v10937_v62 = vpop.f32.mrf.mxu0 }
0x36cf   : > { %v7909_v26 = vsel %vm2393_vm2, %v7908_v61, -inf  ;;  %v10232_v62 = vld [vmem:[%s13916_s9] ss:$0 sm:$0xff]  ;;  %s2162_s9 = sand.u32 1, %s12166_s10  }
0x36d0   : > { %7910 = vmax.xlane.f32.xlu1 %v7909_v26 }
0x36e1   : > { %8072 = vrot.lane.b32.xlu1 %v13421_v15, %s13883_s19 }
0x36e5   : > { %8070 = vrot.lane.b32.xlu1 %v13421_v15, %s13882_s3 }
0x3759   : > { %v7911_v63 = vpop.xlane.xlu1 %7910 }
0x375a   : > { %v7912_v1 = vsub.f32 %v7908_v61, %v7911_v63 }
0x375c   : > { %v7913_v2 = vmul.f32 1.442695, %v7912_v1 }
0x375d   : > { %v8073_v10 = vpop.permute.xlu1 %8072 }
0x375e   : > { %11491 = vpow2.f32 %v7913_v2 }
0x3761   : > { %v8071_v36 = vpop.permute.xlu1 %8070 }
0x376b   : > { %v11492_v3 = vpop.eup %11491 }
0x376c   : > { %v7915_v4 = vsel %vm2393_vm2, %v11492_v3, 0.0 }
0x376d   : > { %7916 = vadd.xlane.f32.xlu0 %v7915_v4 }
0x3783   : > { %7920 = vrot.lane.b32.xlu0 %v13421_v15, %s13895_s12  ;;  %s13913_s12 = sld [smem:[#allocation71_spill]] }
0x3789   : > { %v2215_v45 = vld [vmem:[%s13913_s12 + $0x10] sm:$0xff]  ;;  %v2216_v46 = vld [vmem:[%s13913_s12 + $0x18] sm:$0xff]  ;;  %v2214_v47 = vld [vmem:[%s13913_s12 + $0x8] sm:$0xff] }
0x378a   : > { %v2213_v29 = vld [vmem:[%s13913_s12] sm:$0xff] }
0x37f6   : > { %v7917_v6 = vpop.xlane.xlu0 %7916 }
0x37f7   : > { %11493 = vrcp.f32 %v7917_v6 }
0x37fa   : > { %v7921_v7 = vpop.permute.xlu0 %7920 }
0x37fb   : > { %10939 = vmatpush3.msra.mxu1 %v7921_v7 }
0x37fc   : > { %10948 = vmatprep.subr.mxu1 %v12262_v0 }
0x3804   : > { %v11494_v9 = vpop.eup %11493 }
0x3805   : > { %v7919_v11 = vmul.f32 %v11494_v9, %v11492_v3 }
0x3807   : > { %10941 = vmatmul.mubr.msk.f32.vlgmr.msra.gmra.mxu1 %vm2393_vm2, %v7919_v11 }
0x3808   : > { %10949 = vmatpush3.xpose.msk.msra.mxu1 %vm2393_vm2, %v8073_v10  ;;  %10950 = vmatprep.mubr.msk.f32.mxu1 %vm12263_vm0, %v12262_v0 }
0x3809   : > { %10958 = vmatprep.subr.mxu1 %v12262_v0 }
0x380b   : > { %10951 = vmatmul.mubr.msk.f32.vlgmr.msra.gmra.mxu1 %vm2393_vm2, %v8071_v36 }
0x380c   : > { %10960 = vmatprep.mubr.msk.f32.mxu1 %vm12263_vm0, %v12262_v0  ;;  %10959 = vmatpush3.msra.mxu1 %v2250_v52 }
0x380d   : > { %10974 = vmatprep.subr.mxu1 %v12262_v0 }
0x38c7   : > { %v7992_v14 = vpop.f32.mrf.mxu1 }
0x38c8   : > { %10946 = vmatmul.mubr.msk.f32.vlgmr.msra.gmra.mxu0 %vm2393_vm2, %v7992_v14 }
0x38c9   : > { %v10942_v17 = vpop.f32.mrf.mxu1  ;;  %10955 = vmatprep.mubr.msk.f32.mxu0 %vm12263_vm0, %v12262_v0 }
0x38cb   : > { %v8144_v18 = vpop.f32.mrf.mxu1 }
0x38cc   : > { %v8148_v19 = vmul.f32 0.35355338, %v8144_v18 }
0x38cd   : > { %v10952_v20 = vpop.f32.mrf.mxu1 }
0x38ce   : > { %v8149_v21 = vsel %vm2393_vm2, %v8148_v19, -inf }
0x38cf   : > { %8150 = vmax.xlane.f32.xlu0 %v8149_v21 }
0x38e5   : > { %8160 = vrot.lane.b32.xlu0 %v13421_v15, %s13884_s7  ;;  %s13914_s7 = sld [smem:[#allocation69_spill]] }
0x38e9   : > { %8432 = vrot.lane.b32.xlu0 %v2215_v45, %s13890_s5 }
0x38eb   : > { %v10233_v51 = vld [vmem:[%s13914_s7] ss:$0 sm:$0xff]  ;;  %s13926_s7 = sld [smem:[#allocation50_spill]] }
0x38ed   : > { %8430 = vrot.lane.b32.xlu0 %v2214_v47, %s13890_s5 }
0x38f1   : > { %8428 = vrot.lane.b32.xlu0 %v2213_v29, %s13890_s5 }
0x3958   : > { %v8151_v8 = vpop.xlane.xlu0 %8150 }
0x3959   : > { %v8152_v22 = vsub.f32 %v8148_v19, %v8151_v8 }
0x395b   : > { %v8153_v23 = vmul.f32 1.442695, %v8152_v22 }
0x395c   : > { %v8161_v5 = vpop.permute.xlu0 %8160 }
0x395d   : > { %11495 = vpow2.f32 %v8153_v23  ;;  %10954 = vmatpush3.msra.mxu0 %v8161_v5 }
0x395e   : > { %10963 = vmatprep.subr.mxu0 %v12262_v0 }
0x3960   : > { %v8433_v53 = vpop.permute.xlu0 %8432 }
0x3964   : > { %v8431_v56 = vpop.permute.xlu0 %8430 }
0x396a   : > { %v11496_v24 = vpop.eup %11495 }
0x396b   : > { %v8155_v25 = vsel %vm2393_vm2, %v11496_v24, 0.0 }
0x396c   : > { %8156 = vadd.xlane.f32.xlu1 %v8155_v25 }
0x3988   : > { %v8065_v27 = vpop.f32.mrf.mxu0 }
0x3989   : > { %v8069_v28 = vadd.f32 %v8065_v27, %v7827_v58  ;;  %v8429_v58 = vpop.permute.xlu0 %8428 }
0x398a   : > { %v10947_v30 = vpop.f32.mrf.mxu0 }
0x39f5   : > { %v8157_v15 = vpop.xlane.xlu1 %8156 }
0x39f6   : > { %11497 = vrcp.f32 %v8157_v15 }
0x3a03   : > { %v11498_v32 = vpop.eup %11497 }
0x3a04   : > { %v8159_v33 = vmul.f32 %v11498_v32, %v11496_v24 }
0x3a06   : > { %10956 = vmatmul.mubr.msk.f32.vlgmr.msra.gmra.mxu0 %vm2393_vm2, %v8159_v33 }
0x3a07   : > { %10971 = vmatprep.mubr.msk.f32.mxu0 %vm12263_vm0, %v12262_v0  ;;  %10964 = vmatpush3.msra.mxu0 %v2216_v46 }
0x3a08   : > { %10965 = vmatprep.subr.mxu0 %v12262_v0 }
0x3a09   : > { %10966 = vmatpush3.msra.mxu0 %v2215_v45 }
0x3a0a   : > { %10967 = vmatprep.subr.mxu0 %v12262_v0 }
0x3a0b   : > { %10968 = vmatpush3.msra.mxu0 %v2214_v47 }
0x3a0c   : > { %10969 = vmatprep.subr.mxu0 %v12262_v0 }
0x3a0d   : > { %10970 = vmatpush3.msra.mxu0 %v2213_v29 }
0x3a0e   : > { %10985 = vmatprep.subr.mxu0 %v12262_v0 }
0x3ac6   : > { %v8232_v34 = vpop.f32.mrf.mxu0 }
0x3ac7   : > { %10961 = vmatmul.mubr.msk.f32.vlgmr.msra.gmra.mxu1 %vm2393_vm2, %v8232_v34 }
0x3ac8   : > { %v10957_v35 = vpop.f32.mrf.mxu0  ;;  %10982 = vmatprep.mubr.msk.f32.mxu1 %vm12263_vm0, %v12262_v0 }
0x3b87   : > { %v8305_v38 = vpop.f32.mrf.mxu1 }
0x3b88   : > { %v8309_v39 = vadd.f32 %v8305_v38, %v8069_v28 }
0x3b89   : > { %v10962_v40 = vpop.f32.mrf.mxu1 }
0x3b8a   : > { %v8316_v41 = vadd.f32 %v10230_v37, %v8309_v39 }
0x3b8c   : > { %v8317_v42 = vadd.f32 %v8316_v41, %v13415_v12 }
0x3b8e   : > { %v8318_v43 = vsel %vm2316_vm1, %v8317_v42, 0.0 }
0x3b8f   : > { %8319 = vadd.xlane.f32.xlu1 %v8318_v43 }
0x3c18   : > { %v8320_v12 = vpop.xlane.xlu1 %8319 }
0x3c19   : > { %v8321_v31 = vmul.f32 0.03125, %v8320_v12 }
0x3c1b   : > { %v8322_v48 = vsub.f32 %v8317_v42, %v8321_v31 }
0x3c1d   : > { %v8323_v49 = vmul.f32 %v8322_v48, %v8322_v48 }
0x3c1f   : > { %v8324_v50 = vsel %vm2316_vm1, %v8323_v49, 0.0 }
0x3c20   : > { %8325 = vadd.xlane.f32.xlu1 %v8324_v50 }
0x3c31   : > { %8434 = vrot.lane.b32.xlu1 %v2216_v46, %s13890_s5 }
0x3c35   : > { %8440 = vrot.lane.b32.xlu1 %v10233_v51, %s13890_s5 }
0x3ca9   : > { %v8326_v54 = vpop.xlane.xlu1 %8325 }
0x3caa   : > { %v8327_v55 = vmul.f32 0.03125, %v8326_v54 }
0x3cac   : > { %v8328_v16 = vadd.f32 1e-05, %v8327_v55 }
0x3cad   : > { %v8435_v57 = vpop.permute.xlu1 %8434 }
0x3cae   : > { %11499 = vrsqrt.f32 %v8328_v16  ;;  %10975 = vmatpush3.msra.mxu1 %v8435_v57 }
0x3caf   : > { %10976 = vmatprep.subr.mxu1 %v12262_v0 }
0x3cb0   : > { %10977 = vmatpush3.msra.mxu1 %v8433_v53 }
0x3cb1   : > { %10978 = vmatprep.subr.mxu1 %v12262_v0  ;;  %v8441_v1 = vpop.permute.xlu1 %8440 }
0x3cb2   : > { %10979 = vmatpush3.msra.mxu1 %v8431_v56 }
0x3cb3   : > { %10980 = vmatprep.subr.mxu1 %v12262_v0 }
0x3cb4   : > { %10981 = vmatpush3.msra.mxu1 %v8429_v58 }
0x3cb5   : > { %10983 = vmatmul.mubr.msk.f32.vlgmr.msra.gmra.mxu1 %vm2316_vm1, %v13259_v44  ;;  %10990 = vmatprep.subr.mxu1 %v12262_v0 }
0x3cb6   : > { %10992 = vmatprep.mubr.msk.f32.mxu1 %vm12263_vm0, %v12262_v0 }
0x3cbb   : > { %v11500_v59 = vpop.eup %11499 }
0x3cbc   : > { %v8330_v61 = vmul.f32 %v11500_v59, %v8322_v48 }
0x3cbe   : > { %v8337_v26 = vmul.f32 %v10231_v60, %v8330_v61 }
0x3cc0   : > { %v13537_v63 = vadd.f32 %v10232_v62, %v8337_v26 }
0x3cc2   : > { %10972 = vmatmul.mubr.msk.f32.vlgmr.msra.gmra.mxu0 %vm2316_vm1, %v13537_v63 }
0x3cc3   : > { %10987 = vmatprep.mubr.msk.f32.mxu0 %vm12263_vm0, %v12262_v0 }
0x3d75   : > { %v8509_v44 = vpop.f32.mrf.mxu1 }
0x3d76   : > { %v13543_v2 = vadd.f32 %v8509_v44, %v8441_v1 }
0x3d77   : > { %v10984_v3 = vpop.f32.mrf.mxu1 }
0x3d78   : > { %8679 = vrot.lane.b32.xlu0 %v13543_v2, %s13891_s6  ;;  %10986 = vmatpush3.xpose.msk.msra.mxu0 %vm2393_vm2, %v13543_v2 }
0x3d79   : > { %10995 = vmatprep.subr.mxu0 %v12262_v0 }
0x3d82   : > { %v8420_v4 = vpop.f32.mrf.mxu0 }
0x3d83   : > { %v13550_v6 = vadd.f32 %v10233_v51, %v8420_v4 }
0x3d84   : > { %v10973_v7 = vpop.f32.mrf.mxu0 }
0x3d85   : > { %8677 = vrot.lane.b32.xlu1 %v13550_v6, %s13891_s6  ;;  %10988 = vmatmul.mubr.msk.f32.vlgmr.msra.gmra.mxu0 %vm2393_vm2, %v13550_v6  ;;  %s13919_s6 = sld [smem:[#allocation74_spill]] }
0x3d86   : > { %10997 = vmatprep.mubr.msk.f32.mxu0 %vm12263_vm0, %v12262_v0 }
0x3dea   : > { %v8680_v9 = vpop.permute.xlu0 %8679 }
0x3deb   : > { %10996 = vmatpush3.xpose.msk.msra.mxu0 %vm2393_vm2, %v8680_v9 }
0x3dec   : > { %11005 = vmatprep.subr.mxu0 %v12262_v0 }
0x3df7   : > { %v8678_v10 = vpop.permute.xlu1 %8677 }
0x3df8   : > { %10998 = vmatmul.mubr.msk.f32.vlgmr.msra.gmra.mxu0 %vm2393_vm2, %v8678_v10 }
0x3df9   : > { %11007 = vmatprep.mubr.msk.f32.mxu0 %vm12263_vm0, %v12262_v0 }
0x3e45   : > { %v8585_v11 = vpop.f32.mrf.mxu0 }
0x3e46   : > { %v8589_v36 = vmul.f32 0.35355338, %v8585_v11 }
0x3e47   : > { %v10989_v13 = vpop.f32.mrf.mxu0 }
0x3e48   : > { %v8590_v14 = vsel %vm2393_vm2, %v8589_v36, -inf }
0x3e49   : > { %8591 = vmax.xlane.f32.xlu0 %v8590_v14 }
0x3eb8   : > { %v8751_v17 = vpop.f32.mrf.mxu0 }
0x3eb9   : > { %v8755_v18 = vmul.f32 0.35355338, %v8751_v17 }
0x3eba   : > { %v10999_v19 = vpop.f32.mrf.mxu0 }
0x3ebb   : > { %v8756_v20 = vsel %vm2393_vm2, %v8755_v18, -inf }
0x3ebc   : > { %8757 = vmax.xlane.f32.xlu1 %v8756_v20 }
0x3ecd   : > { %8767 = vrot.lane.b32.xlu1 %v13543_v2, %s13889_s4  ;;  %s13922_s4 = sld [smem:[#allocation79_spill]] }
0x3ed1   : > { %8991 = vrot.lane.b32.xlu1 %v13543_v2, %s13893_s8 }
0x3ed2   : > { %v8592_v21 = vpop.xlane.xlu0 %8591 }
0x3ed3   : > { %v8593_v8 = vsub.f32 %v8589_v36, %v8592_v21 }
0x3ed5   : > { %v8594_v22 = vmul.f32 1.442695, %v8593_v8  ;;  %8989 = vrot.lane.b32.xlu1 %v13550_v6, %s13893_s8  ;;  %s13917_s8 = sld [smem:[#allocation72_spill]] }
0x3ed7   : > { %11501 = vpow2.f32 %v8594_v22 }
0x3edb   : > { %v2217_v39 = vld [vmem:[%s13917_s8] sm:$0xff]  ;;  %v2218_v40 = vld [vmem:[%s13917_s8 + $0x8] sm:$0xff]  ;;  %v2219_v44 = vld [vmem:[%s13917_s8 + $0x10] sm:$0xff] }
0x3edc   : > { %11006 = vmatpush3.msra.mxu0 %v2218_v40  ;;  %v2224_v40 = vld [vmem:[%s13919_s6 + $0x10] sm:$0xff] }
0x3edd   : > { %11015 = vmatprep.subr.mxu0 %v12262_v0 }
0x3ee4   : > { %v11502_v23 = vpop.eup %11501 }
0x3ee5   : > { %v8596_v5 = vsel %vm2393_vm2, %v11502_v23, 0.0 }
0x3ee6   : > { %8597 = vadd.xlane.f32.xlu0 %v8596_v5 }
0x3f45   : > { %v8758_v24 = vpop.xlane.xlu1 %8757 }
0x3f46   : > { %v8759_v25 = vsub.f32 %v8755_v18, %v8758_v24  ;;  %v2220_v18 = vld [vmem:[%s13917_s8 + $0x18] sm:$0xff] }
0x3f48   : > { %v8760_v52 = vmul.f32 1.442695, %v8759_v25 }
0x3f49   : > { %v8768_v35 = vpop.permute.xlu1 %8767 }
0x3f4a   : > { %11503 = vpow2.f32 %v8760_v52 }
0x3f4d   : > { %v8992_v43 = vpop.permute.xlu1 %8991 }
0x3f51   : > { %v8990_v47 = vpop.permute.xlu1 %8989 }
0x3f57   : > { %v11504_v27 = vpop.eup %11503 }
0x3f58   : > { %v8762_v28 = vsel %vm2393_vm2, %v11504_v27, 0.0 }
0x3f59   : > { %8763 = vadd.xlane.f32.xlu0 %v8762_v28 }
0x3f6f   : > { %8601 = vrot.lane.b32.xlu0 %v13543_v2, %s13890_s5  ;;  %v8598_v30 = vpop.xlane.xlu0 %8597  ;;  %s13918_s5 = sld [smem:[#allocation70_spill]] }
0x3f70   : > { %11505 = vrcp.f32 %v8598_v30 }
0x3f75   : > { %v10252_v25 = vld [vmem:[%s13918_s5] ss:$0 sm:$0xff]  ;;  %s10105_s5 = sshll.u32 %s2162_s9, 3 }
0x3f7d   : > { %v11506_v32 = vpop.eup %11505 }
0x3f7e   : > { %v8600_v34 = vmul.f32 %v11506_v32, %v11502_v23 }
0x3fe2   : > { %v8764_v15 = vpop.xlane.xlu0 %8763 }
0x3fe3   : > { %11507 = vrcp.f32 %v8764_v15 }
0x3fe6   : > { %v8602_v33 = vpop.permute.xlu0 %8601 }
0x3fe7   : > { %10991 = vmatpush3.msra.mxu1 %v8602_v33 }
0x3fe8   : > { %10993 = vmatmul.mubr.msk.f32.vlgmr.msra.gmra.mxu1 %vm2393_vm2, %v8600_v34  ;;  %11000 = vmatprep.subr.mxu1 %v12262_v0 }
0x3fe9   : > { %11001 = vmatpush3.msra.mxu1 %v8768_v35  ;;  %11002 = vmatprep.mubr.msk.f32.mxu1 %vm12263_vm0, %v12262_v0 }
0x3fea   : > { %11010 = vmatprep.subr.mxu1 %v12262_v0 }
0x3ff0   : > { %v11508_v37 = vpop.eup %11507 }
0x3ff1   : > { %v8766_v38 = vmul.f32 %v11508_v37, %v11504_v27 }
0x3ff3   : > { %11003 = vmatmul.mubr.msk.f32.vlgmr.msra.gmra.mxu1 %vm2393_vm2, %v8766_v38 }
0x3ff4   : > { %11012 = vmatprep.mubr.msk.f32.mxu1 %vm12263_vm0, %v12262_v0  ;;  %11011 = vmatpush3.msra.mxu1 %v2217_v39  ;;  %v2225_v39 = vld [vmem:[%s13919_s6 + $0x18] sm:$0xff] }
0x3ff5   : > { %11020 = vmatprep.subr.mxu1 %v12262_v0 }
0x40a8   : > { %v8673_v41 = vpop.f32.mrf.mxu1 }
0x40a9   : > { %11013 = vmatmul.mubr.msk.f32.vlgmr.msra.gmra.mxu1 %vm2393_vm2, %v8673_v41  ;;  %v2222_v41 = vld [vmem:[%s13919_s6] sm:$0xff] }
0x40aa   : > { %v10994_v42 = vpop.f32.mrf.mxu1  ;;  %11022 = vmatprep.mubr.msk.f32.mxu1 %vm12263_vm0, %v12262_v0 }
0x40b3   : > { %v8839_v45 = vpop.f32.mrf.mxu1 }
0x40b4   : > { %11008 = vmatmul.mubr.msk.f32.vlgmr.msra.gmra.mxu0 %vm2393_vm2, %v8839_v45 }
0x40b5   : > { %11016 = vmatpush3.xpose.msk.msra.mxu0 %vm2393_vm2, %v8992_v43  ;;  %v11004_v46 = vpop.f32.mrf.mxu1  ;;  %11017 = vmatprep.mubr.msk.f32.mxu0 %vm12263_vm0, %v12262_v0 }
0x40b6   : > { %11025 = vmatprep.subr.mxu0 %v12262_v0 }
0x40b8   : > { %11018 = vmatmul.mubr.msk.f32.vlgmr.msra.gmra.mxu0 %vm2393_vm2, %v8990_v47 }
0x40b9   : > { %11027 = vmatprep.mubr.msk.f32.mxu0 %vm12263_vm0, %v12262_v0  ;;  %11026 = vmatpush3.msra.mxu0 %v2219_v44 }
0x40ba   : > { %11035 = vmatprep.subr.mxu0 %v12262_v0 }
0x4169   : > { %v8985_v29 = vpop.f32.mrf.mxu1 }
0x416b   : > { %v11014_v12 = vpop.f32.mrf.mxu1 }
0x4174   : > { %v8912_v31 = vpop.f32.mrf.mxu0 }
0x4175   : > { %v8986_v48 = vadd.f32 %v8985_v29, %v8912_v31 }
0x4176   : > { %v11009_v49 = vpop.f32.mrf.mxu0 }
0x4178   : > { %v9063_v50 = vpop.f32.mrf.mxu0 }
0x4179   : > { %v9067_v51 = vmul.f32 0.35355338, %v9063_v50 }
0x417a   : > { %v11019_v53 = vpop.f32.mrf.mxu0 }
0x417b   : > { %v9068_v54 = vsel %vm2393_vm2, %v9067_v51, -inf }
0x417c   : > { %9069 = vmax.xlane.f32.xlu0 %v9068_v54 }
0x4192   : > { %9079 = vrot.lane.b32.xlu0 %v13543_v2, %s13881_s0  ;;  %s13923_s0 = sld [smem:[#allocation73_spill]] }
0x4196   : > { %9229 = vrot.lane.b32.xlu0 %v13550_v6, %s13882_s3 }
0x4205   : > { %v9070_v55 = vpop.xlane.xlu0 %9069 }
0x4206   : > { %v9071_v56 = vsub.f32 %v9067_v51, %v9070_v55  ;;  %v10254_v51 = vld [vmem:[%s13922_s4] ss:$0 sm:$0xff]  ;;  %s2164_s4 = scalar_lea.vmem [#allocation35], %s10105_s5 }
0x4208   : > { %v9072_v16 = vmul.f32 1.442695, %v9071_v56 }
0x4209   : > { %v9080_v57 = vpop.permute.xlu0 %9079 }
0x420a   : > { %11509 = vpow2.f32 %v9072_v16  ;;  %11021 = vmatpush3.msra.mxu1 %v9080_v57  ;;  %v10255_v57 = vld [vmem:[%s13923_s0] ss:$0 sm:$0xff]  ;;  %s9733_s0 = sshll.u32 %s2164_s4, 4  ;;  %s9734_s0 = int_to_ptr.vmem [resolvable:$true] %s9733_s0 }
0x420b   : > { %11030 = vmatprep.subr.mxu1 %v12262_v0  ;;  %s12070_s2 = scalar_lea.vmem %s9734_s0, 128 }
0x420c   : > { %p12071_p11 = scmp.ne.s32.totalorder %s9734_s0, %s12070_s2 }
0x420d   : > { %v9230_v1 = vpop.permute.xlu0 %9229 }
0x420e   : > { %p12072_p1 = pnand %p12071_p11, %p13928_p0 }
0x4210   : > { %p12073_p2 = pneg %p12072_p1 }
0x4217   : > { %v11510_v58 = vpop.eup %11509 }
0x4218   : > { %v9074_v59 = vsel %vm2393_vm2, %v11510_v58, 0.0 }
0x4219   : > { %9075 = vadd.xlane.f32.xlu1 %v9074_v59 }
0x422a   : > { %9231 = vrot.lane.b32.xlu1 %v13543_v2, %s13882_s3  ;;  %s13921_s3 = sld [smem:[#allocation80_spill]] }
0x4230   : > { %v10253_v49 = vld [vmem:[%s13921_s3] ss:$0 sm:$0xff]  ;;  %s10264_s3 = sshll.u32 %s12632_s15, 7 }
0x42a2   : > { %v9076_v60 = vpop.xlane.xlu1 %9075 }
0x42a3   : > { %11511 = vrcp.f32 %v9076_v60 }
0x42a6   : > { %v9232_v26 = vpop.permute.xlu1 %9231 }
0x42b0   : > { %v11512_v61 = vpop.eup %11511 }
0x42b1   : > { %v9078_v62 = vmul.f32 %v11512_v61, %v11510_v58 }
0x42b3   : > { %11023 = vmatmul.mubr.msk.f32.vlgmr.msra.gmra.mxu1 %vm2393_vm2, %v9078_v62  ;;  %v10257_v62 = vld [vmem:[%s13924_s1] ss:$0 sm:$0xff]  ;;  %s9731_s1 = scalar_lea.hbm %s12609_s30, %s10264_s3 }
0x42b4   : > { %11031 = vmatpush3.xpose.msk.msra.mxu1 %vm2393_vm2, %v9232_v26  ;;  %11032 = vmatprep.mubr.msk.f32.mxu1 %vm12263_vm0, %v12262_v0 }
0x42b5   : > { %11040 = vmatprep.subr.mxu1 %v12262_v0 }
0x42b7   : > { %11033 = vmatmul.mubr.msk.f32.vlgmr.msra.gmra.mxu1 %vm2393_vm2, %v9230_v1 }
0x42b8   : > { %11042 = vmatprep.mubr.msk.f32.mxu1 %vm12263_vm0, %v12262_v0  ;;  %11041 = vmatpush3.msra.mxu1 %v2220_v18 }
0x42b9   : > { %11056 = vmatprep.subr.mxu1 %v12262_v0 }
0x4373   : > { %v9151_v3 = vpop.f32.mrf.mxu1 }
0x4374   : > { %11028 = vmatmul.mubr.msk.f32.vlgmr.msra.gmra.mxu0 %vm2393_vm2, %v9151_v3 }
0x4375   : > { %v11024_v4 = vpop.f32.mrf.mxu1  ;;  %11037 = vmatprep.mubr.msk.f32.mxu0 %vm12263_vm0, %v12262_v0 }
0x4377   : > { %v9303_v6 = vpop.f32.mrf.mxu1 }
0x4378   : > { %v9307_v7 = vmul.f32 0.35355338, %v9303_v6 }
0x4379   : > { %v11034_v9 = vpop.f32.mrf.mxu1 }
0x437a   : > { %v9308_v10 = vsel %vm2393_vm2, %v9307_v7, -inf }
0x437b   : > { %9309 = vmax.xlane.f32.xlu1 %v9308_v10 }
0x4404   : > { %v9310_v11 = vpop.xlane.xlu1 %9309 }
0x4405   : > { %v9311_v36 = vsub.f32 %v9307_v7, %v9310_v11 }
0x4407   : > { %v9312_v13 = vmul.f32 1.442695, %v9311_v36 }
0x4409   : > { %11513 = vpow2.f32 %v9312_v13 }
0x4416   : > { %v11514_v14 = vpop.eup %11513 }
0x4417   : > { %v9314_v17 = vsel %vm2393_vm2, %v11514_v14, 0.0 }
0x4418   : > { %9315 = vadd.xlane.f32.xlu0 %v9314_v17  ;;  %v10259_v17 = vld [vmem:[#allocation2] ss:$0 sm:$0xff] }
0x442e   : > { %9319 = vrot.lane.b32.xlu0 %v13543_v2, %s13883_s19  ;;  %s13920_s19 = sld [smem:[#allocation76_spill]] }
0x4434   : > { %v9224_v19 = vpop.f32.mrf.mxu0  ;;  %v2234_v42 = vld [vmem:[%s13920_s19 + $0x38] sm:$0xff]  ;;  %v2233_v43 = vld [vmem:[%s13920_s19 + $0x30] sm:$0xff]  ;;  %v2232_v45 = vld [vmem:[%s13920_s19 + $0x28] sm:$0xff] }
0x4435   : > { %v9228_v20 = vadd.f32 %v9224_v19, %v8986_v48  ;;  %v2231_v46 = vld [vmem:[%s13920_s19 + $0x20] sm:$0xff]  ;;  %v2230_v47 = vld [vmem:[%s13920_s19 + $0x18] sm:$0xff]  ;;  %v2229_v55 = vld [vmem:[%s13920_s19 + $0x10] sm:$0xff] }
0x4436   : > { %v11029_v21 = vpop.f32.mrf.mxu0  ;;  %v2228_v56 = vld [vmem:[%s13920_s19 + $0x8] sm:$0xff]  ;;  %v2227_v16 = vld [vmem:[%s13920_s19] sm:$0xff] }
0x4437   : > { %v10260_v19 = vld [vmem:[%s13925_s16] ss:$0 sm:$0xff]  ;;  %s9720_s16 = scalar_lea.sflag [#allocation4], %s2162_s9 }
0x44a1   : > { %v9316_v8 = vpop.xlane.xlu0 %9315 }
0x44a2   : > { %11515 = vrcp.f32 %v9316_v8 }
0x44a5   : > { %v9320_v22 = vpop.permute.xlu0 %9319 }
0x44a6   : > { %11036 = vmatpush3.msra.mxu0 %v9320_v22 }
0x44a7   : > { %11045 = vmatprep.subr.mxu0 %v12262_v0 }
0x44af   : > { %v11516_v23 = vpop.eup %11515 }
0x44b0   : > { %v9318_v5 = vmul.f32 %v11516_v23, %v11514_v14 }
0x44b2   : > { %11038 = vmatmul.mubr.msk.f32.vlgmr.msra.gmra.mxu0 %vm2393_vm2, %v9318_v5 }
0x44b3   : > { %11053 = vmatprep.mubr.msk.f32.mxu0 %vm12263_vm0, %v12262_v0  ;;  %11046 = vmatpush3.msra.mxu0 %v2225_v39 }
0x44b4   : > { %11047 = vmatprep.subr.mxu0 %v12262_v0 }
0x44b5   : > { %11048 = vmatpush3.msra.mxu0 %v2224_v40 }
0x44b6   : > { %11049 = vmatprep.subr.mxu0 %v12262_v0 }
0x4572   : > { %v9391_v2 = vpop.f32.mrf.mxu0 }
0x4573   : > { %11043 = vmatmul.mubr.msk.f32.vlgmr.msra.gmra.mxu1 %vm2393_vm2, %v9391_v2 }
0x4574   : > { %v11039_v24 = vpop.f32.mrf.mxu0  ;;  %11072 = vmatprep.mubr.msk.f32.mxu1 %vm12263_vm0, %v12262_v0  ;;  %11057 = vmatpush3.msra.mxu1 %v2234_v42 }
0x4575   : > { %11058 = vmatprep.subr.mxu1 %v12262_v0 }
0x4576   : > { %11059 = vmatpush3.msra.mxu1 %v2233_v43 }
0x4577   : > { %11060 = vmatprep.subr.mxu1 %v12262_v0 }
0x4578   : > { %11061 = vmatpush3.msra.mxu1 %v2232_v45 }
0x4579   : > { %11062 = vmatprep.subr.mxu1 %v12262_v0 }
0x457a   : > { %11063 = vmatpush3.msra.mxu1 %v2231_v46 }
0x457b   : > { %11064 = vmatprep.subr.mxu1 %v12262_v0 }
0x457c   : > { %11065 = vmatpush3.msra.mxu1 %v2230_v47 }
0x457d   : > { %11066 = vmatprep.subr.mxu1 %v12262_v0 }
0x457e   : > { %11067 = vmatpush3.msra.mxu1 %v2229_v55 }
0x457f   : > { %11068 = vmatprep.subr.mxu1 %v12262_v0 }
0x4580   : > { %11069 = vmatpush3.msra.mxu1 %v2228_v56 }
0x4581   : > { %11070 = vmatprep.subr.mxu1 %v12262_v0 }
0x4582   : > { %11071 = vmatpush3.msra.mxu1 %v2227_v16 }
0x4633   : > { %v9464_v52 = vpop.f32.mrf.mxu1 }
0x4634   : > { %v9468_v27 = vadd.f32 %v9464_v52, %v9228_v20 }
0x4635   : > { %v11044_v28 = vpop.f32.mrf.mxu1 }
0x4636   : > { %v9475_v30 = vadd.f32 %v10252_v25, %v9468_v27 }
0x4638   : > { %v9476_v15 = vadd.f32 %v9475_v30, %v13537_v63  ;;  %v2223_v63 = vld [vmem:[%s13919_s6 + $0x8] sm:$0xff]  ;;  %v10261_v30 = vld [vmem:[%s13926_s7] ss:$0 sm:$0xff]  ;;  %s12275_s6 = smov [#allocation35]  }
0x4639   : > { %11050 = vmatpush3.msra.mxu0 %v2223_v63  ;;  %s12074_s8 = sshll.u32 %s12275_s6, 4  ;;  %s12075_s8 = int_to_ptr.vmem [resolvable:$false] %s12074_s8 }
0x463a   : > { %v9477_v32 = vsel %vm2316_vm1, %v9476_v15, 0.0  ;;  %11051 = vmatprep.subr.mxu0 %v12262_v0  ;;  %s12076_s7 = scalar_lea.vmem %s12075_s8, 256  ;;  %p12077_p3 = scmp.lt.s32.totalorder %s9734_s0, %s12075_s8 }
0x463b   : > { %9478 = vadd.xlane.f32.xlu1 %v9477_v32  ;;  %11052 = vmatpush3.msra.mxu0 %v2222_v41  ;;  %v10262_v32 = vld [vmem:[%s13927_s11] ss:$0 sm:$0xff]  ;;  %p12078_p9 = scmp.lt.s32.totalorder %s12076_s7, %s12070_s2 }
0x463d   : > { %p12079_p4 = por %p12078_p9, %p12077_p3 }
0x463f   : > { %p12080_p13 = pnand %p12079_p4, %p12073_p2 }
0x46c4   : > { %v9479_v33 = vpop.xlane.xlu1 %9478 }
0x46c5   : > { %v9480_v34 = vmul.f32 0.03125, %v9479_v33 }
0x46c7   : > { %v9481_v35 = vsub.f32 %v9476_v15, %v9480_v34 }
0x46c9   : > { %v9482_v37 = vmul.f32 %v9481_v35, %v9481_v35 }
0x46cb   : > { %v9483_v38 = vsel %vm2316_vm1, %v9482_v37, 0.0 }
0x46cc   : > { %9484 = vadd.xlane.f32.xlu1 %v9483_v38 }
0x4755   : > { %v9485_v29 = vpop.xlane.xlu1 %9484 }
0x4756   : > { %v9486_v12 = vmul.f32 0.03125, %v9485_v29 }
0x4758   : > { %v9487_v31 = vadd.f32 1e-05, %v9486_v12 }
0x475a   : > { %11517 = vrsqrt.f32 %v9487_v31 }
0x4767   : > { %v11518_v48 = vpop.eup %11517 }
0x4768   : > { %v9489_v50 = vmul.f32 %v11518_v48, %v9481_v35 }
0x476a   : > { %v9496_v53 = vmul.f32 %v10253_v49, %v9489_v50 }
0x476c   : > { %v9503_v54 = vadd.f32 %v10254_v51, %v9496_v53 }
0x476e   : > { %11054 = vmatmul.mubr.msk.f32.vlgmr.msra.gmra.mxu0 %vm2316_vm1, %v9503_v54 }
0x482e   : > { %v9579_v58 = vpop.f32.mrf.mxu0 }
0x482f   : > { %v9580_v59 = vadd.f32 %v10255_v57, %v9579_v58 }
0x4830   : > { %v11055_v60 = vpop.f32.mrf.mxu0 }
0x4831   : > { %v9583_v61 = vmax.f32 %v9580_v59, 0.0 }
0x4833   : > { %11073 = vmatmul.mubr.msk.f32.vlgmr.msra.gmra.mxu1 %vm3470_vm3, %v9583_v61 }
0x48f3   : > { %v9659_v26 = vpop.f32.mrf.mxu1 }
0x48f4   : > { %v9660_v1 = vadd.f32 %v10257_v62, %v9659_v26 }
0x48f5   : > { %v11074_v44 = vpop.f32.mrf.mxu1 }
0x48f6   : > { %v9663_v3 = vadd.f32 %v9660_v1, %v9503_v54 }
0x48f8   : > { %v9664_v4 = vsel %vm2316_vm1, %v9663_v3, 0.0 }
0x48f9   : > { %9665 = vadd.xlane.f32.xlu1 %v9664_v4 }
0x4982   : > { %v9666_v6 = vpop.xlane.xlu1 %9665 }
0x4983   : > { %v9667_v7 = vmul.f32 0.03125, %v9666_v6 }
0x4985   : > { %v9668_v0 = vsub.f32 %v9663_v3, %v9667_v7 }
0x4987   : > { %v9669_v9 = vmul.f32 %v9668_v0, %v9668_v0 }
0x4989   : > { %v9670_v10 = vsel %vm2316_vm1, %v9669_v9, 0.0 }
0x498a   : > { %9671 = vadd.xlane.f32.xlu1 %v9670_v10 }
0x4a13   : > { %v9672_v11 = vpop.xlane.xlu1 %9671 }
0x4a14   : > { %v9673_v36 = vmul.f32 0.03125, %v9672_v11 }
0x4a16   : > { %v9674_v13 = vadd.f32 1e-05, %v9673_v36 }
0x4a18   : > { %11519 = vrsqrt.f32 %v9674_v13 }
0x4a25   : > { %v11520_v14 = vpop.eup %11519 }
0x4a26   : > { %v9676_v18 = vmul.f32 %v11520_v14, %v9668_v0 }
0x4a28   : > { %v9683_v20 = vmul.f32 %v10259_v17, %v9676_v18 }
0x4a2a   : > { %v9690_v21 = vadd.f32 %v10260_v19, %v9683_v20 }
0x4a2c   : > { %v9691_v8 = vsel %vm2316_vm1, %v9690_v21, 0.0 }
0x4a2d   : > { %9692 = vadd.xlane.f32.xlu1 %v9691_v8 }
0x4ab6   : > { %v9693_v22 = vpop.xlane.xlu1 %9692 }
0x4ab7   : > { %v9694_v23 = vmul.f32 0.03125, %v9693_v22 }
0x4ab9   : > { %v9695_v5 = vsub.f32 %v9690_v21, %v9694_v23 }
0x4abb   : > { %v9696_v2 = vmul.f32 %v9695_v5, %v9695_v5 }
0x4abd   : > { %v9697_v24 = vsel %vm2316_vm1, %v9696_v2, 0.0 }
0x4abe   : > { %9698 = vadd.xlane.f32.xlu0 %v9697_v24 }
0x4b47   : > { %v9699_v25 = vpop.xlane.xlu0 %9698 }
0x4b48   : > { %v9700_v52 = vmul.f32 0.03125, %v9699_v25 }
0x4b4a   : > { %v9701_v27 = vadd.f32 1e-05, %v9700_v52 }
0x4b4c   : > { %11521 = vrsqrt.f32 %v9701_v27 }
0x4b59   : > { %v11522_v28 = vpop.eup %11521 }
0x4b5a   : > { %v9703_v15 = vmul.f32 %v11522_v28, %v9695_v5 }
0x4b5c   : > { %v9710_v33 = vmul.f32 %v10261_v30, %v9703_v15 }
0x4b5e   : > { %v9717_v34 = vadd.f32 %v10262_v32, %v9710_v33 }
0x4b60   : > { %9718 = vst.msk [vmem:[%s2164_s4] sm:$0xff] %vm2316_vm1, %v9717_v34 }
0x4b61   : > { %12083 = shalt.err (!%p12080_p13)
}
0x4b62   : > { %s12084_s15 = scalar_lea.hbm %s9731_s1, 128  ;;  %s12088_s11 = scalar_lea.hbm %s12609_s30, 256 }
0x4b63   : > { %p12085_p5 = scmp.ne.s32.totalorder %s9731_s1, %s12084_s15  ;;  %p12089_p10 = scmp.lt.s32.totalorder %s9731_s1, %s12609_s30 }
0x4b64   : > { %p12090_p7 = scmp.lt.s32.totalorder %s12088_s11, %s12084_s15 }
0x4b65   : > { %p12086_p6 = pnand %p12085_p5, %p13928_p0 }
0x4b66   : > { %p12091_p8 = por %p12090_p7, %p12089_p10 }
0x4b67   : > { %p12087_p12 = pneg %p12086_p6 }
0x4b69   : > { %p12092_p11 = pnand %p12091_p8, %p12087_p12 }
0x4b6b   : > { %12095 = shalt.err (!%p12092_p11)
}
0x4b6c   : > { %11159 = dma.vmem_to_hbm [thread:$0]  (%p13928_p0), %s9734_s0, 128, %s9731_s1, %s9720_s16  }
0x4b6d PF: > { %s13929_s2 = sld [smem:[#allocation108_spill]] }
0x4b6e   : > { %s13930_s8 = sld [smem:[#allocation106_spill]] }
0x4b6f   : > { %s13931_s6 = sld [smem:[#allocation111_spill]] }
0x4b73   : > { %p11271_p1 = scmp.ge.s32.totalorder %s13929_s2, 2 }
0x4b74   : > { %s9745_s9 = sand.u32 1, %s13930_s8  }
0x4b75   : > { %p13932_p2 = scmp.ne.s32.totalorder %s13931_s6, 0  ;;  %s9746_s5 = scalar_lea.sflag [#allocation4], %s9745_s9 }
0x4b77   : > { %p11226_p3 = pnand %p11271_p1, %p13932_p2 }
0x4b79   : > { %p11227_p9 = pneg %p11226_p3 }
0x4b7b   : > { %12157 = dma.done.wait (%p11227_p9), %s9746_s5, 128  }
0x4b7c   : > { %12159 = vsyncadd (%p11227_p9), %s9746_s5, 4294967168  ;;  %s13933_s0 = sld [smem:[#allocation109_spill]]  ;;  %s13936_s7 = smov %s12166_s10 }
0x4b7d   : > { %s13934_s3 = sld [smem:[#allocation107_spill]] }
0x4b7e   : > { %s13935_s11 = sld [smem:[#allocation110_spill]] }
0x4b82   : > { %p152_p4 = scmp.ge.s32.totalorder %s13933_s0, 4  }
0x4b83   : > { %s13937_s10 = smov %s13934_s3 }
0x4b84   :  { %154 = sbr.rel (!%p152_p4) target bundleno = 145 (0x91), region = 465 }
0x4b89   :  { %9751 = vsyncpa [#allocation3], 1 }
0x4b8a   :  { %9753 = vsyncpa [#allocation3 + $0x1], 1 }
0x4b8b   :  { %9754 = vsyncpa [#allocation6], 1 }
0x4b8c   :  { %9755 = vsyncpa [#allocation9], 1 }
0x4b8d   :  { %9756 = vsyncpa [#allocation12], 1 }
0x4b8e   :  { %9757 = vsyncpa [#allocation15], 1 }
0x4b8f   :  { %9758 = vsyncpa [#allocation18], 1 }
0x4b90   :  { %9759 = vsyncpa [#allocation21], 1 }
0x4b91   :  { %9760 = vsyncpa [#allocation24], 1 }
0x4b92   :  { %9761 = vsyncpa [#allocation27], 1 }
0x4b93   :  { %9762 = vsyncpa [#allocation30], 1 }
0x4b94   :  { %9763 = vsyncpa [#allocation33], 1 }
0x4b95   :  { %9764 = vsyncpa [#allocation4], 1 }
0x4b96   :  { %9766 = vsyncpa [#allocation4 + $0x1], 1 }

</bundles_post_ra>
